<compile_context>
chip_gen: v7x
topology: tpu7x:2x2x1
jax: 0.10.0
libtpu: 0.0.40
codegen_flags: <defaults>
</compile_context>

<pallas_src>
import functools

import numpy as np
import jax
import jax.numpy as jnp
from jax import lax
from jax.experimental import pallas as pl
from jax.experimental.pallas import tpu as pltpu

# ---------------- config ----------------
NC = 4        # c.nc
NDF = 8       # c.ndf
KD = 4        # c.kd
LRELU_SLOPE = 0.2
IN_EPS = 1e-5  # PyTorch InstanceNorm2d default eps, affine=False


def _conv_out(size, k, stride, pad):
    return (size + 2 * pad - k) // stride + 1


def _gather_matrix(ih, iw, k, stride, pad):
    """Static 0/1 tensor G of shape (k*k, IH*IW, OH*OW).

    G[t, i, p] = 1 iff (zero-padded) input pixel i is read by conv tap t = kh*k + kw at
    output pixel p = oy*OW + ox.
    """
    oh = _conv_out(ih, k, stride, pad)
    ow = _conv_out(iw, k, stride, pad)
    g = np.zeros((k * k, ih * iw, oh * ow), dtype=np.float32)
    for kh in range(k):
        for kw in range(k):
            t = kh * k + kw
            for oy in range(oh):
                iy = oy * stride + kh - pad
                if not (0 <= iy < ih):
                    continue
                for ox in range(ow):
                    ix = ox * stride + kw - pad
                    if not (0 <= ix < iw):
                        continue
                    g[t, iy * iw + ix, oy * ow + ox] = 1.0
    return g, oh, ow


# --------------------------- fused Pallas kernel ---------------------------
def _discriminator_kernel(x_ref,
                          d1, d2, d3, d4, d5,
                          s1, s2, s3, s4, s5,
                          t1, t2, t3, t4, t5,
                          w6_ref, o_ref, *, n_batch):
    """Whole Discriminator forward, all samples at once, fully VMEM-resident.

    x_ref : (N, NC*H*W)            input, NCHW flattened into the lane dim (batch in sublanes)
    dL    : (CinL*IHWL, CoutL*OHWL) bf16 dense conv operator (weights folded with gather)
    sL    : (CoutL*OHWL, CoutL)     f32 0/1 per-channel segment-sum matrix
    tL    : (CoutL, CoutL*OHWL)     f32 0/1 per-channel broadcast matrix (== sL^T)
    w6_ref: (1, C5*OH5*OW5)         conv6 folded into an elementwise weight (VPU path)
    o_ref : (N, 128)                score per sample, broadcast across the 128 lanes
    """
    act = x_ref[...]                                                     # (N, C*HW) f32
    layers = ((d1, s1, t1), (d2, s2, t2), (d3, s3, t3), (d4, s4, t4), (d5, s5, t5))

    for d_ref, s_ref, st_ref in layers:
        cout = s_ref.shape[1]
        ohw = s_ref.shape[0] // cout

        # Conv2d(bias=False): ONE lane-dense bf16 MXU matmul for the whole batch.
        y = jnp.dot(act.astype(jnp.bfloat16), d_ref[...],
                    preferred_element_type=jnp.float32)                  # (N, Cout*OHW) f32

        # InstanceNorm2d(affine=False), single pass: sums & sums-of-squares in one matmul.
        ysq = jnp.concatenate([y, y * y], axis=0)                        # (2N, Cout*OHW)
        stats = jnp.dot(ysq, s_ref[...],
                        preferred_element_type=jnp.float32)              # (2N, Cout)
        inv = 1.0 / float(ohw)
        mean = stats[:n_batch] * inv
        ex2 = stats[n_batch:] * inv
        var = jnp.maximum(ex2 - mean * mean, 0.0)
        rstd = lax.rsqrt(var + IN_EPS)

        # Broadcast (rstd, mean*rstd) back to the per-pixel lanes in one matmul.
        ab = jnp.concatenate([rstd, mean * rstd], axis=0)                # (2N, Cout)
        ab_bc = jnp.dot(ab, st_ref[...],
                        preferred_element_type=jnp.float32)              # (2N, Cout*OHW)
        yn = y * ab_bc[:n_batch] - ab_bc[n_batch:]

        # LeakyReLU(0.2)
        act = jnp.maximum(yn, LRELU_SLOPE * yn)                          # (N, Cout*OHW)

    # conv6: 512 -> 1 scalar per sample.  Elementwise multiply + lane reduce (VPU/XLU)
    # instead of a 1-lane-wide MXU matmul.
    score = jnp.sum(act * w6_ref[...], axis=1, keepdims=True)            # (N, 1)
    o_ref[...] = jnp.broadcast_to(score, (n_batch, 128))                 # single full store


# --------------------------- host-side (one-time) weight prep ---------------------------
def prepare_params(weights, input_hw):
    """Shape-static preprocessing of the PyTorch-layout (OIHW) weights.  Done once."""
    w1, w2, w3, w4, w5, w6 = (np.asarray(w, np.float32) for w in weights)
    k = KD
    kk = k * k

    dense_ops, seg, seg_t = [], [], []
    ih, iw = input_hw
    for wl in (w1, w2, w3, w4, w5):
        cout, cin = wl.shape[0], wl.shape[1]
        g, oh, ow = _gather_matrix(ih, iw, k, 2, 2)                 # (kk, IHW, OHW)
        taps = wl.transpose(2, 3, 0, 1).reshape(kk, cout, cin)      # (kk, Cout, Cin)
        # Dense per-layer operator: D[ci*IHW + i, co*OHW + p] = sum_t G[t,i,p] * W[t,co,ci]
        d4 = np.einsum('tip,toc->ciop', g, taps)                    # (Cin, IHW, Cout, OHW)
        d = d4.reshape(cin * ih * iw, cout * oh * ow)
        dense_ops.append(jnp.asarray(d, jnp.bfloat16))              # bf16: halves constant DMA
        # Per-channel segment-sum (exact 0/1) and its transpose for broadcast.
        s = np.kron(np.eye(cout, dtype=np.float32), np.ones((oh * ow, 1), np.float32))
        seg.append(jnp.asarray(s))                                  # (Cout*OHW, Cout) f32
        seg_t.append(jnp.asarray(np.ascontiguousarray(s.T)))        # (Cout, Cout*OHW) f32
        ih, iw = oh, ow

    # conv6: k=4, stride=2, pad=1 on the (ih, iw)=conv5 output -> a single 1x1 output pixel.
    assert _conv_out(ih, k, 2, 1) == 1 and _conv_out(iw, k, 2, 1) == 1
    assert w6.shape[0] == 1
    c5 = w6.shape[1]
    w6_vec = np.zeros((1, c5 * ih * iw), np.float32)
    for kh in range(k):
        for kw in range(k):
            iy, ix = kh - 1, kw - 1                 # output pixel (0,0): 0*stride + kh - pad
            if 0 <= iy < ih and 0 <= ix < iw:
                w6_vec[0, np.arange(c5) * (ih * iw) + iy * iw + ix] += w6[0, :, kh, kw]

    return tuple(dense_ops), tuple(seg), tuple(seg_t), jnp.asarray(w6_vec)


# --------------------------- forward ---------------------------
@jax.jit
def discriminator_forward(x, params):
    """Fused Discriminator forward.  x: (N, NC, H, W) -> (N, 1, 1, 1)."""
    dense_ops, seg, seg_t, w6_vec = params
    n, c, h, w = x.shape
    x_flat = x.reshape(n, c * h * w).astype(jnp.float32)   # batch in sublanes, NCHW in lanes

    kernel = functools.partial(_discriminator_kernel, n_batch=n)
    vmem_spec = pl.BlockSpec(memory_space=pltpu.MemorySpace.VMEM)
    n_inputs = 1 + len(dense_ops) + len(seg) + len(seg_t) + 1

    out = pl.pallas_call(
        kernel,
        out_shape=jax.ShapeDtypeStruct((n, 128), jnp.float32),
        in_specs=[vmem_spec] * n_inputs,
        out_specs=vmem_spec,
    )(x_flat, *dense_ops, *seg, *seg_t, w6_vec)
    return out[:, :1].reshape(n, 1, 1, 1)


# ---------------- pure-JAX reference (for validation only) ----------------
def _ref_conv(x, w, stride, pad):
    return lax.conv_general_dilated(
        x, w, (stride, stride), [(pad, pad), (pad, pad)],
        dimension_numbers=("NCHW", "OIHW", "NCHW"))


def _ref_forward(x, weights):
    for w in weights[:5]:
        x = _ref_conv(x, w, 2, 2)
        m = x.mean(axis=(2, 3), keepdims=True)
        v = ((x - m) ** 2).mean(axis=(2, 3), keepdims=True)
        x = (x - m) * lax.rsqrt(v + IN_EPS)
        x = jnp.where(x >= 0, x, LRELU_SLOPE * x)
    return _ref_conv(x, weights[5], 2, 1)


# ---------------- main ----------------
if __name__ == "__main__":
    key = jax.random.PRNGKey(0)
    k_x, k1, k2, k3, k4, k5, k6 = jax.random.split(key, 7)

    N, H, W = 2, 16, 16
    x = jax.random.normal(k_x, (N, NC, H, W), dtype=jnp.float32)

    def init_w(k, cout, cin):
        return 0.02 * jax.random.normal(k, (cout, cin, KD, KD), dtype=jnp.float32)

    weights = (
        init_w(k1, NDF, NC),            # conv1: nc      -> ndf
        init_w(k2, NDF * 2, NDF),       # conv2: ndf     -> ndf*2
        init_w(k3, NDF * 4, NDF * 2),   # conv3: ndf*2   -> ndf*4
        init_w(k4, NDF * 8, NDF * 4),   # conv4: ndf*4   -> ndf*8
        init_w(k5, NDF * 16, NDF * 8),  # conv5: ndf*8   -> ndf*16
        init_w(k6, 1, NDF * 16),        # conv6: ndf*16  -> 1
    )

    params = prepare_params(weights, (H, W))   # one-time, shape-static

    out = jax.block_until_ready(discriminator_forward(x, params))
    ref = jax.block_until_ready(_ref_forward(x, weights))

    assert out.shape == (N, 1, 1, 1), out.shape
    # Tolerance loosened vs f32 reference because the folded conv operators are stored in
    # bf16 (per perf review); accumulation and normalization stay f32.
    assert jnp.allclose(out, ref, rtol=5e-2, atol=5e-2), (out, ref)

    print("KERNEL_OK")
</pallas_src>

<mosaic_0001>
module attributes {stable_mosaic.version = 11 : i64} {
  func.func @_discriminator_kernel(%arg0: memref<2x1024xf32, #tpu.memory_space<vmem>>, %arg1: memref<1024x648xbf16, #tpu.memory_space<vmem>>, %arg2: memref<648x400xbf16, #tpu.memory_space<vmem>>, %arg3: memref<400x288xbf16, #tpu.memory_space<vmem>>, %arg4: memref<288x256xbf16, #tpu.memory_space<vmem>>, %arg5: memref<256x512xbf16, #tpu.memory_space<vmem>>, %arg6: memref<648x8xf32, #tpu.memory_space<vmem>>, %arg7: memref<400x16xf32, #tpu.memory_space<vmem>>, %arg8: memref<288x32xf32, #tpu.memory_space<vmem>>, %arg9: memref<256x64xf32, #tpu.memory_space<vmem>>, %arg10: memref<512x128xf32, #tpu.memory_space<vmem>>, %arg11: memref<8x648xf32, #tpu.memory_space<vmem>>, %arg12: memref<16x400xf32, #tpu.memory_space<vmem>>, %arg13: memref<32x288xf32, #tpu.memory_space<vmem>>, %arg14: memref<64x256xf32, #tpu.memory_space<vmem>>, %arg15: memref<128x512xf32, #tpu.memory_space<vmem>>, %arg16: memref<1x512xf32, #tpu.memory_space<vmem>>, %arg17: memref<2x128xf32, #tpu.memory_space<vmem>>) attributes {dimension_semantics = [], scalar_prefetch = 0 : i64, scratch_operands = 0 : i64, tpu.core_type = #tpu.core_type<tc>} {
    %c0 = arith.constant 0 : index
    %c0_0 = arith.constant 0 : index
    %0 = vector.load %arg0[%c0, %c0_0] : memref<2x1024xf32, #tpu.memory_space<vmem>>, vector<2x1024xf32>
    %1 = arith.truncf %0 : vector<2x1024xf32> to vector<2x1024xbf16>
    %c0_1 = arith.constant 0 : index
    %c0_2 = arith.constant 0 : index
    %2 = vector.load %arg1[%c0_1, %c0_2] : memref<1024x648xbf16, #tpu.memory_space<vmem>>, vector<1024x648xbf16>
    %cst = arith.constant dense<0.000000e+00> : vector<2x648xf32>
    %3 = tpu.matmul %1, %2, %cst {dimension_numbers = #tpu.dot_dimension_numbers<[1], [0], [0], [1], [0, 0, 1, 1], [], []>} : vector<2x1024xbf16>, vector<1024x648xbf16>, vector<2x648xf32> -> vector<2x648xf32>
    %4 = arith.mulf %3, %3 : vector<2x648xf32>
    %5 = tpu.concatenate %3, %4 in 0 : vector<2x648xf32>, vector<2x648xf32> -> vector<4x648xf32>
    %c0_3 = arith.constant 0 : index
    %c0_4 = arith.constant 0 : index
    %6 = vector.load %arg6[%c0_3, %c0_4] : memref<648x8xf32, #tpu.memory_space<vmem>>, vector<648x8xf32>
    %cst_5 = arith.constant dense<0.000000e+00> : vector<4x8xf32>
    %7 = tpu.matmul %5, %6, %cst_5 {dimension_numbers = #tpu.dot_dimension_numbers<[1], [0], [0], [1], [0, 0, 1, 1], [], []>} : vector<4x648xf32>, vector<648x8xf32>, vector<4x8xf32> -> vector<4x8xf32>
    %8 = vector.extract_strided_slice %7 {offsets = [0, 0], sizes = [2, 8], strides = [1, 1]} : vector<4x8xf32> to vector<2x8xf32>
    %cst_6 = arith.constant 0.0123456791 : f32
    %9 = vector.broadcast %cst_6 : f32 to vector<2x8xf32>
    %10 = arith.mulf %8, %9 : vector<2x8xf32>
    %11 = vector.extract_strided_slice %7 {offsets = [2, 0], sizes = [2, 8], strides = [1, 1]} : vector<4x8xf32> to vector<2x8xf32>
    %cst_7 = arith.constant 0.0123456791 : f32
    %12 = vector.broadcast %cst_7 : f32 to vector<2x8xf32>
    %13 = arith.mulf %11, %12 : vector<2x8xf32>
    %14 = arith.mulf %10, %10 : vector<2x8xf32>
    %15 = arith.subf %13, %14 : vector<2x8xf32>
    %cst_8 = arith.constant 0.000000e+00 : f32
    %16 = vector.broadcast %cst_8 : f32 to vector<2x8xf32>
    %17 = arith.maximumf %15, %16 : vector<2x8xf32>
    %cst_9 = arith.constant 9.99999974E-6 : f32
    %18 = vector.broadcast %cst_9 : f32 to vector<2x8xf32>
    %19 = arith.addf %17, %18 : vector<2x8xf32>
    %20 = math.rsqrt %19 : vector<2x8xf32>
    %21 = arith.mulf %10, %20 : vector<2x8xf32>
    %22 = tpu.concatenate %20, %21 in 0 : vector<2x8xf32>, vector<2x8xf32> -> vector<4x8xf32>
    %c0_10 = arith.constant 0 : index
    %c0_11 = arith.constant 0 : index
    %23 = vector.load %arg11[%c0_10, %c0_11] : memref<8x648xf32, #tpu.memory_space<vmem>>, vector<8x648xf32>
    %cst_12 = arith.constant dense<0.000000e+00> : vector<4x648xf32>
    %24 = tpu.matmul %22, %23, %cst_12 {dimension_numbers = #tpu.dot_dimension_numbers<[1], [0], [0], [1], [0, 0, 1, 1], [], []>} : vector<4x8xf32>, vector<8x648xf32>, vector<4x648xf32> -> vector<4x648xf32>
    %25 = vector.extract_strided_slice %24 {offsets = [0, 0], sizes = [2, 648], strides = [1, 1]} : vector<4x648xf32> to vector<2x648xf32>
    %26 = arith.mulf %3, %25 : vector<2x648xf32>
    %27 = vector.extract_strided_slice %24 {offsets = [2, 0], sizes = [2, 648], strides = [1, 1]} : vector<4x648xf32> to vector<2x648xf32>
    %28 = arith.subf %26, %27 : vector<2x648xf32>
    %cst_13 = arith.constant 2.000000e-01 : f32
    %29 = vector.broadcast %cst_13 : f32 to vector<2x648xf32>
    %30 = arith.mulf %29, %28 : vector<2x648xf32>
    %31 = arith.maximumf %28, %30 : vector<2x648xf32>
    %32 = arith.truncf %31 : vector<2x648xf32> to vector<2x648xbf16>
    %c0_14 = arith.constant 0 : index
    %c0_15 = arith.constant 0 : index
    %33 = vector.load %arg2[%c0_14, %c0_15] : memref<648x400xbf16, #tpu.memory_space<vmem>>, vector<648x400xbf16>
    %cst_16 = arith.constant dense<0.000000e+00> : vector<2x400xf32>
    %34 = tpu.matmul %32, %33, %cst_16 {dimension_numbers = #tpu.dot_dimension_numbers<[1], [0], [0], [1], [0, 0, 1, 1], [], []>} : vector<2x648xbf16>, vector<648x400xbf16>, vector<2x400xf32> -> vector<2x400xf32>
    %35 = arith.mulf %34, %34 : vector<2x400xf32>
    %36 = tpu.concatenate %34, %35 in 0 : vector<2x400xf32>, vector<2x400xf32> -> vector<4x400xf32>
    %c0_17 = arith.constant 0 : index
    %c0_18 = arith.constant 0 : index
    %37 = vector.load %arg7[%c0_17, %c0_18] : memref<400x16xf32, #tpu.memory_space<vmem>>, vector<400x16xf32>
    %cst_19 = arith.constant dense<0.000000e+00> : vector<4x16xf32>
    %38 = tpu.matmul %36, %37, %cst_19 {dimension_numbers = #tpu.dot_dimension_numbers<[1], [0], [0], [1], [0, 0, 1, 1], [], []>} : vector<4x400xf32>, vector<400x16xf32>, vector<4x16xf32> -> vector<4x16xf32>
    %39 = vector.extract_strided_slice %38 {offsets = [0, 0], sizes = [2, 16], strides = [1, 1]} : vector<4x16xf32> to vector<2x16xf32>
    %cst_20 = arith.constant 4.000000e-02 : f32
    %40 = vector.broadcast %cst_20 : f32 to vector<2x16xf32>
    %41 = arith.mulf %39, %40 : vector<2x16xf32>
    %42 = vector.extract_strided_slice %38 {offsets = [2, 0], sizes = [2, 16], strides = [1, 1]} : vector<4x16xf32> to vector<2x16xf32>
    %cst_21 = arith.constant 4.000000e-02 : f32
    %43 = vector.broadcast %cst_21 : f32 to vector<2x16xf32>
    %44 = arith.mulf %42, %43 : vector<2x16xf32>
    %45 = arith.mulf %41, %41 : vector<2x16xf32>
    %46 = arith.subf %44, %45 : vector<2x16xf32>
    %cst_22 = arith.constant 0.000000e+00 : f32
    %47 = vector.broadcast %cst_22 : f32 to vector<2x16xf32>
    %48 = arith.maximumf %46, %47 : vector<2x16xf32>
    %cst_23 = arith.constant 9.99999974E-6 : f32
    %49 = vector.broadcast %cst_23 : f32 to vector<2x16xf32>
    %50 = arith.addf %48, %49 : vector<2x16xf32>
    %51 = math.rsqrt %50 : vector<2x16xf32>
    %52 = arith.mulf %41, %51 : vector<2x16xf32>
    %53 = tpu.concatenate %51, %52 in 0 : vector<2x16xf32>, vector<2x16xf32> -> vector<4x16xf32>
    %c0_24 = arith.constant 0 : index
    %c0_25 = arith.constant 0 : index
    %54 = vector.load %arg12[%c0_24, %c0_25] : memref<16x400xf32, #tpu.memory_space<vmem>>, vector<16x400xf32>
    %cst_26 = arith.constant dense<0.000000e+00> : vector<4x400xf32>
    %55 = tpu.matmul %53, %54, %cst_26 {dimension_numbers = #tpu.dot_dimension_numbers<[1], [0], [0], [1], [0, 0, 1, 1], [], []>} : vector<4x16xf32>, vector<16x400xf32>, vector<4x400xf32> -> vector<4x400xf32>
    %56 = vector.extract_strided_slice %55 {offsets = [0, 0], sizes = [2, 400], strides = [1, 1]} : vector<4x400xf32> to vector<2x400xf32>
    %57 = arith.mulf %34, %56 : vector<2x400xf32>
    %58 = vector.extract_strided_slice %55 {offsets = [2, 0], sizes = [2, 400], strides = [1, 1]} : vector<4x400xf32> to vector<2x400xf32>
    %59 = arith.subf %57, %58 : vector<2x400xf32>
    %cst_27 = arith.constant 2.000000e-01 : f32
    %60 = vector.broadcast %cst_27 : f32 to vector<2x400xf32>
    %61 = arith.mulf %60, %59 : vector<2x400xf32>
    %62 = arith.maximumf %59, %61 : vector<2x400xf32>
    %63 = arith.truncf %62 : vector<2x400xf32> to vector<2x400xbf16>
    %c0_28 = arith.constant 0 : index
    %c0_29 = arith.constant 0 : index
    %64 = vector.load %arg3[%c0_28, %c0_29] : memref<400x288xbf16, #tpu.memory_space<vmem>>, vector<400x288xbf16>
    %cst_30 = arith.constant dense<0.000000e+00> : vector<2x288xf32>
    %65 = tpu.matmul %63, %64, %cst_30 {dimension_numbers = #tpu.dot_dimension_numbers<[1], [0], [0], [1], [0, 0, 1, 1], [], []>} : vector<2x400xbf16>, vector<400x288xbf16>, vector<2x288xf32> -> vector<2x288xf32>
    %66 = arith.mulf %65, %65 : vector<2x288xf32>
    %67 = tpu.concatenate %65, %66 in 0 : vector<2x288xf32>, vector<2x288xf32> -> vector<4x288xf32>
    %c0_31 = arith.constant 0 : index
    %c0_32 = arith.constant 0 : index
    %68 = vector.load %arg8[%c0_31, %c0_32] : memref<288x32xf32, #tpu.memory_space<vmem>>, vector<288x32xf32>
    %cst_33 = arith.constant dense<0.000000e+00> : vector<4x32xf32>
    %69 = tpu.matmul %67, %68, %cst_33 {dimension_numbers = #tpu.dot_dimension_numbers<[1], [0], [0], [1], [0, 0, 1, 1], [], []>} : vector<4x288xf32>, vector<288x32xf32>, vector<4x32xf32> -> vector<4x32xf32>
    %70 = vector.extract_strided_slice %69 {offsets = [0, 0], sizes = [2, 32], strides = [1, 1]} : vector<4x32xf32> to vector<2x32xf32>
    %cst_34 = arith.constant 0.111111112 : f32
    %71 = vector.broadcast %cst_34 : f32 to vector<2x32xf32>
    %72 = arith.mulf %70, %71 : vector<2x32xf32>
    %73 = vector.extract_strided_slice %69 {offsets = [2, 0], sizes = [2, 32], strides = [1, 1]} : vector<4x32xf32> to vector<2x32xf32>
    %cst_35 = arith.constant 0.111111112 : f32
    %74 = vector.broadcast %cst_35 : f32 to vector<2x32xf32>
    %75 = arith.mulf %73, %74 : vector<2x32xf32>
    %76 = arith.mulf %72, %72 : vector<2x32xf32>
    %77 = arith.subf %75, %76 : vector<2x32xf32>
    %cst_36 = arith.constant 0.000000e+00 : f32
    %78 = vector.broadcast %cst_36 : f32 to vector<2x32xf32>
    %79 = arith.maximumf %77, %78 : vector<2x32xf32>
    %cst_37 = arith.constant 9.99999974E-6 : f32
    %80 = vector.broadcast %cst_37 : f32 to vector<2x32xf32>
    %81 = arith.addf %79, %80 : vector<2x32xf32>
    %82 = math.rsqrt %81 : vector<2x32xf32>
    %83 = arith.mulf %72, %82 : vector<2x32xf32>
    %84 = tpu.concatenate %82, %83 in 0 : vector<2x32xf32>, vector<2x32xf32> -> vector<4x32xf32>
    %c0_38 = arith.constant 0 : index
    %c0_39 = arith.constant 0 : index
    %85 = vector.load %arg13[%c0_38, %c0_39] : memref<32x288xf32, #tpu.memory_space<vmem>>, vector<32x288xf32>
    %cst_40 = arith.constant dense<0.000000e+00> : vector<4x288xf32>
    %86 = tpu.matmul %84, %85, %cst_40 {dimension_numbers = #tpu.dot_dimension_numbers<[1], [0], [0], [1], [0, 0, 1, 1], [], []>} : vector<4x32xf32>, vector<32x288xf32>, vector<4x288xf32> -> vector<4x288xf32>
    %87 = vector.extract_strided_slice %86 {offsets = [0, 0], sizes = [2, 288], strides = [1, 1]} : vector<4x288xf32> to vector<2x288xf32>
    %88 = arith.mulf %65, %87 : vector<2x288xf32>
    %89 = vector.extract_strided_slice %86 {offsets = [2, 0], sizes = [2, 288], strides = [1, 1]} : vector<4x288xf32> to vector<2x288xf32>
    %90 = arith.subf %88, %89 : vector<2x288xf32>
    %cst_41 = arith.constant 2.000000e-01 : f32
    %91 = vector.broadcast %cst_41 : f32 to vector<2x288xf32>
    %92 = arith.mulf %91, %90 : vector<2x288xf32>
    %93 = arith.maximumf %90, %92 : vector<2x288xf32>
    %94 = arith.truncf %93 : vector<2x288xf32> to vector<2x288xbf16>
    %c0_42 = arith.constant 0 : index
    %c0_43 = arith.constant 0 : index
    %95 = vector.load %arg4[%c0_42, %c0_43] : memref<288x256xbf16, #tpu.memory_space<vmem>>, vector<288x256xbf16>
    %cst_44 = arith.constant dense<0.000000e+00> : vector<2x256xf32>
    %96 = tpu.matmul %94, %95, %cst_44 {dimension_numbers = #tpu.dot_dimension_numbers<[1], [0], [0], [1], [0, 0, 1, 1], [], []>} : vector<2x288xbf16>, vector<288x256xbf16>, vector<2x256xf32> -> vector<2x256xf32>
    %97 = arith.mulf %96, %96 : vector<2x256xf32>
    %98 = tpu.concatenate %96, %97 in 0 : vector<2x256xf32>, vector<2x256xf32> -> vector<4x256xf32>
    %c0_45 = arith.constant 0 : index
    %c0_46 = arith.constant 0 : index
    %99 = vector.load %arg9[%c0_45, %c0_46] : memref<256x64xf32, #tpu.memory_space<vmem>>, vector<256x64xf32>
    %cst_47 = arith.constant dense<0.000000e+00> : vector<4x64xf32>
    %100 = tpu.matmul %98, %99, %cst_47 {dimension_numbers = #tpu.dot_dimension_numbers<[1], [0], [0], [1], [0, 0, 1, 1], [], []>} : vector<4x256xf32>, vector<256x64xf32>, vector<4x64xf32> -> vector<4x64xf32>
    %101 = vector.extract_strided_slice %100 {offsets = [0, 0], sizes = [2, 64], strides = [1, 1]} : vector<4x64xf32> to vector<2x64xf32>
    %cst_48 = arith.constant 2.500000e-01 : f32
    %102 = vector.broadcast %cst_48 : f32 to vector<2x64xf32>
    %103 = arith.mulf %101, %102 : vector<2x64xf32>
    %104 = vector.extract_strided_slice %100 {offsets = [2, 0], sizes = [2, 64], strides = [1, 1]} : vector<4x64xf32> to vector<2x64xf32>
    %cst_49 = arith.constant 2.500000e-01 : f32
    %105 = vector.broadcast %cst_49 : f32 to vector<2x64xf32>
    %106 = arith.mulf %104, %105 : vector<2x64xf32>
    %107 = arith.mulf %103, %103 : vector<2x64xf32>
    %108 = arith.subf %106, %107 : vector<2x64xf32>
    %cst_50 = arith.constant 0.000000e+00 : f32
    %109 = vector.broadcast %cst_50 : f32 to vector<2x64xf32>
    %110 = arith.maximumf %108, %109 : vector<2x64xf32>
    %cst_51 = arith.constant 9.99999974E-6 : f32
    %111 = vector.broadcast %cst_51 : f32 to vector<2x64xf32>
    %112 = arith.addf %110, %111 : vector<2x64xf32>
    %113 = math.rsqrt %112 : vector<2x64xf32>
    %114 = arith.mulf %103, %113 : vector<2x64xf32>
    %115 = tpu.concatenate %113, %114 in 0 : vector<2x64xf32>, vector<2x64xf32> -> vector<4x64xf32>
    %c0_52 = arith.constant 0 : index
    %c0_53 = arith.constant 0 : index
    %116 = vector.load %arg14[%c0_52, %c0_53] : memref<64x256xf32, #tpu.memory_space<vmem>>, vector<64x256xf32>
    %cst_54 = arith.constant dense<0.000000e+00> : vector<4x256xf32>
    %117 = tpu.matmul %115, %116, %cst_54 {dimension_numbers = #tpu.dot_dimension_numbers<[1], [0], [0], [1], [0, 0, 1, 1], [], []>} : vector<4x64xf32>, vector<64x256xf32>, vector<4x256xf32> -> vector<4x256xf32>
    %118 = vector.extract_strided_slice %117 {offsets = [0, 0], sizes = [2, 256], strides = [1, 1]} : vector<4x256xf32> to vector<2x256xf32>
    %119 = arith.mulf %96, %118 : vector<2x256xf32>
    %120 = vector.extract_strided_slice %117 {offsets = [2, 0], sizes = [2, 256], strides = [1, 1]} : vector<4x256xf32> to vector<2x256xf32>
    %121 = arith.subf %119, %120 : vector<2x256xf32>
    %cst_55 = arith.constant 2.000000e-01 : f32
    %122 = vector.broadcast %cst_55 : f32 to vector<2x256xf32>
    %123 = arith.mulf %122, %121 : vector<2x256xf32>
    %124 = arith.maximumf %121, %123 : vector<2x256xf32>
    %125 = arith.truncf %124 : vector<2x256xf32> to vector<2x256xbf16>
    %c0_56 = arith.constant 0 : index
    %c0_57 = arith.constant 0 : index
    %126 = vector.load %arg5[%c0_56, %c0_57] : memref<256x512xbf16, #tpu.memory_space<vmem>>, vector<256x512xbf16>
    %cst_58 = arith.constant dense<0.000000e+00> : vector<2x512xf32>
    %127 = tpu.matmul %125, %126, %cst_58 {dimension_numbers = #tpu.dot_dimension_numbers<[1], [0], [0], [1], [0, 0, 1, 1], [], []>} : vector<2x256xbf16>, vector<256x512xbf16>, vector<2x512xf32> -> vector<2x512xf32>
    %128 = arith.mulf %127, %127 : vector<2x512xf32>
    %129 = tpu.concatenate %127, %128 in 0 : vector<2x512xf32>, vector<2x512xf32> -> vector<4x512xf32>
    %c0_59 = arith.constant 0 : index
    %c0_60 = arith.constant 0 : index
    %130 = vector.load %arg10[%c0_59, %c0_60] : memref<512x128xf32, #tpu.memory_space<vmem>>, vector<512x128xf32>
    %cst_61 = arith.constant dense<0.000000e+00> : vector<4x128xf32>
    %131 = tpu.matmul %129, %130, %cst_61 {dimension_numbers = #tpu.dot_dimension_numbers<[1], [0], [0], [1], [0, 0, 1, 1], [], []>} : vector<4x512xf32>, vector<512x128xf32>, vector<4x128xf32> -> vector<4x128xf32>
    %132 = vector.extract_strided_slice %131 {offsets = [0, 0], sizes = [2, 128], strides = [1, 1]} : vector<4x128xf32> to vector<2x128xf32>
    %cst_62 = arith.constant 2.500000e-01 : f32
    %133 = vector.broadcast %cst_62 : f32 to vector<2x128xf32>
    %134 = arith.mulf %132, %133 : vector<2x128xf32>
    %135 = vector.extract_strided_slice %131 {offsets = [2, 0], sizes = [2, 128], strides = [1, 1]} : vector<4x128xf32> to vector<2x128xf32>
    %cst_63 = arith.constant 2.500000e-01 : f32
    %136 = vector.broadcast %cst_63 : f32 to vector<2x128xf32>
    %137 = arith.mulf %135, %136 : vector<2x128xf32>
    %138 = arith.mulf %134, %134 : vector<2x128xf32>
    %139 = arith.subf %137, %138 : vector<2x128xf32>
    %cst_64 = arith.constant 0.000000e+00 : f32
    %140 = vector.broadcast %cst_64 : f32 to vector<2x128xf32>
    %141 = arith.maximumf %139, %140 : vector<2x128xf32>
    %cst_65 = arith.constant 9.99999974E-6 : f32
    %142 = vector.broadcast %cst_65 : f32 to vector<2x128xf32>
    %143 = arith.addf %141, %142 : vector<2x128xf32>
    %144 = math.rsqrt %143 : vector<2x128xf32>
    %145 = arith.mulf %134, %144 : vector<2x128xf32>
    %146 = tpu.concatenate %144, %145 in 0 : vector<2x128xf32>, vector<2x128xf32> -> vector<4x128xf32>
    %c0_66 = arith.constant 0 : index
    %c0_67 = arith.constant 0 : index
    %147 = vector.load %arg15[%c0_66, %c0_67] : memref<128x512xf32, #tpu.memory_space<vmem>>, vector<128x512xf32>
    %cst_68 = arith.constant dense<0.000000e+00> : vector<4x512xf32>
    %148 = tpu.matmul %146, %147, %cst_68 {dimension_numbers = #tpu.dot_dimension_numbers<[1], [0], [0], [1], [0, 0, 1, 1], [], []>} : vector<4x128xf32>, vector<128x512xf32>, vector<4x512xf32> -> vector<4x512xf32>
    %149 = vector.extract_strided_slice %148 {offsets = [0, 0], sizes = [2, 512], strides = [1, 1]} : vector<4x512xf32> to vector<2x512xf32>
    %150 = arith.mulf %127, %149 : vector<2x512xf32>
    %151 = vector.extract_strided_slice %148 {offsets = [2, 0], sizes = [2, 512], strides = [1, 1]} : vector<4x512xf32> to vector<2x512xf32>
    %152 = arith.subf %150, %151 : vector<2x512xf32>
    %cst_69 = arith.constant 2.000000e-01 : f32
    %153 = vector.broadcast %cst_69 : f32 to vector<2x512xf32>
    %154 = arith.mulf %153, %152 : vector<2x512xf32>
    %155 = arith.maximumf %152, %154 : vector<2x512xf32>
    %c0_70 = arith.constant 0 : index
    %c0_71 = arith.constant 0 : index
    %156 = vector.load %arg16[%c0_70, %c0_71] : memref<1x512xf32, #tpu.memory_space<vmem>>, vector<1x512xf32>
    %157 = vector.broadcast %156 : vector<1x512xf32> to vector<2x512xf32>
    %158 = arith.mulf %155, %157 : vector<2x512xf32>
    %cst_72 = arith.constant dense<0.000000e+00> : vector<2xf32>
    %159 = vector.multi_reduction <add>, %158, %cst_72 [1] : vector<2x512xf32> to vector<2xf32>
    %160 = vector.shape_cast %159 : vector<2xf32> to vector<2x1xf32>
    %161 = vector.shape_cast %160 : vector<2x1xf32> to vector<2x1xf32>
    %162 = vector.broadcast %161 : vector<2x1xf32> to vector<2x128xf32>
    %c0_73 = arith.constant 0 : index
    %c0_74 = arith.constant 0 : index
    %163 = vector.load %arg17[%c0_73, %c0_74] : memref<2x128xf32, #tpu.memory_space<vmem>>, vector<2x128xf32>
    tpu.vector_store %arg17[%c0_73, %c0_74], %162 {strides = array<i32>} : memref<2x128xf32, #tpu.memory_space<vmem>>, vector<2x128xf32>,
    return
  }
}

</mosaic_0001>

<bundles_post_ra>
// kernel: discriminator_forward.1
= control target key start
LH: loop header
LB: loop body
LE: loop exit
PB: predicated region body
PF: predicated region fallthrough
CT: control target
= control target key end

     0   :  { %v10315_v23 = vmov 1983009808   ;;  %v65_v25 = vlaneseq  ;;  %vm2931_vm0 = vcmask 1041408   ;;  %vm3019_vm1 = vcmask 64512   ;;  %s13985_s1 = inlined_call_operand.vmem [shape: bf16[1024,648], index: 1, kind: input, shape index: {}]   ;;  %s13986_s0 = inlined_call_operand.vmem [shape: f32[2,1024], index: 0, kind: input, shape index: {}]   ;;  %s13987_s6 = inlined_call_operand.vmem [shape: f32[648,8], index: 6, kind: input, shape index: {}]   ;;  %s13988_s11 = inlined_call_operand.vmem [shape: f32[8,648], index: 11, kind: input, shape index: {}]   ;;  %s13989_s2 = inlined_call_operand.vmem [shape: bf16[648,400], index: 2, kind: input, shape index: {}]   ;;  %s13990_s7 = inlined_call_operand.vmem [shape: f32[400,16], index: 7, kind: input, shape index: {}]   ;;  %s13991_s12 = inlined_call_operand.vmem [shape: f32[16,400], index: 12, kind: input, shape index: {}]   ;;  %s13992_s3 = inlined_call_operand.vmem [shape: bf16[400,288], index: 3, kind: input, shape index: {}]   ;;  %s13993_s8 = inlined_call_operand.vmem [shape: f32[288,32], index: 8, kind: input, shape index: {}]   ;;  %s13994_s13 = inlined_call_operand.vmem [shape: f32[32,288], index: 13, kind: input, shape index: {}]   ;;  %s13995_s4 = inlined_call_operand.vmem [shape: bf16[288,256], index: 4, kind: input, shape index: {}]   ;;  %s13996_s9 = inlined_call_operand.vmem [shape: f32[256,64], index: 9, kind: input, shape index: {}]   ;;  %s13997_s14 = inlined_call_operand.vmem [shape: f32[64,256], index: 14, kind: input, shape index: {}]   ;;  %s13998_s5 = inlined_call_operand.vmem [shape: bf16[256,512], index: 5, kind: input, shape index: {}]   ;;  %s13999_s10 = inlined_call_operand.vmem [shape: f32[512,128], index: 10, kind: input, shape index: {}]   ;;  %s14000_s15 = inlined_call_operand.vmem [shape: f32[128,512], index: 15, kind: input, shape index: {}]   ;;  %s14001_s16 = inlined_call_operand.vmem [shape: f32[1,512], index: 16, kind: input, shape index: {}]   ;;  %s14002_s17 = inlined_call_operand.vmem [shape: f32[2,128], index: 17, kind: output, shape index: {}]  }
   0x1   :  { %14005 = sst [smem:[#allocation2_spill]] %s13985_s1  ;;  %v63_v24 = vunpack.c.l.s4 %v10315_v23  ;;  %vm4495_vm2 = vcmask 1043456   ;;  %vm4824_vm3 = vcmask 130048   ;;  %vm10319_vm4 = vmmov 0  }
   0x2   :  { %14006 = sst [smem:[#allocation3_spill]] %s13986_s0  ;;  %s14007_s26 = sld [smem:[#allocation2_spill]]  ;;  %v10491_v31 = vshrl.u32 %v65_v25, 7  ;;  %vm5886_vm5 = vcmask 261120   ;;  %vm6673_vm6 = vcmask 523264  }
   0x3   :  { %v64_v30 = vunpack.c.0.s8 %v63_v24  ;;  %s14008_s24 = sld [smem:[#allocation3_spill]] }
   0x5   :  { %v10506_v36 = vsub.s32 %v64_v30, %v10491_v31 }
   0x8   :  { %v9233_v0 = vld [vmem:[%s14007_s26 + $0x4] ss:$24 sps:$4 sm:$0xff]   ;;  %v9235_v1 = vld [vmem:[%s14007_s26] ss:$24 sps:$4 sm:$0xff]   ;;  %v9236_v2 = vld [vmem:[%s14007_s26 + $0x34] ss:$24 sps:$4 sm:$0xff]  }
   0x9   :  { %2415 = vmatprep.subr.bf16.mxu0 %v9233_v0  ;;  %v9238_v3 = vld [vmem:[%s14007_s26 + $0x30] ss:$24 sps:$4 sm:$0xff]   ;;  %v9239_v4 = vld [vmem:[%s14007_s26 + $0x64] ss:$24 sps:$4 sm:$0xff]   ;;  %v9241_v5 = vld [vmem:[%s14007_s26 + $0x60] ss:$24 sps:$4 sm:$0xff]  }
   0xa   :  { %2416 = vmatpush1.bf16.msra.mxu0 %v9235_v1  ;;  %v9242_v6 = vld [vmem:[%s14007_s26 + $0x94] ss:$24 sps:$4 sm:$0xff]   ;;  %v9244_v8 = vld [vmem:[%s14007_s26 + $0x90] ss:$24 sps:$4 sm:$0xff]   ;;  %v9245_v9 = vld [vmem:[%s14007_s26 + $0xc4] ss:$24 sps:$4 sm:$0xff]  }
   0xb   :  { %2417 = vmatprep.subr.bf16.mxu0 %v9236_v2  ;;  %v9254_v7 = vld [vmem:[%s14007_s26 + $0xc] ss:$24 sps:$4 sm:$0xff]   ;;  %v9258_v10 = vld [vmem:[%s14007_s26 + $0x8] ss:$24 sps:$4 sm:$0xff]   ;;  %v9260_v11 = vld [vmem:[%s14007_s26 + $0x3c] ss:$24 sps:$4 sm:$0xff]  }
   0xc   :  { %2579 = vmatprep.subr.bf16.mxu1 %v9254_v7  ;;  %v9247_v12 = vld [vmem:[%s14007_s26 + $0xc0] ss:$24 sps:$4 sm:$0xff]   ;;  %v9266_v14 = vld [vmem:[%s14007_s26 + $0x6c] ss:$24 sps:$4 sm:$0xff]   ;;  %v9272_v17 = vld [vmem:[%s14007_s26 + $0x9c] ss:$24 sps:$4 sm:$0xff]  }
   0xd   :  { %2580 = vmatpush1.bf16.msra.mxu1 %v9258_v10  ;;  %v9264_v13 = vld [vmem:[%s14007_s26 + $0x38] ss:$24 sps:$4 sm:$0xff]   ;;  %v9248_v15 = vld [vmem:[%s14007_s26 + $0xf4] ss:$24 sps:$4 sm:$0xff]   ;;  %v9270_v16 = vld [vmem:[%s14007_s26 + $0x68] ss:$24 sps:$4 sm:$0xff]  }
   0xe   :  { %2418 = vmatpush1.bf16.msra.mxu0 %v9238_v3  ;;  %2581 = vmatprep.subr.bf16.mxu1 %v9260_v11  ;;  %v9250_v18 = vld [vmem:[%s14007_s26 + $0xf0] ss:$24 sps:$4 sm:$0xff]   ;;  %v9251_v19 = vld [vmem:[%s14007_s26 + $0x124] ss:$24 sps:$4 sm:$0xff]   ;;  %v9253_v22 = vld [vmem:[%s14007_s26 + $0x120] ss:$24 sps:$4 sm:$0xff]  }
   0xf   :  { %2419 = vmatprep.subr.bf16.mxu0 %v9239_v4  ;;  %v9276_v20 = vld [vmem:[%s14007_s26 + $0x98] ss:$24 sps:$4 sm:$0xff]   ;;  %v9278_v21 = vld [vmem:[%s14007_s26 + $0xcc] ss:$24 sps:$4 sm:$0xff]   ;;  %v9282_v27 = vld [vmem:[%s14007_s26 + $0xc8] ss:$24 sps:$4 sm:$0xff]  }
  0x10   :  { %v9256_v26 = vld [vmem:[%s14007_s26 + $0x154] ss:$24 sps:$4 sm:$0xff]   ;;  %v9259_v29 = vld [vmem:[%s14007_s26 + $0x150] ss:$24 sps:$4 sm:$0xff]   ;;  %v9262_v32 = vld [vmem:[%s14007_s26 + $0x184] ss:$24 sps:$4 sm:$0xff]  }
  0x11   :  { %2582 = vmatpush1.bf16.msra.mxu1 %v9264_v13  ;;  %v9284_v28 = vld [vmem:[%s14007_s26 + $0xfc] ss:$24 sps:$4 sm:$0xff]   ;;  %v9288_v33 = vld [vmem:[%s14007_s26 + $0xf8] ss:$24 sps:$4 sm:$0xff]   ;;  %v9290_v34 = vld [vmem:[%s14007_s26 + $0x12c] ss:$24 sps:$4 sm:$0xff]  }
  0x12   :  { %2420 = vmatpush1.bf16.msra.mxu0 %v9241_v5  ;;  %2583 = vmatprep.subr.bf16.mxu1 %v9266_v14  ;;  %v9265_v35 = vld [vmem:[%s14007_s26 + $0x180] ss:$24 sps:$4 sm:$0xff]   ;;  %v9268_v37 = vld [vmem:[%s14007_s26 + $0x1b4] ss:$24 sps:$4 sm:$0xff]   ;;  %v9271_v41 = vld [vmem:[%s14007_s26 + $0x1b0] ss:$24 sps:$4 sm:$0xff]  }
  0x13   :  { %2421 = vmatprep.subr.bf16.mxu0 %v9242_v6  ;;  %v9294_v38 = vld [vmem:[%s14007_s26 + $0x128] ss:$24 sps:$4 sm:$0xff]   ;;  %v9296_v39 = vld [vmem:[%s14007_s26 + $0x15c] ss:$24 sps:$4 sm:$0xff]   ;;  %v9300_v44 = vld [vmem:[%s14007_s26 + $0x158] ss:$24 sps:$4 sm:$0xff]  }
  0x14   :  { %v57_v40 = vld [vmem:[%s14008_s24] sm:$0xff]  ;;  %v9280_v49 = vld [vmem:[%s14007_s26 + $0x214] ss:$24 sps:$4 sm:$0xff]   ;;  %v9283_v52 = vld [vmem:[%s14007_s26 + $0x210] ss:$24 sps:$4 sm:$0xff]  }
  0x15   :  { %2584 = vmatpush1.bf16.msra.mxu1 %v9270_v16  ;;  %v68_v42 = vrot.slane %v57_v40, %v10506_v36  ;;  %v9274_v43 = vld [vmem:[%s14007_s26 + $0x1e4] ss:$24 sps:$4 sm:$0xff]   ;;  %v9277_v47 = vld [vmem:[%s14007_s26 + $0x1e0] ss:$24 sps:$4 sm:$0xff]   ;;  %v9292_v57 = vld [vmem:[%s14007_s26 + $0x274] ss:$24 sps:$4 sm:$0xff]   ;;  %v61_v61 = vcombine.high %v57_v40, %v57_v40 }
  0x16   :  { %2422 = vmatpush1.bf16.msra.mxu0 %v9244_v8  ;;  %2585 = vmatprep.subr.bf16.mxu1 %v9272_v17  ;;  %v9302_v46 = vld [vmem:[%s14007_s26 + $0x18c] ss:$24 sps:$4 sm:$0xff]   ;;  %v9306_v50 = vld [vmem:[%s14007_s26 + $0x188] ss:$24 sps:$4 sm:$0xff]   ;;  %v9308_v51 = vld [vmem:[%s14007_s26 + $0x1bc] ss:$24 sps:$4 sm:$0xff]  }
  0x17   :  { %2423 = vmatprep.subr.bf16.mxu0 %v9245_v9  ;;  %v76_v45 = vcombine.high %v68_v42, %v68_v42  ;;  %v9286_v53 = vld [vmem:[%s14007_s26 + $0x244] ss:$24 sps:$4 sm:$0xff]   ;;  %v9313_v54 = vld [vmem:[%s14007_s26 + $0x1b8] ss:$24 sps:$4 sm:$0xff]   ;;  %v9319_v58 = vld [vmem:[%s14007_s26 + $0x1e8] ss:$24 sps:$4 sm:$0xff]   ;;  %v10589_v2 = vrot.slane %v61_v61, %v10506_v36  ;;  %v10611_v10 = vpack.c.bf16 %v68_v42, %v68_v42 }
  0x18   :  { %v9314_v55 = vld [vmem:[%s14007_s26 + $0x1ec] ss:$24 sps:$4 sm:$0xff]   ;;  %v9289_v56 = vld [vmem:[%s14007_s26 + $0x240] ss:$24 sps:$4 sm:$0xff]   ;;  %v9320_v59 = vld [vmem:[%s14007_s26 + $0x21c] ss:$24 sps:$4 sm:$0xff]  }
  0x19   :  { %2586 = vmatpush1.bf16.msra.mxu1 %v9276_v20  ;;  %v10536_v48 = vpack.c.bf16 %v76_v45, %v76_v45  ;;  %v9295_v60 = vld [vmem:[%s14007_s26 + $0x270] ss:$24 sps:$4 sm:$0xff]   ;;  %v9298_v62 = vld [vmem:[%s14007_s26 + $0x2a4] ss:$24 sps:$4 sm:$0xff]   ;;  %v9301_v1 = vld [vmem:[%s14007_s26 + $0x2a0] ss:$24 sps:$4 sm:$0xff]   ;;  %v77_v7 = vcombine.high %v10589_v2, %v10589_v2 }
  0x1a   :  { %2424 = vmatpush1.bf16.msra.mxu0 %v9247_v12  ;;  %2587 = vmatprep.subr.bf16.mxu1 %v9278_v21  ;;  %v9325_v63 = vld [vmem:[%s14007_s26 + $0x218] ss:$24 sps:$4 sm:$0xff]   ;;  %v9326_v0 = vld [vmem:[%s14007_s26 + $0x24c] ss:$24 sps:$4 sm:$0xff]   ;;  %v9331_v4 = vld [vmem:[%s14007_s26 + $0x248] ss:$24 sps:$4 sm:$0xff]  }
  0x1b   :  { %2425 = vmatprep.subr.bf16.mxu0 %v9248_v15  ;;  %2447 = vmatprep.mubr.bf16.mxu0 %v10536_v48  ;;  %v9304_v3 = vld [vmem:[%s14007_s26 + $0x2d4] ss:$24 sps:$4 sm:$0xff]   ;;  %v9307_v6 = vld [vmem:[%s14007_s26 + $0x2d0] ss:$24 sps:$4 sm:$0xff]   ;;  %v9312_v8 = vld [vmem:[%s14007_s26 + $0x304] ss:$24 sps:$4 sm:$0xff]   ;;  %v10619_v13 = vpack.c.bf16 %v77_v7, %v77_v7 }
  0x1c   :  { %2611 = vmatprep.mubr.bf16.mxu1 %v10536_v48  ;;  %v9332_v5 = vld [vmem:[%s14007_s26 + $0x27c] ss:$24 sps:$4 sm:$0xff]   ;;  %v9337_v9 = vld [vmem:[%s14007_s26 + $0x278] ss:$24 sps:$4 sm:$0xff]   ;;  %v9338_v11 = vld [vmem:[%s14007_s26 + $0x2ac] ss:$24 sps:$4 sm:$0xff]  }
  0x1d   :  { %2588 = vmatpush1.bf16.msra.mxu1 %v9282_v27  ;;  %v9310_v12 = vld [vmem:[%s14007_s26 + $0x300] ss:$24 sps:$4 sm:$0xff]   ;;  %v9318_v14 = vld [vmem:[%s14007_s26 + $0x334] ss:$24 sps:$4 sm:$0xff]   ;;  %v9316_v17 = vld [vmem:[%s14007_s26 + $0x330] ss:$24 sps:$4 sm:$0xff]  }
  0x1e   :  { %2426 = vmatpush1.bf16.msra.mxu0 %v9250_v18  ;;  %2589 = vmatprep.subr.bf16.mxu1 %v9284_v28  ;;  %v9343_v15 = vld [vmem:[%s14007_s26 + $0x2a8] ss:$24 sps:$4 sm:$0xff]   ;;  %v9344_v16 = vld [vmem:[%s14007_s26 + $0x2dc] ss:$24 sps:$4 sm:$0xff]   ;;  %v9352_v20 = vld [vmem:[%s14007_s26 + $0x30c] ss:$24 sps:$4 sm:$0xff]  }
  0x1f   :  { %2427 = vmatprep.subr.bf16.mxu0 %v9251_v19  ;;  %v9324_v18 = vld [vmem:[%s14007_s26 + $0x364] ss:$24 sps:$4 sm:$0xff]   ;;  %v9349_v19 = vld [vmem:[%s14007_s26 + $0x2d8] ss:$24 sps:$4 sm:$0xff]   ;;  %v9350_v23 = vld [vmem:[%s14007_s26 + $0x308] ss:$24 sps:$4 sm:$0xff]  }
  0x20   :  { %v9322_v21 = vld [vmem:[%s14007_s26 + $0x360] ss:$24 sps:$4 sm:$0xff]   ;;  %v9358_v24 = vld [vmem:[%s14007_s26 + $0x33c] ss:$24 sps:$4 sm:$0xff]   ;;  %v9328_v25 = vld [vmem:[%s14007_s26 + $0x390] ss:$24 sps:$4 sm:$0xff]  }
  0x21   :  { %2590 = vmatpush1.bf16.msra.mxu1 %v9288_v33  ;;  %v9356_v27 = vld [vmem:[%s14007_s26 + $0x338] ss:$24 sps:$4 sm:$0xff]   ;;  %v9364_v28 = vld [vmem:[%s14007_s26 + $0x36c] ss:$24 sps:$4 sm:$0xff]   ;;  %v9370_v33 = vld [vmem:[%s14007_s26 + $0x39c] ss:$24 sps:$4 sm:$0xff]  }
  0x22   :  { %2428 = vmatpush1.bf16.msra.mxu0 %v9253_v22  ;;  %2591 = vmatprep.subr.bf16.mxu1 %v9290_v34  ;;  %v9330_v22 = vld [vmem:[%s14007_s26 + $0x394] ss:$24 sps:$4 sm:$0xff]   ;;  %v9340_v34 = vld [vmem:[%s14007_s26 + $0x3f0] ss:$24 sps:$4 sm:$0xff]   ;;  %v9385_v61 = vld [vmem:[%s14007_s26 + $0x544] ss:$24 sps:$4 sm:$0xff]  }
  0x23   :  { %2429 = vmatprep.subr.bf16.mxu0 %v9256_v26  ;;  %v9336_v26 = vld [vmem:[%s14007_s26 + $0x3c4] ss:$24 sps:$4 sm:$0xff]   ;;  %v9342_v30 = vld [vmem:[%s14007_s26 + $0x3f4] ss:$24 sps:$4 sm:$0xff]   ;;  %v9380_v45 = vld [vmem:[%s14007_s26 + $0x3f8] ss:$24 sps:$4 sm:$0xff]  }
  0x24   :  { %v9355_v40 = vld [vmem:[%s14007_s26 + $0x454] ss:$24 sps:$4 sm:$0xff]   ;;  %v9417_v7 = vld [vmem:[%s14007_s26 + $0x518] ss:$24 sps:$4 sm:$0xff]  }
  0x25   :  { %2592 = vmatpush1.bf16.msra.mxu1 %v9294_v38  ;;  %v9376_v38 = vld [vmem:[%s14007_s26 + $0x3cc] ss:$24 sps:$4 sm:$0xff]   ;;  %v9382_v42 = vld [vmem:[%s14007_s26 + $0x3fc] ss:$24 sps:$4 sm:$0xff]  }
  0x26   :  { %2430 = vmatpush1.bf16.msra.mxu0 %v9259_v29  ;;  %2593 = vmatprep.subr.bf16.mxu1 %v9296_v39  ;;  %v9334_v29 = vld [vmem:[%s14007_s26 + $0x3c0] ss:$24 sps:$4 sm:$0xff]  }
  0x27   :  { %2431 = vmatprep.subr.bf16.mxu0 %v9262_v32  ;;  %v9362_v32 = vld [vmem:[%s14007_s26 + $0x368] ss:$24 sps:$4 sm:$0xff]  }
  0x28   :  { %v9346_v39 = vld [vmem:[%s14007_s26 + $0x420] ss:$24 sps:$4 sm:$0xff]  }
  0x29   :  { %2594 = vmatpush1.bf16.msra.mxu1 %v9300_v44  ;;  %v9361_v44 = vld [vmem:[%s14007_s26 + $0x484] ss:$24 sps:$4 sm:$0xff]  }
  0x2a   :  { %2432 = vmatpush1.bf16.msra.mxu0 %v9265_v35  ;;  %2595 = vmatprep.subr.bf16.mxu1 %v9302_v46  ;;  %v9348_v35 = vld [vmem:[%s14007_s26 + $0x424] ss:$24 sps:$4 sm:$0xff]  }
  0x2b   :  { %2433 = vmatprep.subr.bf16.mxu0 %v9268_v37  ;;  %v9368_v37 = vld [vmem:[%s14007_s26 + $0x398] ss:$24 sps:$4 sm:$0xff]   ;;  %v9388_v46 = vld [vmem:[%s14007_s26 + $0x42c] ss:$24 sps:$4 sm:$0xff]  }
  0x2d   :  { %2596 = vmatpush1.bf16.msra.mxu1 %v9306_v50  ;;  %v9386_v50 = vld [vmem:[%s14007_s26 + $0x428] ss:$24 sps:$4 sm:$0xff]  }
  0x2e   :  { %2434 = vmatpush1.bf16.msra.mxu0 %v9271_v41  ;;  %2597 = vmatprep.subr.bf16.mxu1 %v9308_v51  ;;  %v9374_v41 = vld [vmem:[%s14007_s26 + $0x3c8] ss:$24 sps:$4 sm:$0xff]   ;;  %v9394_v51 = vld [vmem:[%s14007_s26 + $0x45c] ss:$24 sps:$4 sm:$0xff]  }
  0x2f   :  { %2435 = vmatprep.subr.bf16.mxu0 %v9274_v43  ;;  %v9353_v43 = vld [vmem:[%s14007_s26 + $0x450] ss:$24 sps:$4 sm:$0xff]  }
  0x31   :  { %2598 = vmatpush1.bf16.msra.mxu1 %v9313_v54  ;;  %v9392_v54 = vld [vmem:[%s14007_s26 + $0x458] ss:$24 sps:$4 sm:$0xff]  }
  0x32   :  { %2436 = vmatpush1.bf16.msra.mxu0 %v9277_v47  ;;  %2599 = vmatprep.subr.bf16.mxu1 %v9314_v55  ;;  %v9359_v47 = vld [vmem:[%s14007_s26 + $0x480] ss:$24 sps:$4 sm:$0xff]   ;;  %v9400_v55 = vld [vmem:[%s14007_s26 + $0x48c] ss:$24 sps:$4 sm:$0xff]  }
  0x33   :  { %2437 = vmatprep.subr.bf16.mxu0 %v9280_v49  ;;  %v9367_v49 = vld [vmem:[%s14007_s26 + $0x4b4] ss:$24 sps:$4 sm:$0xff]  }
  0x35   :  { %2600 = vmatpush1.bf16.msra.mxu1 %v9319_v58  ;;  %v9398_v58 = vld [vmem:[%s14007_s26 + $0x488] ss:$24 sps:$4 sm:$0xff]  }
  0x36   :  { %2438 = vmatpush1.bf16.msra.mxu0 %v9283_v52  ;;  %2601 = vmatprep.subr.bf16.mxu1 %v9320_v59  ;;  %v9365_v52 = vld [vmem:[%s14007_s26 + $0x4b0] ss:$24 sps:$4 sm:$0xff]   ;;  %v9406_v59 = vld [vmem:[%s14007_s26 + $0x4bc] ss:$24 sps:$4 sm:$0xff]  }
  0x37   :  { %2439 = vmatprep.subr.bf16.mxu0 %v9286_v53  ;;  %v9373_v53 = vld [vmem:[%s14007_s26 + $0x4e4] ss:$24 sps:$4 sm:$0xff]  }
  0x39   :  { %2602 = vmatpush1.bf16.msra.mxu1 %v9325_v63  ;;  %v9413_v63 = vld [vmem:[%s14007_s26 + $0x4ec] ss:$24 sps:$4 sm:$0xff]  }
  0x3a   :  { %2440 = vmatpush1.bf16.msra.mxu0 %v9289_v56  ;;  %2603 = vmatprep.subr.bf16.mxu1 %v9326_v0  ;;  %v9371_v56 = vld [vmem:[%s14007_s26 + $0x4e0] ss:$24 sps:$4 sm:$0xff]  }
  0x3b   :  { %2441 = vmatprep.subr.bf16.mxu0 %v9292_v57  ;;  %v9379_v57 = vld [vmem:[%s14007_s26 + $0x514] ss:$24 sps:$4 sm:$0xff]   ;;  %v9383_v0 = vld [vmem:[%s14007_s26 + $0x540] ss:$24 sps:$4 sm:$0xff]  }
  0x3d   :  { %2604 = vmatpush1.bf16.msra.mxu1 %v9331_v4  ;;  %v9419_v4 = vld [vmem:[%s14007_s26 + $0x51c] ss:$24 sps:$4 sm:$0xff]  }
  0x3e   :  { %2442 = vmatpush1.bf16.msra.mxu0 %v9295_v60  ;;  %2605 = vmatprep.subr.bf16.mxu1 %v9332_v5  ;;  %v9377_v60 = vld [vmem:[%s14007_s26 + $0x510] ss:$24 sps:$4 sm:$0xff]  }
  0x3f   :  { %2443 = vmatprep.subr.bf16.mxu0 %v9298_v62  ;;  %v9404_v62 = vld [vmem:[%s14007_s26 + $0x4b8] ss:$24 sps:$4 sm:$0xff]  }
  0x40   :  { %v9389_v5 = vld [vmem:[%s14007_s26 + $0x570] ss:$24 sps:$4 sm:$0xff]  }
  0x41   :  { %2606 = vmatpush1.bf16.msra.mxu1 %v9337_v9  ;;  %v9395_v9 = vld [vmem:[%s14007_s26 + $0x5a0] ss:$24 sps:$4 sm:$0xff]  }
  0x42   :  { %2444 = vmatpush1.bf16.msra.mxu0 %v9301_v1  ;;  %2607 = vmatprep.subr.bf16.mxu1 %v9338_v11  ;;  %v9391_v1 = vld [vmem:[%s14007_s26 + $0x574] ss:$24 sps:$4 sm:$0xff]  }
  0x43   :  { %2445 = vmatprep.subr.bf16.mxu0 %v9304_v3  ;;  %v9411_v3 = vld [vmem:[%s14007_s26 + $0x4e8] ss:$24 sps:$4 sm:$0xff]   ;;  %v9403_v11 = vld [vmem:[%s14007_s26 + $0x5d4] ss:$24 sps:$4 sm:$0xff]  }
  0x45   :  { %2608 = vmatpush1.bf16.msra.mxu1 %v9343_v15 }
  0x46   :  { %2446 = vmatpush1.bf16.msra.mxu0 %v9307_v6  ;;  %2609 = vmatprep.subr.bf16.mxu1 %v9344_v16  ;;  %v9397_v6 = vld [vmem:[%s14007_s26 + $0x5a4] ss:$24 sps:$4 sm:$0xff]  }
  0x47   :  { %2456 = vmatprep.subr.bf16.mxu0 %v9312_v8  ;;  %v9425_v8 = vld [vmem:[%s14007_s26 + $0x54c] ss:$24 sps:$4 sm:$0xff]   ;;  %v9431_v16 = vld [vmem:[%s14007_s26 + $0x57c] ss:$24 sps:$4 sm:$0xff]  }
  0x49   :  { %2448 = vmatmul.mubr.bf16.vlgmr.msra.gmra.mrb[0].mxu0 %v10611_v10  ;;  %2610 = vmatpush1.bf16.msra.mxu1 %v9349_v19  ;;  %v9410_v19 = vld [vmem:[%s14007_s26 + $0x604] ss:$24 sps:$4 sm:$0xff]  }
  0x4a   :  { %2457 = vmatpush1.bf16.msra.mxu0 %v9310_v12  ;;  %2488 = vmatprep.mubr.bf16.mxu0 %v10619_v13  ;;  %v10799_v12 = vld [vmem:[%s14008_s24 + $0x8] sm:$0xff] }
  0x4b   :  { %2458 = vmatprep.subr.bf16.mxu0 %v9318_v14  ;;  %2620 = vmatprep.subr.bf16.mxu1 %v9352_v20  ;;  %v9423_v14 = vld [vmem:[%s14007_s26 + $0x548] ss:$24 sps:$4 sm:$0xff]   ;;  %v10806_v15 = vrot.slane %v10799_v12, %v10506_v36  ;;  %v9429_v20 = vld [vmem:[%s14007_s26 + $0x578] ss:$24 sps:$4 sm:$0xff]  }
  0x4c   :  { %2612 = vmatmul.mubr.bf16.vlgmr.msra.gmra.mrb[0].mxu1 %v10611_v10 }
  0x4d   :  { %2621 = vmatpush1.bf16.msra.mxu1 %v9350_v23  ;;  %2652 = vmatprep.mubr.bf16.mxu1 %v10619_v13  ;;  %v9408_v23 = vld [vmem:[%s14007_s26 + $0x600] ss:$24 sps:$4 sm:$0xff]  }
  0x4e   :  { %2459 = vmatpush1.bf16.msra.mxu0 %v9316_v17  ;;  %2622 = vmatprep.subr.bf16.mxu1 %v9358_v24  ;;  %v9401_v17 = vld [vmem:[%s14007_s26 + $0x5d0] ss:$24 sps:$4 sm:$0xff]  }
  0x4f   :  { %2460 = vmatprep.subr.bf16.mxu0 %v9324_v18  ;;  %v93_v18 = vcombine.high %v10806_v15, %v10806_v15 }
  0x51   :  { %2623 = vmatpush1.bf16.msra.mxu1 %v9356_v27  ;;  %v10832_v24 = vpack.c.bf16 %v93_v18, %v93_v18  ;;  %v9414_v27 = vld [vmem:[%s14007_s26 + $0x630] ss:$24 sps:$4 sm:$0xff]   ;;  %v9515_v18 = vld [vmem:[%s14007_s26 + $0x81c] ss:$24 sps:$4 sm:$0xff]  }
  0x52   :  { %2461 = vmatpush1.bf16.msra.mxu0 %v9322_v21  ;;  %2624 = vmatprep.subr.bf16.mxu1 %v9364_v28  ;;  %v10824_v21 = vpack.c.bf16 %v10589_v2, %v10589_v2  ;;  %v9435_v2 = vld [vmem:[%s14007_s26 + $0x5a8] ss:$24 sps:$4 sm:$0xff]   ;;  %v9422_v28 = vld [vmem:[%s14007_s26 + $0x664] ss:$24 sps:$4 sm:$0xff]  }
  0x53   :  { %2462 = vmatprep.subr.bf16.mxu0 %v9330_v22  ;;  %v9437_v22 = vld [vmem:[%s14007_s26 + $0x5ac] ss:$24 sps:$4 sm:$0xff]  }
  0x55   :  { %2625 = vmatpush1.bf16.msra.mxu1 %v9362_v32  ;;  %v9420_v32 = vld [vmem:[%s14007_s26 + $0x660] ss:$24 sps:$4 sm:$0xff]  }
  0x56   :  { %2463 = vmatpush1.bf16.msra.mxu0 %v9328_v25  ;;  %2626 = vmatprep.subr.bf16.mxu1 %v9370_v33  ;;  %v9416_v25 = vld [vmem:[%s14007_s26 + $0x634] ss:$24 sps:$4 sm:$0xff]  }
  0x57   :  { %2464 = vmatprep.subr.bf16.mxu0 %v9336_v26  ;;  %v9443_v26 = vld [vmem:[%s14007_s26 + $0x5dc] ss:$24 sps:$4 sm:$0xff]  }
  0x58   :  { %v9428_v33 = vld [vmem:[%s14007_s26 + $0x694] ss:$24 sps:$4 sm:$0xff]  }
  0x59   :  { %2627 = vmatpush1.bf16.msra.mxu1 %v9368_v37  ;;  %v9426_v37 = vld [vmem:[%s14007_s26 + $0x690] ss:$24 sps:$4 sm:$0xff]  }
  0x5a   :  { %2465 = vmatpush1.bf16.msra.mxu0 %v9334_v29  ;;  %2628 = vmatprep.subr.bf16.mxu1 %v9376_v38  ;;  %v9441_v29 = vld [vmem:[%s14007_s26 + $0x5d8] ss:$24 sps:$4 sm:$0xff]   ;;  %v9434_v38 = vld [vmem:[%s14007_s26 + $0x6c4] ss:$24 sps:$4 sm:$0xff]  }
  0x5b   :  { %2466 = vmatprep.subr.bf16.mxu0 %v9342_v30  ;;  %v9449_v30 = vld [vmem:[%s14007_s26 + $0x60c] ss:$24 sps:$4 sm:$0xff]  }
  0x5d   :  { %2629 = vmatpush1.bf16.msra.mxu1 %v9374_v41  ;;  %v9432_v41 = vld [vmem:[%s14007_s26 + $0x6c0] ss:$24 sps:$4 sm:$0xff]  }
  0x5e   :  { %2467 = vmatpush1.bf16.msra.mxu0 %v9340_v34  ;;  %2630 = vmatprep.subr.bf16.mxu1 %v9382_v42  ;;  %v9447_v34 = vld [vmem:[%s14007_s26 + $0x608] ss:$24 sps:$4 sm:$0xff]   ;;  %v9440_v42 = vld [vmem:[%s14007_s26 + $0x6f4] ss:$24 sps:$4 sm:$0xff]  }
  0x5f   :  { %2468 = vmatprep.subr.bf16.mxu0 %v9348_v35  ;;  %v9455_v35 = vld [vmem:[%s14007_s26 + $0x63c] ss:$24 sps:$4 sm:$0xff]  }
  0x61   :  { %2631 = vmatpush1.bf16.msra.mxu1 %v9380_v45  ;;  %v9438_v45 = vld [vmem:[%s14007_s26 + $0x6f0] ss:$24 sps:$4 sm:$0xff]  }
  0x62   :  { %2469 = vmatpush1.bf16.msra.mxu0 %v9346_v39  ;;  %2632 = vmatprep.subr.bf16.mxu1 %v9388_v46  ;;  %v9453_v39 = vld [vmem:[%s14007_s26 + $0x638] ss:$24 sps:$4 sm:$0xff]   ;;  %v9446_v46 = vld [vmem:[%s14007_s26 + $0x724] ss:$24 sps:$4 sm:$0xff]  }
  0x63   :  { %2470 = vmatprep.subr.bf16.mxu0 %v9355_v40  ;;  %v9461_v40 = vld [vmem:[%s14007_s26 + $0x66c] ss:$24 sps:$4 sm:$0xff]  }
  0x65   :  { %2633 = vmatpush1.bf16.msra.mxu1 %v9386_v50  ;;  %v9444_v50 = vld [vmem:[%s14007_s26 + $0x720] ss:$24 sps:$4 sm:$0xff]  }
  0x66   :  { %2471 = vmatpush1.bf16.msra.mxu0 %v9353_v43  ;;  %2634 = vmatprep.subr.bf16.mxu1 %v9394_v51  ;;  %v9459_v43 = vld [vmem:[%s14007_s26 + $0x668] ss:$24 sps:$4 sm:$0xff]   ;;  %v9452_v51 = vld [vmem:[%s14007_s26 + $0x754] ss:$24 sps:$4 sm:$0xff]  }
  0x67   :  { %2472 = vmatprep.subr.bf16.mxu0 %v9361_v44  ;;  %v9467_v44 = vld [vmem:[%s14007_s26 + $0x69c] ss:$24 sps:$4 sm:$0xff]  }
  0x69   :  { %2635 = vmatpush1.bf16.msra.mxu1 %v9392_v54  ;;  %v9450_v54 = vld [vmem:[%s14007_s26 + $0x750] ss:$24 sps:$4 sm:$0xff]  }
  0x6a   :  { %2473 = vmatpush1.bf16.msra.mxu0 %v9359_v47  ;;  %2636 = vmatprep.subr.bf16.mxu1 %v9400_v55  ;;  %v9465_v47 = vld [vmem:[%s14007_s26 + $0x698] ss:$24 sps:$4 sm:$0xff]   ;;  %v9458_v55 = vld [vmem:[%s14007_s26 + $0x784] ss:$24 sps:$4 sm:$0xff]  }
  0x6b   :  { %2474 = vmatprep.subr.bf16.mxu0 %v9367_v49  ;;  %v9473_v49 = vld [vmem:[%s14007_s26 + $0x6cc] ss:$24 sps:$4 sm:$0xff]  }
  0x6d   :  { %2637 = vmatpush1.bf16.msra.mxu1 %v9398_v58  ;;  %v9456_v58 = vld [vmem:[%s14007_s26 + $0x780] ss:$24 sps:$4 sm:$0xff]  }
  0x6e   :  { %2475 = vmatpush1.bf16.msra.mxu0 %v9365_v52  ;;  %2638 = vmatprep.subr.bf16.mxu1 %v9406_v59  ;;  %v9471_v52 = vld [vmem:[%s14007_s26 + $0x6c8] ss:$24 sps:$4 sm:$0xff]   ;;  %v9464_v59 = vld [vmem:[%s14007_s26 + $0x7b4] ss:$24 sps:$4 sm:$0xff]  }
  0x6f   :  { %2476 = vmatprep.subr.bf16.mxu0 %v9373_v53  ;;  %v9479_v53 = vld [vmem:[%s14007_s26 + $0x6fc] ss:$24 sps:$4 sm:$0xff]  }
  0x71   :  { %2639 = vmatpush1.bf16.msra.mxu1 %v9404_v62  ;;  %v9462_v62 = vld [vmem:[%s14007_s26 + $0x7b0] ss:$24 sps:$4 sm:$0xff]  }
  0x72   :  { %2477 = vmatpush1.bf16.msra.mxu0 %v9371_v56  ;;  %2640 = vmatprep.subr.bf16.mxu1 %v9413_v63  ;;  %v9477_v56 = vld [vmem:[%s14007_s26 + $0x6f8] ss:$24 sps:$4 sm:$0xff]   ;;  %v9470_v63 = vld [vmem:[%s14007_s26 + $0x7e4] ss:$24 sps:$4 sm:$0xff]  }
  0x73   :  { %2478 = vmatprep.subr.bf16.mxu0 %v9379_v57  ;;  %v9485_v57 = vld [vmem:[%s14007_s26 + $0x72c] ss:$24 sps:$4 sm:$0xff]  }
  0x75   :  { %2641 = vmatpush1.bf16.msra.mxu1 %v9411_v3  ;;  %v9468_v3 = vld [vmem:[%s14007_s26 + $0x7e0] ss:$24 sps:$4 sm:$0xff]  }
  0x76   :  { %2479 = vmatpush1.bf16.msra.mxu0 %v9377_v60  ;;  %2642 = vmatprep.subr.bf16.mxu1 %v9419_v4  ;;  %v9483_v60 = vld [vmem:[%s14007_s26 + $0x728] ss:$24 sps:$4 sm:$0xff]   ;;  %v9476_v4 = vld [vmem:[%s14007_s26 + $0x814] ss:$24 sps:$4 sm:$0xff]  }
  0x77   :  { %2480 = vmatprep.subr.bf16.mxu0 %v9385_v61  ;;  %v9491_v61 = vld [vmem:[%s14007_s26 + $0x75c] ss:$24 sps:$4 sm:$0xff]  }
  0x79   :  { %2643 = vmatpush1.bf16.msra.mxu1 %v9417_v7  ;;  %v9474_v7 = vld [vmem:[%s14007_s26 + $0x810] ss:$24 sps:$4 sm:$0xff]  }
  0x7a   :  { %2481 = vmatpush1.bf16.msra.mxu0 %v9383_v0  ;;  %2644 = vmatprep.subr.bf16.mxu1 %v9425_v8  ;;  %v9489_v0 = vld [vmem:[%s14007_s26 + $0x758] ss:$24 sps:$4 sm:$0xff]   ;;  %v9482_v8 = vld [vmem:[%s14007_s26 + $0x844] ss:$24 sps:$4 sm:$0xff]  }
  0x7b   :  { %2482 = vmatprep.subr.bf16.mxu0 %v9391_v1  ;;  %v9497_v1 = vld [vmem:[%s14007_s26 + $0x78c] ss:$24 sps:$4 sm:$0xff]  }
  0x7d   :  { %2645 = vmatpush1.bf16.msra.mxu1 %v9423_v14  ;;  %v9480_v14 = vld [vmem:[%s14007_s26 + $0x840] ss:$24 sps:$4 sm:$0xff]  }
  0x7e   :  { %2483 = vmatpush1.bf16.msra.mxu0 %v9389_v5  ;;  %2646 = vmatprep.subr.bf16.mxu1 %v9431_v16  ;;  %v9495_v5 = vld [vmem:[%s14007_s26 + $0x788] ss:$24 sps:$4 sm:$0xff]   ;;  %v9488_v16 = vld [vmem:[%s14007_s26 + $0x874] ss:$24 sps:$4 sm:$0xff]  }
  0x7f   :  { %2484 = vmatprep.subr.bf16.mxu0 %v9397_v6  ;;  %v9503_v6 = vld [vmem:[%s14007_s26 + $0x7bc] ss:$24 sps:$4 sm:$0xff]  }
  0x81   :  { %2647 = vmatpush1.bf16.msra.mxu1 %v9429_v20  ;;  %v78_v20 = vcombine.high %v10799_v12, %v10799_v12  ;;  %v9492_v12 = vld [vmem:[%s14007_s26 + $0x8a0] ss:$24 sps:$4 sm:$0xff]  }
  0x82   :  { %2485 = vmatpush1.bf16.msra.mxu0 %v9395_v9  ;;  %2648 = vmatprep.subr.bf16.mxu1 %v9437_v22  ;;  %v9501_v9 = vld [vmem:[%s14007_s26 + $0x7b8] ss:$24 sps:$4 sm:$0xff]   ;;  %v9494_v22 = vld [vmem:[%s14007_s26 + $0x8a4] ss:$24 sps:$4 sm:$0xff]  }
  0x83   :  { %2486 = vmatprep.subr.bf16.mxu0 %v9403_v11  ;;  %v9509_v11 = vld [vmem:[%s14007_s26 + $0x7ec] ss:$24 sps:$4 sm:$0xff]  }
  0x85   :  { %2649 = vmatpush1.bf16.msra.mxu1 %v9435_v2  ;;  %v11009_v2 = vrot.slane %v78_v20, %v10506_v36  ;;  %v9498_v36 = vld [vmem:[%s14007_s26 + $0x8d0] ss:$24 sps:$4 sm:$0xff]  }
  0x86   :  { %2487 = vmatpush1.bf16.msra.mxu0 %v9401_v17  ;;  %2650 = vmatprep.subr.bf16.mxu1 %v9443_v26  ;;  %v9507_v17 = vld [vmem:[%s14007_s26 + $0x7e8] ss:$24 sps:$4 sm:$0xff]   ;;  %v9500_v26 = vld [vmem:[%s14007_s26 + $0x8d4] ss:$24 sps:$4 sm:$0xff]  }
  0x87   :  { %2497 = vmatprep.subr.bf16.mxu0 %v9410_v19  ;;  %v9486_v19 = vld [vmem:[%s14007_s26 + $0x870] ss:$24 sps:$4 sm:$0xff]  }
  0x88   :  { %v9591_v20 = vld [vmem:[%s14007_s26 + $0xa88] ss:$24 sps:$4 sm:$0xff]  }
  0x89   :  { %2489 = vmatmul.mubr.bf16.vlgmr.msra.gmra.mrb[0].mxu0 %v10824_v21  ;;  %2651 = vmatpush1.bf16.msra.mxu1 %v9441_v29  ;;  %v94_v29 = vcombine.high %v11009_v2, %v11009_v2 }
  0x8a   :  { %2498 = vmatpush1.bf16.msra.mxu0 %v9408_v23  ;;  %2529 = vmatprep.mubr.bf16.mxu0 %v10832_v24  ;;  %v9513_v23 = vld [vmem:[%s14007_s26 + $0x818] ss:$24 sps:$4 sm:$0xff]  }
  0x8b   :  { %2499 = vmatprep.subr.bf16.mxu0 %v9416_v25  ;;  %2661 = vmatprep.subr.bf16.mxu1 %v9449_v30  ;;  %v9521_v25 = vld [vmem:[%s14007_s26 + $0x84c] ss:$24 sps:$4 sm:$0xff]  }
  0x8c   :  { %2653 = vmatmul.mubr.bf16.vlgmr.msra.gmra.mrb[0].mxu1 %v10824_v21  ;;  %v9506_v30 = vld [vmem:[%s14007_s26 + $0x904] ss:$24 sps:$4 sm:$0xff]  }
  0x8d   :  { %2662 = vmatpush1.bf16.msra.mxu1 %v9447_v34  ;;  %2693 = vmatprep.mubr.bf16.mxu1 %v10832_v24  ;;  %v9533_v34 = vld [vmem:[%s14007_s26 + $0x8ac] ss:$24 sps:$4 sm:$0xff]  }
  0x8e   :  { %2500 = vmatpush1.bf16.msra.mxu0 %v9414_v27  ;;  %2663 = vmatprep.subr.bf16.mxu1 %v9455_v35  ;;  %v9519_v27 = vld [vmem:[%s14007_s26 + $0x848] ss:$24 sps:$4 sm:$0xff]  }
  0x8f   :  { %2501 = vmatprep.subr.bf16.mxu0 %v9422_v28  ;;  %v9527_v28 = vld [vmem:[%s14007_s26 + $0x87c] ss:$24 sps:$4 sm:$0xff]   ;;  %v9504_v35 = vld [vmem:[%s14007_s26 + $0x900] ss:$24 sps:$4 sm:$0xff]  }
  0x91   :  { %2664 = vmatpush1.bf16.msra.mxu1 %v9453_v39  ;;  %v9531_v39 = vld [vmem:[%s14007_s26 + $0x8a8] ss:$24 sps:$4 sm:$0xff]  }
  0x92   :  { %2502 = vmatpush1.bf16.msra.mxu0 %v9420_v32  ;;  %2665 = vmatprep.subr.bf16.mxu1 %v9461_v40  ;;  %v9525_v32 = vld [vmem:[%s14007_s26 + $0x878] ss:$24 sps:$4 sm:$0xff]   ;;  %v9539_v40 = vld [vmem:[%s14007_s26 + $0x8dc] ss:$24 sps:$4 sm:$0xff]  }
  0x93   :  { %2503 = vmatprep.subr.bf16.mxu0 %v9428_v33  ;;  %v11033_v33 = vpack.c.bf16 %v10806_v15, %v10806_v15  ;;  %v9510_v15 = vld [vmem:[%s14007_s26 + $0x930] ss:$24 sps:$4 sm:$0xff]  }
  0x95   :  { %2666 = vmatpush1.bf16.msra.mxu1 %v9459_v43  ;;  %v9545_v43 = vld [vmem:[%s14007_s26 + $0x90c] ss:$24 sps:$4 sm:$0xff]  }
  0x96   :  { %2504 = vmatpush1.bf16.msra.mxu0 %v9426_v37  ;;  %2667 = vmatprep.subr.bf16.mxu1 %v9467_v44  ;;  %v11041_v37 = vpack.c.bf16 %v94_v29, %v94_v29  ;;  %v9516_v44 = vld [vmem:[%s14007_s26 + $0x960] ss:$24 sps:$4 sm:$0xff]   ;;  %v9612_v29 = vld [vmem:[%s14007_s26 + $0xb1c] ss:$24 sps:$4 sm:$0xff]  }
  0x97   :  { %2505 = vmatprep.subr.bf16.mxu0 %v9434_v38  ;;  %v9512_v38 = vld [vmem:[%s14007_s26 + $0x934] ss:$24 sps:$4 sm:$0xff]  }
  0x99   :  { %2668 = vmatpush1.bf16.msra.mxu1 %v9465_v47  ;;  %v9551_v47 = vld [vmem:[%s14007_s26 + $0x93c] ss:$24 sps:$4 sm:$0xff]  }
  0x9a   :  { %2506 = vmatpush1.bf16.msra.mxu0 %v9432_v41  ;;  %2669 = vmatprep.subr.bf16.mxu1 %v9473_v49  ;;  %v9518_v41 = vld [vmem:[%s14007_s26 + $0x964] ss:$24 sps:$4 sm:$0xff]   ;;  %v9522_v49 = vld [vmem:[%s14007_s26 + $0x990] ss:$24 sps:$4 sm:$0xff]  }
  0x9b   :  { %2507 = vmatprep.subr.bf16.mxu0 %v9440_v42  ;;  %v9537_v42 = vld [vmem:[%s14007_s26 + $0x8d8] ss:$24 sps:$4 sm:$0xff]  }
  0x9d   :  { %2670 = vmatpush1.bf16.msra.mxu1 %v9471_v52  ;;  %v9557_v52 = vld [vmem:[%s14007_s26 + $0x96c] ss:$24 sps:$4 sm:$0xff]  }
  0x9e   :  { %2508 = vmatpush1.bf16.msra.mxu0 %v9438_v45  ;;  %2671 = vmatprep.subr.bf16.mxu1 %v9479_v53  ;;  %v9524_v45 = vld [vmem:[%s14007_s26 + $0x994] ss:$24 sps:$4 sm:$0xff]   ;;  %v9528_v53 = vld [vmem:[%s14007_s26 + $0x9c0] ss:$24 sps:$4 sm:$0xff]  }
  0x9f   :  { %2509 = vmatprep.subr.bf16.mxu0 %v9446_v46  ;;  %v9543_v46 = vld [vmem:[%s14007_s26 + $0x908] ss:$24 sps:$4 sm:$0xff]  }
  0xa1   :  { %2672 = vmatpush1.bf16.msra.mxu1 %v9477_v56  ;;  %v9563_v56 = vld [vmem:[%s14007_s26 + $0x99c] ss:$24 sps:$4 sm:$0xff]  }
  0xa2   :  { %2510 = vmatpush1.bf16.msra.mxu0 %v9444_v50  ;;  %2673 = vmatprep.subr.bf16.mxu1 %v9485_v57  ;;  %v9530_v50 = vld [vmem:[%s14007_s26 + $0x9c4] ss:$24 sps:$4 sm:$0xff]   ;;  %v9534_v57 = vld [vmem:[%s14007_s26 + $0x9f0] ss:$24 sps:$4 sm:$0xff]  }
  0xa3   :  { %2511 = vmatprep.subr.bf16.mxu0 %v9452_v51  ;;  %v9549_v51 = vld [vmem:[%s14007_s26 + $0x938] ss:$24 sps:$4 sm:$0xff]  }
  0xa5   :  { %2674 = vmatpush1.bf16.msra.mxu1 %v9483_v60  ;;  %v9569_v60 = vld [vmem:[%s14007_s26 + $0x9cc] ss:$24 sps:$4 sm:$0xff]  }
  0xa6   :  { %2512 = vmatpush1.bf16.msra.mxu0 %v9450_v54  ;;  %2675 = vmatprep.subr.bf16.mxu1 %v9491_v61  ;;  %v9536_v54 = vld [vmem:[%s14007_s26 + $0x9f4] ss:$24 sps:$4 sm:$0xff]   ;;  %v9540_v61 = vld [vmem:[%s14007_s26 + $0xa20] ss:$24 sps:$4 sm:$0xff]  }
  0xa7   :  { %2513 = vmatprep.subr.bf16.mxu0 %v9458_v55  ;;  %v9555_v55 = vld [vmem:[%s14007_s26 + $0x968] ss:$24 sps:$4 sm:$0xff]  }
  0xa9   :  { %2676 = vmatpush1.bf16.msra.mxu1 %v9489_v0  ;;  %v9575_v0 = vld [vmem:[%s14007_s26 + $0x9fc] ss:$24 sps:$4 sm:$0xff]  }
  0xaa   :  { %2514 = vmatpush1.bf16.msra.mxu0 %v9456_v58  ;;  %2677 = vmatprep.subr.bf16.mxu1 %v9497_v1  ;;  %v9542_v58 = vld [vmem:[%s14007_s26 + $0xa24] ss:$24 sps:$4 sm:$0xff]   ;;  %v9546_v1 = vld [vmem:[%s14007_s26 + $0xa50] ss:$24 sps:$4 sm:$0xff]  }
  0xab   :  { %2515 = vmatprep.subr.bf16.mxu0 %v9464_v59  ;;  %v9561_v59 = vld [vmem:[%s14007_s26 + $0x998] ss:$24 sps:$4 sm:$0xff]  }
  0xad   :  { %2678 = vmatpush1.bf16.msra.mxu1 %v9495_v5  ;;  %v9581_v5 = vld [vmem:[%s14007_s26 + $0xa2c] ss:$24 sps:$4 sm:$0xff]  }
  0xae   :  { %2516 = vmatpush1.bf16.msra.mxu0 %v9462_v62  ;;  %2679 = vmatprep.subr.bf16.mxu1 %v9503_v6  ;;  %v9548_v62 = vld [vmem:[%s14007_s26 + $0xa54] ss:$24 sps:$4 sm:$0xff]   ;;  %v9552_v6 = vld [vmem:[%s14007_s26 + $0xa80] ss:$24 sps:$4 sm:$0xff]  }
  0xaf   :  { %2517 = vmatprep.subr.bf16.mxu0 %v9470_v63  ;;  %v9567_v63 = vld [vmem:[%s14007_s26 + $0x9c8] ss:$24 sps:$4 sm:$0xff]  }
  0xb1   :  { %2680 = vmatpush1.bf16.msra.mxu1 %v9501_v9  ;;  %v9587_v9 = vld [vmem:[%s14007_s26 + $0xa5c] ss:$24 sps:$4 sm:$0xff]  }
  0xb2   :  { %2518 = vmatpush1.bf16.msra.mxu0 %v9468_v3  ;;  %2681 = vmatprep.subr.bf16.mxu1 %v9509_v11  ;;  %v9554_v3 = vld [vmem:[%s14007_s26 + $0xa84] ss:$24 sps:$4 sm:$0xff]   ;;  %v9558_v11 = vld [vmem:[%s14007_s26 + $0xab0] ss:$24 sps:$4 sm:$0xff]  }
  0xb3   :  { %2519 = vmatprep.subr.bf16.mxu0 %v9476_v4  ;;  %v9573_v4 = vld [vmem:[%s14007_s26 + $0x9f8] ss:$24 sps:$4 sm:$0xff]  }
  0xb5   :  { %2682 = vmatpush1.bf16.msra.mxu1 %v9507_v17  ;;  %v9593_v17 = vld [vmem:[%s14007_s26 + $0xa8c] ss:$24 sps:$4 sm:$0xff]  }
  0xb6   :  { %2520 = vmatpush1.bf16.msra.mxu0 %v9474_v7  ;;  %2683 = vmatprep.subr.bf16.mxu1 %v9515_v18  ;;  %v9560_v7 = vld [vmem:[%s14007_s26 + $0xab4] ss:$24 sps:$4 sm:$0xff]   ;;  %v9564_v18 = vld [vmem:[%s14007_s26 + $0xae0] ss:$24 sps:$4 sm:$0xff]  }
  0xb7   :  { %2521 = vmatprep.subr.bf16.mxu0 %v9482_v8  ;;  %v9579_v8 = vld [vmem:[%s14007_s26 + $0xa28] ss:$24 sps:$4 sm:$0xff]  }
  0xb9   :  { %2684 = vmatpush1.bf16.msra.mxu1 %v9513_v23  ;;  %v9570_v23 = vld [vmem:[%s14007_s26 + $0xb10] ss:$24 sps:$4 sm:$0xff]  }
  0xba   :  { %2522 = vmatpush1.bf16.msra.mxu0 %v9480_v14  ;;  %2685 = vmatprep.subr.bf16.mxu1 %v9521_v25  ;;  %v9566_v14 = vld [vmem:[%s14007_s26 + $0xae4] ss:$24 sps:$4 sm:$0xff]  }
  0xbb   :  { %2523 = vmatprep.subr.bf16.mxu0 %v9488_v16  ;;  %v9585_v16 = vld [vmem:[%s14007_s26 + $0xa58] ss:$24 sps:$4 sm:$0xff]   ;;  %v9578_v25 = vld [vmem:[%s14007_s26 + $0xb44] ss:$24 sps:$4 sm:$0xff]  }
  0xbd   :  { %2686 = vmatpush1.bf16.msra.mxu1 %v9519_v27  ;;  %v9576_v27 = vld [vmem:[%s14007_s26 + $0xb40] ss:$24 sps:$4 sm:$0xff]  }
  0xbe   :  { %2524 = vmatpush1.bf16.msra.mxu0 %v9486_v19  ;;  %2687 = vmatprep.subr.bf16.mxu1 %v9527_v28  ;;  %v9572_v19 = vld [vmem:[%s14007_s26 + $0xb14] ss:$24 sps:$4 sm:$0xff]  }
  0xbf   :  { %2525 = vmatprep.subr.bf16.mxu0 %v9494_v22  ;;  %v9600_v22 = vld [vmem:[%s14007_s26 + $0xabc] ss:$24 sps:$4 sm:$0xff]  }
  0xc0   :  { %v9584_v28 = vld [vmem:[%s14007_s26 + $0xb74] ss:$24 sps:$4 sm:$0xff]  }
  0xc1   :  { %2688 = vmatpush1.bf16.msra.mxu1 %v9525_v32  ;;  %v9590_v32 = vld [vmem:[%s14007_s26 + $0xba4] ss:$24 sps:$4 sm:$0xff]  }
  0xc2   :  { %2526 = vmatpush1.bf16.msra.mxu0 %v9492_v12  ;;  %2689 = vmatprep.subr.bf16.mxu1 %v9533_v34  ;;  %v9598_v12 = vld [vmem:[%s14007_s26 + $0xab8] ss:$24 sps:$4 sm:$0xff]  }
  0xc3   :  { %2527 = vmatprep.subr.bf16.mxu0 %v9500_v26  ;;  %v9606_v26 = vld [vmem:[%s14007_s26 + $0xaec] ss:$24 sps:$4 sm:$0xff]   ;;  %v9610_v34 = vld [vmem:[%s14007_s26 + $0xb18] ss:$24 sps:$4 sm:$0xff]  }
  0xc5   :  { %2690 = vmatpush1.bf16.msra.mxu1 %v9531_v39  ;;  %v9616_v39 = vld [vmem:[%s14007_s26 + $0xb48] ss:$24 sps:$4 sm:$0xff]  }
  0xc6   :  { %2528 = vmatpush1.bf16.msra.mxu0 %v9498_v36  ;;  %2691 = vmatprep.subr.bf16.mxu1 %v9539_v40  ;;  %v9604_v36 = vld [vmem:[%s14007_s26 + $0xae8] ss:$24 sps:$4 sm:$0xff]   ;;  %v9624_v40 = vld [vmem:[%s14007_s26 + $0xb7c] ss:$24 sps:$4 sm:$0xff]  }
  0xc7   :  { %2538 = vmatprep.subr.bf16.mxu0 %v9506_v30  ;;  %v9582_v30 = vld [vmem:[%s14007_s26 + $0xb70] ss:$24 sps:$4 sm:$0xff]  }
  0xc9   :  { %2530 = vmatmul.mubr.bf16.vlgmr.msra.gmra.mrb[0].mxu0 %v11033_v33  ;;  %2692 = vmatpush1.bf16.msra.mxu1 %v9537_v42  ;;  %v9603_v42 = vld [vmem:[%s14007_s26 + $0x14] ss:$24 sps:$4 sm:$0xff]  }
  0xca   :  { %2539 = vmatpush1.bf16.msra.mxu0 %v9504_v35  ;;  %2570 = vmatprep.mubr.bf16.mxu0 %v11041_v37  ;;  %v9618_v35 = vld [vmem:[%s14007_s26 + $0xb4c] ss:$24 sps:$4 sm:$0xff]  }
  0xcb   :  { %2540 = vmatprep.subr.bf16.mxu0 %v9512_v38  ;;  %2702 = vmatprep.subr.bf16.mxu1 %v9545_v43  ;;  %v9588_v38 = vld [vmem:[%s14007_s26 + $0xba0] ss:$24 sps:$4 sm:$0xff]  }
  0xcc   :  { %2694 = vmatmul.mubr.bf16.vlgmr.msra.gmra.mrb[0].mxu1 %v11033_v33  ;;  %v9622_v43 = vld [vmem:[%s14007_s26 + $0xb78] ss:$24 sps:$4 sm:$0xff]  }
  0xcd   :  { %2703 = vmatpush1.bf16.msra.mxu1 %v9543_v46  ;;  %2734 = vmatprep.mubr.bf16.mxu1 %v11041_v37  ;;  %v9601_v46 = vld [vmem:[%s14007_s26 + $0x10] ss:$24 sps:$4 sm:$0xff]  }
  0xce   :  { %2541 = vmatpush1.bf16.msra.mxu0 %v9510_v15  ;;  %2704 = vmatprep.subr.bf16.mxu1 %v9551_v47  ;;  %v9596_v15 = vld [vmem:[%s14007_s26 + $0xbd4] ss:$24 sps:$4 sm:$0xff]   ;;  %v9609_v47 = vld [vmem:[%s14007_s26 + $0x44] ss:$24 sps:$4 sm:$0xff]  }
  0xcf   :  { %2542 = vmatprep.subr.bf16.mxu0 %v9518_v41  ;;  %v9594_v41 = vld [vmem:[%s14007_s26 + $0xbd0] ss:$24 sps:$4 sm:$0xff]  }
  0xd1   :  { %2705 = vmatpush1.bf16.msra.mxu1 %v9549_v51  ;;  %v9615_v51 = vld [vmem:[%s14007_s26 + $0x74] ss:$24 sps:$4 sm:$0xff]  }
  0xd2   :  { %2543 = vmatpush1.bf16.msra.mxu0 %v9516_v44  ;;  %2706 = vmatprep.subr.bf16.mxu1 %v9557_v52  ;;  %v11235_v44 = vpack.c.bf16 %v11009_v2, %v11009_v2  ;;  %v9628_v2 = vld [vmem:[%s14007_s26 + $0xba8] ss:$24 sps:$4 sm:$0xff]   ;;  %v9634_v52 = vld [vmem:[%s14007_s26 + $0xbd8] ss:$24 sps:$4 sm:$0xff]  }
  0xd3   :  { %2544 = vmatprep.subr.bf16.mxu0 %v9524_v45  ;;  %v9630_v45 = vld [vmem:[%s14007_s26 + $0xbac] ss:$24 sps:$4 sm:$0xff]  }
  0xd5   :  { %2707 = vmatpush1.bf16.msra.mxu1 %v9555_v55  ;;  %v9627_v55 = vld [vmem:[%s14007_s26 + $0xd4] ss:$24 sps:$4 sm:$0xff]  }
  0xd6   :  { %2545 = vmatpush1.bf16.msra.mxu0 %v9522_v49  ;;  %2708 = vmatprep.subr.bf16.mxu1 %v9563_v56  ;;  %v9636_v49 = vld [vmem:[%s14007_s26 + $0xbdc] ss:$24 sps:$4 sm:$0xff]   ;;  %v9625_v56 = vld [vmem:[%s14007_s26 + $0xd0] ss:$24 sps:$4 sm:$0xff]  }
  0xd7   :  { %2546 = vmatprep.subr.bf16.mxu0 %v9530_v50  ;;  %v9607_v50 = vld [vmem:[%s14007_s26 + $0x40] ss:$24 sps:$4 sm:$0xff]  }
  0xd9   :  { %2709 = vmatpush1.bf16.msra.mxu1 %v9561_v59  ;;  %v9639_v59 = vld [vmem:[%s14007_s26 + $0x134] ss:$24 sps:$4 sm:$0xff]  }
  0xda   :  { %2547 = vmatpush1.bf16.msra.mxu0 %v9528_v53  ;;  %2710 = vmatprep.subr.bf16.mxu1 %v9569_v60  ;;  %v9613_v53 = vld [vmem:[%s14007_s26 + $0x70] ss:$24 sps:$4 sm:$0xff]  }
  0xdb   :  { %2548 = vmatprep.subr.bf16.mxu0 %v9536_v54  ;;  %v9619_v54 = vld [vmem:[%s14007_s26 + $0xa0] ss:$24 sps:$4 sm:$0xff]   ;;  %v9637_v60 = vld [vmem:[%s14007_s26 + $0x130] ss:$24 sps:$4 sm:$0xff]  }
  0xdd   :  { %2711 = vmatpush1.bf16.msra.mxu1 %v9567_v63  ;;  %v9645_v63 = vld [vmem:[%s14007_s26 + $0x194] ss:$24 sps:$4 sm:$0xff]  }
  0xde   :  { %2549 = vmatpush1.bf16.msra.mxu0 %v9534_v57  ;;  %2712 = vmatprep.subr.bf16.mxu1 %v9575_v0  ;;  %v9633_v57 = vld [vmem:[%s14007_s26 + $0x104] ss:$24 sps:$4 sm:$0xff]   ;;  %v9643_v0 = vld [vmem:[%s14007_s26 + $0x190] ss:$24 sps:$4 sm:$0xff]  }
  0xdf   :  { %2550 = vmatprep.subr.bf16.mxu0 %v9542_v58  ;;  %v9631_v58 = vld [vmem:[%s14007_s26 + $0x100] ss:$24 sps:$4 sm:$0xff]  }
  0xe1   :  { %2713 = vmatpush1.bf16.msra.mxu1 %v9573_v4  ;;  %v9651_v4 = vld [vmem:[%s14007_s26 + $0x1f4] ss:$24 sps:$4 sm:$0xff]  }
  0xe2   :  { %2551 = vmatpush1.bf16.msra.mxu0 %v9540_v61  ;;  %2714 = vmatprep.subr.bf16.mxu1 %v9581_v5  ;;  %v9642_v61 = vld [vmem:[%s14007_s26 + $0x164] ss:$24 sps:$4 sm:$0xff]   ;;  %v9649_v5 = vld [vmem:[%s14007_s26 + $0x1f0] ss:$24 sps:$4 sm:$0xff]  }
  0xe3   :  { %2552 = vmatprep.subr.bf16.mxu0 %v9548_v62  ;;  %v9640_v62 = vld [vmem:[%s14007_s26 + $0x160] ss:$24 sps:$4 sm:$0xff]  }
  0xe5   :  { %2715 = vmatpush1.bf16.msra.mxu1 %v9579_v8  ;;  %v9657_v8 = vld [vmem:[%s14007_s26 + $0x254] ss:$24 sps:$4 sm:$0xff]  }
  0xe6   :  { %2553 = vmatpush1.bf16.msra.mxu0 %v9546_v1  ;;  %2716 = vmatprep.subr.bf16.mxu1 %v9587_v9  ;;  %v9648_v1 = vld [vmem:[%s14007_s26 + $0x1c4] ss:$24 sps:$4 sm:$0xff]   ;;  %v9655_v9 = vld [vmem:[%s14007_s26 + $0x250] ss:$24 sps:$4 sm:$0xff]  }
  0xe7   :  { %2554 = vmatprep.subr.bf16.mxu0 %v9554_v3  ;;  %v9646_v3 = vld [vmem:[%s14007_s26 + $0x1c0] ss:$24 sps:$4 sm:$0xff]  }
  0xe9   :  { %2717 = vmatpush1.bf16.msra.mxu1 %v9585_v16  ;;  %v9663_v16 = vld [vmem:[%s14007_s26 + $0x2b4] ss:$24 sps:$4 sm:$0xff]  }
  0xea   :  { %2555 = vmatpush1.bf16.msra.mxu0 %v9552_v6  ;;  %2718 = vmatprep.subr.bf16.mxu1 %v9593_v17  ;;  %v9654_v6 = vld [vmem:[%s14007_s26 + $0x224] ss:$24 sps:$4 sm:$0xff]   ;;  %v9661_v17 = vld [vmem:[%s14007_s26 + $0x2b0] ss:$24 sps:$4 sm:$0xff]  }
  0xeb   :  { %2556 = vmatprep.subr.bf16.mxu0 %v9560_v7  ;;  %v9652_v7 = vld [vmem:[%s14007_s26 + $0x220] ss:$24 sps:$4 sm:$0xff]  }
  0xed   :  { %2719 = vmatpush1.bf16.msra.mxu1 %v9591_v20  ;;  %v2955_v20 = vld [vmem:[%s13987_s6 + $0x88] sm:$0xff] }
  0xee   :  { %2557 = vmatpush1.bf16.msra.mxu0 %v9558_v11  ;;  %2720 = vmatprep.subr.bf16.mxu1 %v9600_v22  ;;  %v9660_v11 = vld [vmem:[%s14007_s26 + $0x284] ss:$24 sps:$4 sm:$0xff]  }
  0xef   :  { %2558 = vmatprep.subr.bf16.mxu0 %v9566_v14  ;;  %v9658_v14 = vld [vmem:[%s14007_s26 + $0x280] ss:$24 sps:$4 sm:$0xff]  }
  0xf1   :  { %2721 = vmatpush1.bf16.msra.mxu1 %v9598_v12  ;;  %v9664_v12 = vld [vmem:[%s14007_s26 + $0x2e0] ss:$24 sps:$4 sm:$0xff]  }
  0xf2   :  { %2559 = vmatpush1.bf16.msra.mxu0 %v9564_v18  ;;  %2722 = vmatprep.subr.bf16.mxu1 %v9606_v26  ;;  %v9666_v18 = vld [vmem:[%s14007_s26 + $0x2e4] ss:$24 sps:$4 sm:$0xff]  }
  0xf3   :  { %2560 = vmatprep.subr.bf16.mxu0 %v9572_v19  ;;  %v2954_v19 = vld [vmem:[%s13987_s6 + $0x80] sm:$0xff] }
  0xf4   :  { %v8785_v22 = vpack.c.bf16 %v2955_v20, %v2954_v19  ;;  %v2952_v20 = vld [vmem:[%s13987_s6 + $0x70] sm:$0xff] }
  0xf5   :  { %2723 = vmatpush1.bf16.msra.mxu1 %v9604_v36  ;;  %v2957_v36 = vld [vmem:[%s13987_s6 + $0x98] sm:$0xff] }
  0xf6   :  { %2561 = vmatpush1.bf16.msra.mxu0 %v9570_v23  ;;  %2724 = vmatprep.subr.bf16.mxu1 %v9612_v29  ;;  %v2938_v23 = vld [vmem:[%s13987_s6] sm:$0xff] }
  0xf7   :  { %2562 = vmatprep.subr.bf16.mxu0 %v9578_v25  ;;  %v2939_v25 = vld [vmem:[%s13987_s6 + $0x8] sm:$0xff] }
  0xf8   :  { %v8787_v26 = vpack.c.bf16 %v2939_v25, %v2938_v23  ;;  %v9685_v23 = vld [vmem:[%s14007_s26 + $0x430] ss:$24 sps:$4 sm:$0xff]  }
  0xf9   :  { %2725 = vmatpush1.bf16.msra.mxu1 %v9610_v34  ;;  %v9667_v34 = vld [vmem:[%s14007_s26 + $0x310] ss:$24 sps:$4 sm:$0xff]  }
  0xfa   :  { %2563 = vmatpush1.bf16.msra.mxu0 %v9576_v27  ;;  %2726 = vmatprep.subr.bf16.mxu1 %v9618_v35  ;;  %v9669_v27 = vld [vmem:[%s14007_s26 + $0x314] ss:$24 sps:$4 sm:$0xff]  }
  0xfb   :  { %2564 = vmatprep.subr.bf16.mxu0 %v9584_v28  ;;  %v2956_v28 = vld [vmem:[%s13987_s6 + $0x90] sm:$0xff] }
  0xfc   :  { %v8789_v29 = vpack.c.bf16 %v2957_v36, %v2956_v28  ;;  %v9688_v36 = vld [vmem:[%s14007_s26 + $0x460] ss:$24 sps:$4 sm:$0xff]  }
  0xfd   :  { %2727 = vmatpush1.bf16.msra.mxu1 %v9616_v39  ;;  %v2959_v39 = vld [vmem:[%s13987_s6 + $0xa8] sm:$0xff] }
  0xfe   :  { %2565 = vmatpush1.bf16.msra.mxu0 %v9582_v30  ;;  %2728 = vmatprep.subr.bf16.mxu1 %v9624_v40  ;;  %v2940_v30 = vld [vmem:[%s13987_s6 + $0x10] sm:$0xff] }
  0xff   :  { %2566 = vmatprep.subr.bf16.mxu0 %v9590_v32  ;;  %v2941_v32 = vld [vmem:[%s13987_s6 + $0x18] sm:$0xff] }
 0x100   :  { %v8791_v35 = vpack.c.bf16 %v2941_v32, %v2940_v30  ;;  %v9691_v30 = vld [vmem:[%s14007_s26 + $0x490] ss:$24 sps:$4 sm:$0xff]   ;;  %v9696_v32 = vld [vmem:[%s14007_s26 + $0x4c4] ss:$24 sps:$4 sm:$0xff]  }
 0x101   :  { %2729 = vmatpush1.bf16.msra.mxu1 %v9622_v43  ;;  %v9670_v43 = vld [vmem:[%s14007_s26 + $0x340] ss:$24 sps:$4 sm:$0xff]  }
 0x102   :  { %2567 = vmatpush1.bf16.msra.mxu0 %v9588_v38  ;;  %2730 = vmatprep.subr.bf16.mxu1 %v9630_v45  ;;  %v9672_v38 = vld [vmem:[%s14007_s26 + $0x344] ss:$24 sps:$4 sm:$0xff]  }
 0x103   :  { %2568 = vmatprep.subr.bf16.mxu0 %v9596_v15  ;;  %v2958_v15 = vld [vmem:[%s13987_s6 + $0xa0] sm:$0xff] }
 0x104   :  { %v8793_v40 = vpack.c.bf16 %v2959_v39, %v2958_v15  ;;  %v9702_v15 = vld [vmem:[%s14007_s26 + $0x524] ss:$24 sps:$4 sm:$0xff]   ;;  %v9700_v39 = vld [vmem:[%s14007_s26 + $0x520] ss:$24 sps:$4 sm:$0xff]  }
 0x105   :  { %2731 = vmatpush1.bf16.msra.mxu1 %v9628_v2 }
 0x106   :  { %2569 = vmatpush1.bf16.msra.mxu0 %v9594_v41  ;;  %2732 = vmatprep.subr.bf16.mxu1 %v9636_v49  ;;  %v2942_v41 = vld [vmem:[%s13987_s6 + $0x20] sm:$0xff]  ;;  %v2945_v49 = vld [vmem:[%s13987_s6 + $0x38] sm:$0xff] }
 0x107   :  { %2743 = vmatprep.subr.bf16.mxu0 %v9603_v42  ;;  %v2943_v42 = vld [vmem:[%s13987_s6 + $0x28] sm:$0xff] }
 0x108   :  { %v8795_v45 = vpack.c.bf16 %v2943_v42, %v2942_v41  ;;  %v9703_v41 = vld [vmem:[%s14007_s26 + $0x550] ss:$24 sps:$4 sm:$0xff]   ;;  %v9708_v42 = vld [vmem:[%s14007_s26 + $0x584] ss:$24 sps:$4 sm:$0xff]  }
 0x109   :  { %2571 = vmatmul.mubr.bf16.vlgmr.msra.gmra.mrb[0].mxu0 %v11235_v44  ;;  %2733 = vmatpush1.bf16.msra.mxu1 %v9634_v52  ;;  %v9678_v52 = vld [vmem:[%s14007_s26 + $0x3a4] ss:$24 sps:$4 sm:$0xff]  }
 0x10a   :  { %2744 = vmatpush1.bf16.msra.mxu0 %v9601_v46  ;;  %2775 = vmatprep.mubr.bf16.mxu0 %v10536_v48  ;;  %v9621_v48 = vld [vmem:[%s14007_s26 + $0xa4] ss:$24 sps:$4 sm:$0xff]   ;;  %v2960_v46 = vld [vmem:[%s13987_s6 + $0xb0] sm:$0xff] }
 0x10b   :  { %2745 = vmatprep.subr.bf16.mxu0 %v9609_v47  ;;  %8786 = vmatprep.subr.bf16.mxu1 %v8785_v22  ;;  %v2961_v47 = vld [vmem:[%s13987_s6 + $0xb8] sm:$0xff] }
 0x10c   :  { %2735 = vmatmul.mubr.bf16.vlgmr.msra.gmra.mrb[0].mxu1 %v11235_v44  ;;  %v8797_v2 = vpack.c.bf16 %v2961_v47, %v2960_v46  ;;  %v2953_v22 = vld [vmem:[%s13987_s6 + $0x78] sm:$0xff] }
 0x10d   :  { %8788 = vmatpush3.bf16.msra.mxu1 %v8787_v26  ;;  %v8815_v25 = vpack.c.bf16 %v2953_v22, %v2952_v20  ;;  %v2986_v26 = vld [vmem:[%s13987_s6 + $0x180] sm:$0xff]  ;;  %v9771_v22 = vld [vmem:[%s14007_s26 + $0x974] ss:$24 sps:$4 sm:$0xff]  }
 0x10e   :  { %2746 = vmatpush1.bf16.msra.mxu0 %v9607_v50  ;;  %8790 = vmatprep.subr.bf16.mxu1 %v8789_v29  ;;  %v9673_v50 = vld [vmem:[%s14007_s26 + $0x370] ss:$24 sps:$4 sm:$0xff]   ;;  %v9693_v29 = vld [vmem:[%s14007_s26 + $0x494] ss:$24 sps:$4 sm:$0xff]   ;;  %v9714_v46 = vld [vmem:[%s14007_s26 + $0x5e4] ss:$24 sps:$4 sm:$0xff]  }
 0x10f   :  { %2747 = vmatprep.subr.bf16.mxu0 %v9615_v51  ;;  %v9712_v47 = vld [vmem:[%s14007_s26 + $0x5e0] ss:$24 sps:$4 sm:$0xff]  }
 0x110   :  { %v9766_v20 = vld [vmem:[%s14007_s26 + $0x940] ss:$24 sps:$4 sm:$0xff]  }
 0x111   :  { %8792 = vmatpush3.bf16.msra.mxu1 %v8791_v35  ;;  %v9699_v35 = vld [vmem:[%s14007_s26 + $0x4f4] ss:$24 sps:$4 sm:$0xff]  }
 0x112   :  { %2748 = vmatpush1.bf16.msra.mxu0 %v9613_v53  ;;  %8794 = vmatprep.subr.bf16.mxu1 %v8793_v40  ;;  %v2962_v53 = vld [vmem:[%s13987_s6 + $0xc0] sm:$0xff]  ;;  %v9705_v40 = vld [vmem:[%s14007_s26 + $0x554] ss:$24 sps:$4 sm:$0xff]  }
 0x113   :  { %2749 = vmatprep.subr.bf16.mxu0 %v9621_v48  ;;  %v2963_v48 = vld [vmem:[%s13987_s6 + $0xc8] sm:$0xff] }
 0x115   :  { %8796 = vmatpush3.bf16.msra.mxu1 %v8795_v45  ;;  %v9711_v45 = vld [vmem:[%s14007_s26 + $0x5b4] ss:$24 sps:$4 sm:$0xff]  }
 0x116   :  { %2750 = vmatpush1.bf16.msra.mxu0 %v9619_v54  ;;  %8798 = vmatprep.subr.bf16.mxu1 %v8797_v2  ;;  %v8801_v54 = vpack.c.bf16 %v2963_v48, %v2962_v53  ;;  %v9717_v2 = vld [vmem:[%s14007_s26 + $0x614] ss:$24 sps:$4 sm:$0xff]   ;;  %v9727_v48 = vld [vmem:[%s14007_s26 + $0x6d0] ss:$24 sps:$4 sm:$0xff]  }
 0x117   :  { %2751 = vmatprep.subr.bf16.mxu0 %v9627_v55  ;;  %v2946_v55 = vld [vmem:[%s13987_s6 + $0x40] sm:$0xff]  ;;  %v9729_v53 = vld [vmem:[%s14007_s26 + $0x6d4] ss:$24 sps:$4 sm:$0xff]  }
 0x11a   :  { %2752 = vmatpush1.bf16.msra.mxu0 %v9625_v56  ;;  %v2947_v56 = vld [vmem:[%s13987_s6 + $0x48] sm:$0xff] }
 0x11b   :  { %2753 = vmatprep.subr.bf16.mxu0 %v9633_v57  ;;  %v9676_v57 = vld [vmem:[%s14007_s26 + $0x3a0] ss:$24 sps:$4 sm:$0xff]  }
 0x11e   :  { %2754 = vmatpush1.bf16.msra.mxu0 %v9631_v58  ;;  %v8803_v58 = vpack.c.bf16 %v2947_v56, %v2946_v55  ;;  %v9730_v55 = vld [vmem:[%s14007_s26 + $0x700] ss:$24 sps:$4 sm:$0xff]   ;;  %v9735_v56 = vld [vmem:[%s14007_s26 + $0x734] ss:$24 sps:$4 sm:$0xff]  }
 0x11f   :  { %2755 = vmatprep.subr.bf16.mxu0 %v9639_v59  ;;  %v9681_v59 = vld [vmem:[%s14007_s26 + $0x3d4] ss:$24 sps:$4 sm:$0xff]  }
 0x122   :  { %2756 = vmatpush1.bf16.msra.mxu0 %v9637_v60  ;;  %v2964_v60 = vld [vmem:[%s13987_s6 + $0xd0] sm:$0xff] }
 0x123   :  { %2757 = vmatprep.subr.bf16.mxu0 %v9642_v61  ;;  %v2965_v61 = vld [vmem:[%s13987_s6 + $0xd8] sm:$0xff] }
 0x126   :  { %2758 = vmatpush1.bf16.msra.mxu0 %v9640_v62  ;;  %v8805_v62 = vpack.c.bf16 %v2965_v61, %v2964_v60  ;;  %v9741_v60 = vld [vmem:[%s14007_s26 + $0x794] ss:$24 sps:$4 sm:$0xff]   ;;  %v9739_v61 = vld [vmem:[%s14007_s26 + $0x790] ss:$24 sps:$4 sm:$0xff]  }
 0x127   :  { %2759 = vmatprep.subr.bf16.mxu0 %v9645_v63  ;;  %v2948_v63 = vld [vmem:[%s13987_s6 + $0x50] sm:$0xff] }
 0x12a   :  { %2760 = vmatpush1.bf16.msra.mxu0 %v9643_v0  ;;  %v2949_v0 = vld [vmem:[%s13987_s6 + $0x58] sm:$0xff] }
 0x12b   :  { %2761 = vmatprep.subr.bf16.mxu0 %v9648_v1  ;;  %v9679_v1 = vld [vmem:[%s14007_s26 + $0x3d0] ss:$24 sps:$4 sm:$0xff]  }
 0x12e   :  { %2762 = vmatpush1.bf16.msra.mxu0 %v9646_v3  ;;  %v8807_v3 = vpack.c.bf16 %v2949_v0, %v2948_v63  ;;  %v9742_v63 = vld [vmem:[%s14007_s26 + $0x7c0] ss:$24 sps:$4 sm:$0xff]   ;;  %v9747_v0 = vld [vmem:[%s14007_s26 + $0x7f4] ss:$24 sps:$4 sm:$0xff]  }
 0x12f   :  { %2763 = vmatprep.subr.bf16.mxu0 %v9651_v4  ;;  %v9684_v4 = vld [vmem:[%s14007_s26 + $0x404] ss:$24 sps:$4 sm:$0xff]  }
 0x132   :  { %2764 = vmatpush1.bf16.msra.mxu0 %v9649_v5  ;;  %v2966_v5 = vld [vmem:[%s13987_s6 + $0xe0] sm:$0xff] }
 0x133   :  { %2765 = vmatprep.subr.bf16.mxu0 %v9654_v6  ;;  %v2967_v6 = vld [vmem:[%s13987_s6 + $0xe8] sm:$0xff] }
 0x136   :  { %2766 = vmatpush1.bf16.msra.mxu0 %v9652_v7  ;;  %v8809_v7 = vpack.c.bf16 %v2967_v6, %v2966_v5  ;;  %v9753_v5 = vld [vmem:[%s14007_s26 + $0x854] ss:$24 sps:$4 sm:$0xff]   ;;  %v9751_v6 = vld [vmem:[%s14007_s26 + $0x850] ss:$24 sps:$4 sm:$0xff]  }
 0x137   :  { %2767 = vmatprep.subr.bf16.mxu0 %v9657_v8  ;;  %v2950_v8 = vld [vmem:[%s13987_s6 + $0x60] sm:$0xff] }
 0x13a   :  { %2768 = vmatpush1.bf16.msra.mxu0 %v9655_v9  ;;  %v2951_v9 = vld [vmem:[%s13987_s6 + $0x68] sm:$0xff] }
 0x13b   :  { %2769 = vmatprep.subr.bf16.mxu0 %v9660_v11  ;;  %v9682_v11 = vld [vmem:[%s14007_s26 + $0x400] ss:$24 sps:$4 sm:$0xff]  }
 0x13e   :  { %2770 = vmatpush1.bf16.msra.mxu0 %v9658_v14  ;;  %v8811_v14 = vpack.c.bf16 %v2951_v9, %v2950_v8  ;;  %v9754_v8 = vld [vmem:[%s14007_s26 + $0x880] ss:$24 sps:$4 sm:$0xff]   ;;  %v9759_v9 = vld [vmem:[%s14007_s26 + $0x8b4] ss:$24 sps:$4 sm:$0xff]  }
 0x13f   :  { %2771 = vmatprep.subr.bf16.mxu0 %v9663_v16  ;;  %v9687_v16 = vld [vmem:[%s14007_s26 + $0x434] ss:$24 sps:$4 sm:$0xff]  }
 0x142   :  { %2772 = vmatpush1.bf16.msra.mxu0 %v9661_v17  ;;  %v2968_v17 = vld [vmem:[%s13987_s6 + $0xf0] sm:$0xff] }
 0x143   :  { %2773 = vmatprep.subr.bf16.mxu0 %v9666_v18  ;;  %v2969_v18 = vld [vmem:[%s13987_s6 + $0xf8] sm:$0xff] }
 0x144   :  { %v8813_v19 = vpack.c.bf16 %v2969_v18, %v2968_v17  ;;  %v9765_v17 = vld [vmem:[%s14007_s26 + $0x914] ss:$24 sps:$4 sm:$0xff]   ;;  %v9763_v18 = vld [vmem:[%s14007_s26 + $0x910] ss:$24 sps:$4 sm:$0xff]  }
 0x146   :  { %2774 = vmatpush1.bf16.msra.mxu0 %v9664_v12  ;;  %v9690_v12 = vld [vmem:[%s14007_s26 + $0x464] ss:$24 sps:$4 sm:$0xff]  }
 0x147   :  { %2784 = vmatprep.subr.bf16.mxu0 %v9669_v27  ;;  %v2987_v27 = vld [vmem:[%s13987_s6 + $0x188] sm:$0xff] }
 0x148   :  { %v8817_v28 = vpack.c.bf16 %v2987_v27, %v2986_v26  ;;  %v9780_v26 = vld [vmem:[%s14007_s26 + $0xa04] ss:$24 sps:$4 sm:$0xff]   ;;  %v9778_v27 = vld [vmem:[%s14007_s26 + $0xa00] ss:$24 sps:$4 sm:$0xff]  }
 0x149   :  { %2776 = vmatmul.mubr.bf16.vlgmr.msra.gmra.mrb[4].mxu0 %v10611_v10  ;;  %v9675_v10 = vld [vmem:[%s14007_s26 + $0x374] ss:$24 sps:$4 sm:$0xff]  }
 0x14a   :  { %2785 = vmatpush1.bf16.msra.mxu0 %v9667_v34  ;;  %2816 = vmatprep.mubr.bf16.mxu0 %v10619_v13  ;;  %v2944_v13 = vld [vmem:[%s13987_s6 + $0x30] sm:$0xff]  ;;  %v9694_v34 = vld [vmem:[%s14007_s26 + $0x4c0] ss:$24 sps:$4 sm:$0xff]  }
 0x14b   :  { %2786 = vmatprep.subr.bf16.mxu0 %v9672_v38  ;;  %v8799_v51 = vpack.c.bf16 %v2945_v49, %v2944_v13  ;;  %v9697_v38 = vld [vmem:[%s14007_s26 + $0x4f0] ss:$24 sps:$4 sm:$0xff]   ;;  %v9720_v49 = vld [vmem:[%s14007_s26 + $0x644] ss:$24 sps:$4 sm:$0xff]  }
 0x14c   :  { %v9715_v13 = vld [vmem:[%s14007_s26 + $0x610] ss:$24 sps:$4 sm:$0xff]  }
 0x14d   :  { %8800 = vmatpush3.bf16.msra.mxu1 %v8799_v51  ;;  %v9723_v51 = vld [vmem:[%s14007_s26 + $0x674] ss:$24 sps:$4 sm:$0xff]  }
 0x14e   :  { %2787 = vmatpush1.bf16.msra.mxu0 %v9670_v43  ;;  %8802 = vmatprep.subr.bf16.mxu1 %v8801_v54  ;;  %v9706_v43 = vld [vmem:[%s14007_s26 + $0x580] ss:$24 sps:$4 sm:$0xff]   ;;  %v9732_v54 = vld [vmem:[%s14007_s26 + $0x704] ss:$24 sps:$4 sm:$0xff]  }
 0x14f   :  { %2788 = vmatprep.subr.bf16.mxu0 %v9675_v10  ;;  %v9709_v10 = vld [vmem:[%s14007_s26 + $0x5b0] ss:$24 sps:$4 sm:$0xff]  }
 0x151   :  { %8804 = vmatpush3.bf16.msra.mxu1 %v8803_v58  ;;  %v9738_v58 = vld [vmem:[%s14007_s26 + $0x764] ss:$24 sps:$4 sm:$0xff]  }
 0x152   :  { %2789 = vmatpush1.bf16.msra.mxu0 %v9673_v50  ;;  %8806 = vmatprep.subr.bf16.mxu1 %v8805_v62  ;;  %v9718_v50 = vld [vmem:[%s14007_s26 + $0x640] ss:$24 sps:$4 sm:$0xff]   ;;  %v9744_v62 = vld [vmem:[%s14007_s26 + $0x7c4] ss:$24 sps:$4 sm:$0xff]  }
 0x153   :  { %2790 = vmatprep.subr.bf16.mxu0 %v9678_v52  ;;  %v9721_v52 = vld [vmem:[%s14007_s26 + $0x670] ss:$24 sps:$4 sm:$0xff]  }
 0x155   :  { %8808 = vmatpush3.bf16.msra.mxu1 %v8807_v3  ;;  %v9750_v3 = vld [vmem:[%s14007_s26 + $0x824] ss:$24 sps:$4 sm:$0xff]  }
 0x156   :  { %2791 = vmatpush1.bf16.msra.mxu0 %v9676_v57  ;;  %8810 = vmatprep.subr.bf16.mxu1 %v8809_v7  ;;  %v9733_v57 = vld [vmem:[%s14007_s26 + $0x730] ss:$24 sps:$4 sm:$0xff]   ;;  %v9756_v7 = vld [vmem:[%s14007_s26 + $0x884] ss:$24 sps:$4 sm:$0xff]  }
 0x157   :  { %2792 = vmatprep.subr.bf16.mxu0 %v9681_v59  ;;  %v9736_v59 = vld [vmem:[%s14007_s26 + $0x760] ss:$24 sps:$4 sm:$0xff]  }
 0x159   :  { %8812 = vmatpush3.bf16.msra.mxu1 %v8811_v14  ;;  %v9762_v14 = vld [vmem:[%s14007_s26 + $0x8e4] ss:$24 sps:$4 sm:$0xff]  }
 0x15a   :  { %2793 = vmatpush1.bf16.msra.mxu0 %v9679_v1  ;;  %8814 = vmatprep.subr.bf16.mxu1 %v8813_v19  ;;  %v9745_v1 = vld [vmem:[%s14007_s26 + $0x7f0] ss:$24 sps:$4 sm:$0xff]   ;;  %v9768_v19 = vld [vmem:[%s14007_s26 + $0x944] ss:$24 sps:$4 sm:$0xff]  }
 0x15b   :  { %2794 = vmatprep.subr.bf16.mxu0 %v9684_v4  ;;  %v9748_v4 = vld [vmem:[%s14007_s26 + $0x820] ss:$24 sps:$4 sm:$0xff]  }
 0x15d   :  { %8816 = vmatpush3.bf16.msra.mxu1 %v8815_v25  ;;  %v9777_v25 = vld [vmem:[%s14007_s26 + $0x9d4] ss:$24 sps:$4 sm:$0xff]  }
 0x15e   :  { %2795 = vmatpush1.bf16.msra.mxu0 %v9682_v11  ;;  %8818 = vmatprep.subr.bf16.mxu1 %v8817_v28  ;;  %v9757_v11 = vld [vmem:[%s14007_s26 + $0x8b0] ss:$24 sps:$4 sm:$0xff]   ;;  %v9783_v28 = vld [vmem:[%s14007_s26 + $0xa34] ss:$24 sps:$4 sm:$0xff]  }
 0x15f   :  { %2796 = vmatprep.subr.bf16.mxu0 %v9687_v16  ;;  %v9760_v16 = vld [vmem:[%s14007_s26 + $0x8e0] ss:$24 sps:$4 sm:$0xff]  }
 0x162   :  { %2797 = vmatpush1.bf16.msra.mxu0 %v9685_v23  ;;  %v9769_v23 = vld [vmem:[%s14007_s26 + $0x970] ss:$24 sps:$4 sm:$0xff]  }
 0x163   :  { %2798 = vmatprep.subr.bf16.mxu0 %v9690_v12  ;;  %v9775_v12 = vld [vmem:[%s14007_s26 + $0x9d0] ss:$24 sps:$4 sm:$0xff]  }
 0x166   :  { %2799 = vmatpush1.bf16.msra.mxu0 %v9688_v36 }
 0x167   :  { %2800 = vmatprep.subr.bf16.mxu0 %v9693_v29 }
 0x16a   :  { %2801 = vmatpush1.bf16.msra.mxu0 %v9691_v30 }
 0x16b   :  { %2802 = vmatprep.subr.bf16.mxu0 %v9696_v32 }
 0x16e   :  { %2803 = vmatpush1.bf16.msra.mxu0 %v9694_v34 }
 0x16f   :  { %2804 = vmatprep.subr.bf16.mxu0 %v9699_v35  ;;  %v9781_v35 = vld [vmem:[%s14007_s26 + $0xa30] ss:$24 sps:$4 sm:$0xff]  }
 0x172   :  { %2805 = vmatpush1.bf16.msra.mxu0 %v9697_v38  ;;  %v2970_v38 = vld [vmem:[%s13987_s6 + $0x100] sm:$0xff] }
 0x173   :  { %2806 = vmatprep.subr.bf16.mxu0 %v9702_v15  ;;  %v2971_v15 = vld [vmem:[%s13987_s6 + $0x108] sm:$0xff] }
 0x176   :  { %2807 = vmatpush1.bf16.msra.mxu0 %v9700_v39 }
 0x177   :  { %2808 = vmatprep.subr.bf16.mxu0 %v9705_v40 }
 0x17a   :  { %2809 = vmatpush1.bf16.msra.mxu0 %v9703_v41  ;;  %v9786_v41 = vld [vmem:[%s14007_s26 + $0xa64] ss:$24 sps:$4 sm:$0xff]  }
 0x17b   :  { %2810 = vmatprep.subr.bf16.mxu0 %v9708_v42  ;;  %v2988_v42 = vld [vmem:[%s13987_s6 + $0x190] sm:$0xff] }
 0x17e   :  { %2811 = vmatpush1.bf16.msra.mxu0 %v9706_v43  ;;  %v2989_v43 = vld [vmem:[%s13987_s6 + $0x198] sm:$0xff] }
 0x17f   :  { %2812 = vmatprep.subr.bf16.mxu0 %v9711_v45 }
 0x182   :  { %2813 = vmatpush1.bf16.msra.mxu0 %v9709_v10  ;;  %v8819_v10 = vpack.c.bf16 %v2971_v15, %v2970_v38  ;;  %v2982_v38 = vld [vmem:[%s13987_s6 + $0x160] sm:$0xff]  ;;  %v2983_v15 = vld [vmem:[%s13987_s6 + $0x168] sm:$0xff] }
 0x183   :  { %2814 = vmatprep.subr.bf16.mxu0 %v9714_v46 }
 0x186   :  { %2815 = vmatpush1.bf16.msra.mxu0 %v9712_v47  ;;  %v9784_v47 = vld [vmem:[%s14007_s26 + $0xa60] ss:$24 sps:$4 sm:$0xff]  }
 0x187   :  { %2825 = vmatprep.subr.bf16.mxu0 %v9717_v2  ;;  %v8821_v2 = vpack.c.bf16 %v2989_v43, %v2988_v42  ;;  %v8843_v42 = vpack.c.bf16 %v2983_v15, %v2982_v38  ;;  %v9802_v43 = vld [vmem:[%s14007_s26 + $0xb80] ss:$24 sps:$4 sm:$0xff]  }
 0x189   :  { %2817 = vmatmul.mubr.bf16.vlgmr.msra.gmra.mrb[4].mxu0 %v10824_v21  ;;  %v9726_v21 = vld [vmem:[%s14007_s26 + $0x6a4] ss:$24 sps:$4 sm:$0xff]  }
 0x18a   :  { %2826 = vmatpush1.bf16.msra.mxu0 %v9715_v13  ;;  %2857 = vmatprep.mubr.bf16.mxu0 %v10832_v24  ;;  %v9724_v24 = vld [vmem:[%s14007_s26 + $0x6a0] ss:$24 sps:$4 sm:$0xff]   ;;  %v2972_v13 = vld [vmem:[%s13987_s6 + $0x110] sm:$0xff] }
 0x18b   :  { %2827 = vmatprep.subr.bf16.mxu0 %v9720_v49  ;;  %v2973_v49 = vld [vmem:[%s13987_s6 + $0x118] sm:$0xff] }
 0x18e   :  { %2828 = vmatpush1.bf16.msra.mxu0 %v9718_v50 }
 0x18f   :  { %2829 = vmatprep.subr.bf16.mxu0 %v9723_v51  ;;  %v9789_v51 = vld [vmem:[%s14007_s26 + $0xa94] ss:$24 sps:$4 sm:$0xff]  }
 0x192   :  { %2830 = vmatpush1.bf16.msra.mxu0 %v9721_v52  ;;  %v2990_v52 = vld [vmem:[%s13987_s6 + $0x1a0] sm:$0xff] }
 0x193   :  { %2831 = vmatprep.subr.bf16.mxu0 %v9726_v21  ;;  %v2991_v21 = vld [vmem:[%s13987_s6 + $0x1a8] sm:$0xff] }
 0x196   :  { %2832 = vmatpush1.bf16.msra.mxu0 %v9724_v24  ;;  %v8823_v24 = vpack.c.bf16 %v2973_v49, %v2972_v13  ;;  %v9805_v49 = vld [vmem:[%s14007_s26 + $0xbb0] ss:$24 sps:$4 sm:$0xff]  }
 0x197   :  { %2833 = vmatprep.subr.bf16.mxu0 %v9729_v53  ;;  %v9787_v53 = vld [vmem:[%s14007_s26 + $0xa90] ss:$24 sps:$4 sm:$0xff]  }
 0x19a   :  { %2834 = vmatpush1.bf16.msra.mxu0 %v9727_v48  ;;  %v8825_v48 = vpack.c.bf16 %v2991_v21, %v2990_v52  ;;  %v9808_v52 = vld [vmem:[%s14007_s26 + $0xbe0] ss:$24 sps:$4 sm:$0xff]  }
 0x19b   :  { %2835 = vmatprep.subr.bf16.mxu0 %v9732_v54  ;;  %v2974_v54 = vld [vmem:[%s13987_s6 + $0x120] sm:$0xff] }
 0x19e   :  { %2836 = vmatpush1.bf16.msra.mxu0 %v9730_v55  ;;  %v2975_v55 = vld [vmem:[%s13987_s6 + $0x128] sm:$0xff] }
 0x19f   :  { %2837 = vmatprep.subr.bf16.mxu0 %v9735_v56 }
 0x1a2   :  { %2838 = vmatpush1.bf16.msra.mxu0 %v9733_v57  ;;  %v9792_v57 = vld [vmem:[%s14007_s26 + $0xac4] ss:$24 sps:$4 sm:$0xff]  }
 0x1a3   :  { %2839 = vmatprep.subr.bf16.mxu0 %v9738_v58  ;;  %v2992_v58 = vld [vmem:[%s13987_s6 + $0x1b0] sm:$0xff] }
 0x1a6   :  { %2840 = vmatpush1.bf16.msra.mxu0 %v9736_v59  ;;  %v2993_v59 = vld [vmem:[%s13987_s6 + $0x1b8] sm:$0xff] }
 0x1a7   :  { %2841 = vmatprep.subr.bf16.mxu0 %v9741_v60 }
 0x1aa   :  { %2842 = vmatpush1.bf16.msra.mxu0 %v9739_v61 }
 0x1ab   :  { %2843 = vmatprep.subr.bf16.mxu0 %v9744_v62 }
 0x1ae   :  { %2844 = vmatpush1.bf16.msra.mxu0 %v9742_v63  ;;  %v8827_v63 = vpack.c.bf16 %v2975_v55, %v2974_v54  ;;  %v10316_v54 = vmov 0.0|0.0  }
 0x1af   :  { %2845 = vmatprep.subr.bf16.mxu0 %v9747_v0 }
 0x1b2   :  { %2846 = vmatpush1.bf16.msra.mxu0 %v9745_v1  ;;  %v9790_v1 = vld [vmem:[%s14007_s26 + $0xac0] ss:$24 sps:$4 sm:$0xff]  }
 0x1b3   :  { %2847 = vmatprep.subr.bf16.mxu0 %v9750_v3  ;;  %v8829_v3 = vpack.c.bf16 %v2993_v59, %v2992_v58  ;;  %v3006_v58 = vld [vmem:[%s13987_s6 + $0x220] sm:$0xff]  ;;  %v3007_v59 = vld [vmem:[%s13987_s6 + $0x228] sm:$0xff] }
 0x1b6   :  { %2848 = vmatpush1.bf16.msra.mxu0 %v9748_v4  ;;  %v2976_v4 = vld [vmem:[%s13987_s6 + $0x130] sm:$0xff] }
 0x1b7   :  { %2849 = vmatprep.subr.bf16.mxu0 %v9753_v5  ;;  %v2977_v5 = vld [vmem:[%s13987_s6 + $0x138] sm:$0xff] }
 0x1ba   :  { %2850 = vmatpush1.bf16.msra.mxu0 %v9751_v6 }
 0x1bb   :  { %2851 = vmatprep.subr.bf16.mxu0 %v9756_v7  ;;  %v9795_v7 = vld [vmem:[%s14007_s26 + $0xaf4] ss:$24 sps:$4 sm:$0xff]  }
 0x1be   :  { %2852 = vmatpush1.bf16.msra.mxu0 %v9754_v8  ;;  %v2994_v8 = vld [vmem:[%s13987_s6 + $0x1c0] sm:$0xff] }
 0x1bf   :  { %2853 = vmatprep.subr.bf16.mxu0 %v9759_v9  ;;  %v2995_v9 = vld [vmem:[%s13987_s6 + $0x1c8] sm:$0xff] }
 0x1c2   :  { %2854 = vmatpush1.bf16.msra.mxu0 %v9757_v11 }
 0x1c3   :  { %2855 = vmatprep.subr.bf16.mxu0 %v9762_v14  ;;  %v8831_v14 = vpack.c.bf16 %v2977_v5, %v2976_v4  ;;  %v3012_v5 = vld [vmem:[%s13987_s6 + $0x250] sm:$0xff] }
 0x1c6   :  { %2856 = vmatpush1.bf16.msra.mxu0 %v9760_v16  ;;  %v9793_v16 = vld [vmem:[%s14007_s26 + $0xaf0] ss:$24 sps:$4 sm:$0xff]  }
 0x1c7   :  { %2866 = vmatprep.subr.bf16.mxu0 %v9765_v17  ;;  %v8833_v17 = vpack.c.bf16 %v2995_v9, %v2994_v8  ;;  %v3014_v8 = vld [vmem:[%s13987_s6 + $0x260] sm:$0xff]  ;;  %v3015_v9 = vld [vmem:[%s13987_s6 + $0x268] sm:$0xff] }
 0x1c9   :  { %2858 = vmatmul.mubr.bf16.vlgmr.msra.gmra.mrb[4].mxu0 %v11033_v33  ;;  %v9774_v33 = vld [vmem:[%s14007_s26 + $0x9a4] ss:$24 sps:$4 sm:$0xff]  }
 0x1ca   :  { %2867 = vmatpush1.bf16.msra.mxu0 %v9763_v18  ;;  %2898 = vmatprep.mubr.bf16.mxu0 %v11041_v37  ;;  %v9772_v37 = vld [vmem:[%s14007_s26 + $0x9a0] ss:$24 sps:$4 sm:$0xff]  }
 0x1cb   :  { %2868 = vmatprep.subr.bf16.mxu0 %v9768_v19  ;;  %v2978_v18 = vld [vmem:[%s13987_s6 + $0x140] sm:$0xff]  ;;  %v2979_v19 = vld [vmem:[%s13987_s6 + $0x148] sm:$0xff] }
 0x1ce   :  { %2869 = vmatpush1.bf16.msra.mxu0 %v9766_v20  ;;  %v9798_v20 = vld [vmem:[%s14007_s26 + $0xb24] ss:$24 sps:$4 sm:$0xff]  }
 0x1cf   :  { %2870 = vmatprep.subr.bf16.mxu0 %v9771_v22  ;;  %v2996_v22 = vld [vmem:[%s13987_s6 + $0x1d0] sm:$0xff] }
 0x1d2   :  { %2871 = vmatpush1.bf16.msra.mxu0 %v9769_v23  ;;  %v2997_v23 = vld [vmem:[%s13987_s6 + $0x1d8] sm:$0xff] }
 0x1d3   :  { %2872 = vmatprep.subr.bf16.mxu0 %v9774_v33  ;;  %v8835_v33 = vpack.c.bf16 %v2979_v19, %v2978_v18  ;;  %v10317_v18 = vmov 0.0   ;;  %v3018_v19 = vld [vmem:[%s13987_s6 + $0x280] sm:$0xff] }
 0x1d6   :  { %2873 = vmatpush1.bf16.msra.mxu0 %v9772_v37  ;;  %v9796_v37 = vld [vmem:[%s14007_s26 + $0xb20] ss:$24 sps:$4 sm:$0xff]  }
 0x1d7   :  { %2874 = vmatprep.subr.bf16.mxu0 %v9777_v25  ;;  %v8837_v25 = vpack.c.bf16 %v2997_v23, %v2996_v22 }
 0x1da   :  { %2875 = vmatpush1.bf16.msra.mxu0 %v9775_v12  ;;  %v2980_v12 = vld [vmem:[%s13987_s6 + $0x150] sm:$0xff] }
 0x1db   :  { %2876 = vmatprep.subr.bf16.mxu0 %v9780_v26  ;;  %v2981_v26 = vld [vmem:[%s13987_s6 + $0x158] sm:$0xff] }
 0x1dc   :  { %v11684_v36 = vpop.f32.mrb[0].mxu0 }
 0x1dd   :  { %v2907_v29 = vmul.f32 %v11684_v36, %v11684_v36  ;;  %v11688_v30 = vpop.f32.mrb[1].mxu0 }
 0x1de   :  { %v2908_v32 = vmul.f32 %v11688_v30, %v11688_v30  ;;  %v2576_v34 = vpop.f32.mrb[2].mxu0  ;;  %2877 = vmatpush1.bf16.msra.mxu0 %v9778_v27  ;;  %v9801_v27 = vld [vmem:[%s14007_s26 + $0xb54] ss:$24 sps:$4 sm:$0xff]  }
 0x1df   :  { %v2919_v39 = vrot.slane %v2907_v29, 6  ;;  %v2577_v40 = vpop.f32.mrb[3].mxu0  ;;  %2878 = vmatprep.subr.bf16.mxu0 %v9783_v28  ;;  %v11741_v56 = vpop.f32.mrb[0].mxu1  ;;  %v2998_v28 = vld [vmem:[%s13987_s6 + $0x1e0] sm:$0xff]  ;;  %v2999_v29 = vld [vmem:[%s13987_s6 + $0x1e8] sm:$0xff] }
 0x1e0   :  { %v2920_v45 = vrot.slane %v2908_v32, 6  ;;  %v11752_v60 = vpop.f32.mrb[1].mxu1  ;;  %v8839_v32 = vpack.c.bf16 %v2981_v26, %v2980_v12  ;;  %v9799_v34 = vld [vmem:[%s14007_s26 + $0xb50] ss:$24 sps:$4 sm:$0xff]  }
 0x1e1   :  { %v2932_v50 = vsel %vm2931_vm0, %v11684_v36, %v2919_v39  ;;  %v2910_v61 = vmul.f32 %v11752_v60, %v11752_v60  ;;  %v2740_v62 = vpop.f32.mrb[2].mxu1  ;;  %v9804_v39 = vld [vmem:[%s14007_s26 + $0xb84] ss:$24 sps:$4 sm:$0xff]   ;;  %v3000_v40 = vld [vmem:[%s13987_s6 + $0x1f0] sm:$0xff] }
 0x1e2   :  { %2879 = vmatpush1.bf16.msra.mxu0 %v9781_v35  ;;  %v2933_v46 = vsel %vm2931_vm0, %v11688_v30, %v2920_v45  ;;  %v2741_v0 = vpop.f32.mrb[3].mxu1  ;;  %v8841_v35 = vpack.c.bf16 %v2999_v29, %v2998_v28  ;;  %v3008_v62 = vld [vmem:[%s13987_s6 + $0x230] sm:$0xff] }
 0x1e3   :  { %3087 = vmatprep.mubr.f32.mxu1 %v2933_v46  ;;  %2880 = vmatprep.subr.bf16.mxu0 %v9786_v41  ;;  %v2922_v6 = vrot.slane %v2910_v61, 6  ;;  %v3001_v41 = vld [vmem:[%s13987_s6 + $0x1f8] sm:$0xff]  ;;  %v8856_v61 = vpack.c.bf16 %v3007_v59, %v3006_v58 }
 0x1e4   :  { %3088 = vmatmul.mubr.f32.vlgmr.msra.gmra.mrb[4].mxu1 %v2932_v50  ;;  %v8845_v45 = vpack.c.bf16 %v3001_v41, %v3000_v40  ;;  %v2985_v46 = vld [vmem:[%s13987_s6 + $0x178] sm:$0xff]  ;;  %v3251_v40 = vld [vmem:[%s13988_s11 + $0x8] sm:$0xff]  ;;  %v3250_v41 = vld [vmem:[%s13988_s11] sm:$0xff] }
 0x1e5   :  { %8820 = vmatpush3.bf16.msra.mxu1 %v8819_v10  ;;  %v2935_v11 = vsel %vm2931_vm0, %v11752_v60, %v2922_v6  ;;  %v2984_v10 = vld [vmem:[%s13987_s6 + $0x170] sm:$0xff]  ;;  %v3013_v6 = vld [vmem:[%s13987_s6 + $0x258] sm:$0xff] }
 0x1e6   :  { %2881 = vmatpush1.bf16.msra.mxu0 %v9784_v47  ;;  %8822 = vmatprep.subr.bf16.mxu1 %v8821_v2  ;;  %v2909_v47 = vmul.f32 %v11741_v56, %v11741_v56  ;;  %v9807_v2 = vld [vmem:[%s14007_s26 + $0xbb4] ss:$24 sps:$4 sm:$0xff]   ;;  %v8847_v13 = vpack.c.bf16 %v2985_v46, %v2984_v10  ;;  %v9820_v10 = vld [vmem:[%s13989_s2 + $0x28] ss:$16 sps:$4 sm:$0xff]  }
 0x1e7   :  { %2882 = vmatprep.subr.bf16.mxu0 %v9789_v51  ;;  %3157 = vmatprep.mubr.f32.mxu1 %v2935_v11  ;;  %v9810_v51 = vld [vmem:[%s14007_s26 + $0xbe4] ss:$24 sps:$4 sm:$0xff]   ;;  %v8868_v11 = vpack.c.bf16 %v3015_v9, %v3014_v8  ;;  %v9868_v59 = vld [vmem:[%s13989_s2 + $0x128] ss:$16 sps:$4 sm:$0xff]  }
 0x1e8   :  { %v2921_v50 = vrot.slane %v2909_v47, 6  ;;  %v9822_v46 = vld [vmem:[%s13989_s2 + $0x2c] ss:$16 sps:$4 sm:$0xff]  }
 0x1e9   :  { %8824 = vmatpush3.bf16.msra.mxu1 %v8823_v24  ;;  %v3002_v24 = vld [vmem:[%s13987_s6 + $0x200] sm:$0xff]  ;;  %v9828_v47 = vld [vmem:[%s13989_s2 + $0x4c] ss:$16 sps:$4 sm:$0xff]  }
 0x1ea   :  { %2883 = vmatpush1.bf16.msra.mxu0 %v9787_v53  ;;  %8826 = vmatprep.subr.bf16.mxu1 %v8825_v48  ;;  %v2934_v21 = vsel %vm2931_vm0, %v11741_v56, %v2921_v50  ;;  %v3003_v53 = vld [vmem:[%s13987_s6 + $0x208] sm:$0xff]  ;;  %v3004_v48 = vld [vmem:[%s13987_s6 + $0x210] sm:$0xff] }
 0x1eb   :  { %2884 = vmatprep.subr.bf16.mxu0 %v9792_v57  ;;  %v8850_v55 = vpack.c.bf16 %v3003_v53, %v3002_v24  ;;  %v9840_v50 = vld [vmem:[%s13989_s2 + $0x8c] ss:$16 sps:$4 sm:$0xff]   ;;  %v9850_v53 = vld [vmem:[%s13989_s2 + $0xc8] ss:$16 sps:$4 sm:$0xff]  }
 0x1ec   :  { %v9852_v24 = vld [vmem:[%s13989_s2 + $0xcc] ss:$16 sps:$4 sm:$0xff]  }
 0x1ed   :  { %8828 = vmatpush3.bf16.msra.mxu1 %v8827_v63  ;;  %v3009_v63 = vld [vmem:[%s13987_s6 + $0x238] sm:$0xff] }
 0x1ee   :  { %2885 = vmatpush1.bf16.msra.mxu0 %v9790_v1  ;;  %8830 = vmatprep.subr.bf16.mxu1 %v8829_v3  ;;  %v8859_v0 = vpack.c.bf16 %v3009_v63, %v3008_v62  ;;  %v3010_v1 = vld [vmem:[%s13987_s6 + $0x240] sm:$0xff]  ;;  %v3011_v3 = vld [vmem:[%s13987_s6 + $0x248] sm:$0xff] }
 0x1ef   :  { %2886 = vmatprep.subr.bf16.mxu0 %v9795_v7  ;;  %v8862_v4 = vpack.c.bf16 %v3011_v3, %v3010_v1  ;;  %v8865_v7 = vpack.c.bf16 %v3013_v6, %v3012_v5  ;;  %v9870_v58 = vld [vmem:[%s13989_s2 + $0x12c] ss:$16 sps:$4 sm:$0xff]   ;;  %v9874_v62 = vld [vmem:[%s13989_s2 + $0x148] ss:$16 sps:$4 sm:$0xff]  }
 0x1f0   :  { %v9882_v63 = vld [vmem:[%s13989_s2 + $0x16c] ss:$16 sps:$4 sm:$0xff]   ;;  %v9886_v3 = vld [vmem:[%s13989_s2 + $0x188] ss:$16 sps:$4 sm:$0xff]  }
 0x1f1   :  { %8832 = vmatpush3.bf16.msra.mxu1 %v8831_v14  ;;  %v3016_v14 = vld [vmem:[%s13987_s6 + $0x270] sm:$0xff]  ;;  %v9888_v1 = vld [vmem:[%s13989_s2 + $0x18c] ss:$16 sps:$4 sm:$0xff]  }
 0x1f2   :  { %2887 = vmatpush1.bf16.msra.mxu0 %v9793_v16  ;;  %8834 = vmatprep.subr.bf16.mxu1 %v8833_v17  ;;  %v3017_v16 = vld [vmem:[%s13987_s6 + $0x278] sm:$0xff] }
 0x1f3   :  { %2888 = vmatprep.subr.bf16.mxu0 %v9798_v20  ;;  %v8871_v17 = vpack.c.bf16 %v3017_v16, %v3016_v14 }
 0x1f5   :  { %8836 = vmatpush3.bf16.msra.mxu1 %v8835_v33 }
 0x1f6   :  { %2889 = vmatpush1.bf16.msra.mxu0 %v9796_v37  ;;  %8838 = vmatprep.subr.bf16.mxu1 %v8837_v25 }
 0x1f7   :  { %2890 = vmatprep.subr.bf16.mxu0 %v9801_v27 }
 0x1f9   :  { %8840 = vmatpush3.bf16.msra.mxu1 %v8839_v32 }
 0x1fa   :  { %2891 = vmatpush1.bf16.msra.mxu0 %v9799_v34  ;;  %8842 = vmatprep.subr.bf16.mxu1 %v8841_v35 }
 0x1fb   :  { %2892 = vmatprep.subr.bf16.mxu0 %v9804_v39 }
 0x1fd   :  { %8844 = vmatpush3.bf16.msra.mxu1 %v8843_v42  ;;  %v3253_v42 = vld [vmem:[%s13988_s11 + $0x18] sm:$0xff] }
 0x1fe   :  { %2893 = vmatpush1.bf16.msra.mxu0 %v9802_v43  ;;  %8846 = vmatprep.subr.bf16.mxu1 %v8845_v45  ;;  %v9814_v43 = vld [vmem:[%s13989_s2 + $0x8] ss:$16 sps:$4 sm:$0xff]   ;;  %v9816_v45 = vld [vmem:[%s13989_s2 + $0xc] ss:$16 sps:$4 sm:$0xff]  }
 0x1ff   :  { %2894 = vmatprep.subr.bf16.mxu0 %v9807_v2  ;;  %v9826_v2 = vld [vmem:[%s13989_s2 + $0x48] ss:$16 sps:$4 sm:$0xff]  }
 0x201   :  { %8848 = vmatpush3.bf16.msra.mxu1 %v8847_v13  ;;  %v9834_v13 = vld [vmem:[%s13989_s2 + $0x6c] ss:$16 sps:$4 sm:$0xff]  }
 0x202   :  { %2895 = vmatpush1.bf16.msra.mxu0 %v9805_v49  ;;  %8849 = vmatprep.subr.bf16.mxu1 %v10316_v54  ;;  %v9832_v49 = vld [vmem:[%s13989_s2 + $0x68] ss:$16 sps:$4 sm:$0xff]  }
 0x203   :  { %2896 = vmatprep.subr.bf16.mxu0 %v9810_v51  ;;  %v9838_v51 = vld [vmem:[%s13989_s2 + $0x88] ss:$16 sps:$4 sm:$0xff]  }
 0x204   :  { %3158 = vmatmul.mubr.f32.vlgmr.msra.gmra.mrb[6].mxu1 %v2934_v21  ;;  %v9844_v21 = vld [vmem:[%s13989_s2 + $0xa8] ss:$16 sps:$4 sm:$0xff]  }
 0x205   :  { %8851 = vmatpush1.bf16.msra.mxu1 %v8850_v55  ;;  %v9856_v55 = vld [vmem:[%s13989_s2 + $0xe8] ss:$16 sps:$4 sm:$0xff]  }
 0x206   :  { %2897 = vmatpush1.bf16.msra.mxu0 %v9808_v52  ;;  %8852 = vmatprep.subr.bf16.mxu1 %v10316_v54  ;;  %v9846_v52 = vld [vmem:[%s13989_s2 + $0xac] ss:$16 sps:$4 sm:$0xff]  }
 0x207   :  { %4631 = vmatprep.subr.bf16.mxu0 %v9816_v45  ;;  %v9847_v45 = vld [vmem:[%s13989_s2 + $0xc0] ss:$16 sps:$4 sm:$0xff]  }
 0x209   :  { %2899 = vmatmul.mubr.bf16.vlgmr.msra.gmra.mrb[4].mxu0 %v11235_v44  ;;  %v3005_v44 = vld [vmem:[%s13987_s6 + $0x218] sm:$0xff] }
 0x20a   :  { %v8853_v57 = vpack.c.bf16 %v3005_v44, %v3004_v48  ;;  %4632 = vmatpush1.bf16.msra.mxu0 %v9814_v43  ;;  %v9858_v48 = vld [vmem:[%s13989_s2 + $0xec] ss:$16 sps:$4 sm:$0xff]   ;;  %v9849_v43 = vld [vmem:[%s13989_s2 + $0xc4] ss:$16 sps:$4 sm:$0xff]  }
 0x20b   :  { %4633 = vmatprep.subr.bf16.mxu0 %v9822_v46  ;;  %v9864_v44 = vld [vmem:[%s13989_s2 + $0x10c] ss:$16 sps:$4 sm:$0xff]   ;;  %v9853_v46 = vld [vmem:[%s13989_s2 + $0xe0] ss:$16 sps:$4 sm:$0xff]  }
 0x20c   :  { %8854 = vmatpush1.bf16.msra.mxu1 %v8853_v57  ;;  %v9862_v57 = vld [vmem:[%s13989_s2 + $0x108] ss:$16 sps:$4 sm:$0xff]  }
 0x20d   :  { %8855 = vmatprep.subr.bf16.mxu1 %v10316_v54 }
 0x20e   :  { %4634 = vmatpush1.bf16.msra.mxu0 %v9820_v10  ;;  %v9855_v10 = vld [vmem:[%s13989_s2 + $0xe4] ss:$16 sps:$4 sm:$0xff]  }
 0x20f   :  { %4635 = vmatprep.subr.bf16.mxu0 %v9828_v47  ;;  %v9861_v47 = vld [vmem:[%s13989_s2 + $0x104] ss:$16 sps:$4 sm:$0xff]  }
 0x210   :  { %8857 = vmatpush1.bf16.msra.mxu1 %v8856_v61  ;;  %v9876_v61 = vld [vmem:[%s13989_s2 + $0x14c] ss:$16 sps:$4 sm:$0xff]  }
 0x211   :  { %8858 = vmatprep.subr.bf16.mxu1 %v10316_v54 }
 0x212   :  { %4636 = vmatpush1.bf16.msra.mxu0 %v9826_v2  ;;  %v9859_v2 = vld [vmem:[%s13989_s2 + $0x100] ss:$16 sps:$4 sm:$0xff]  }
 0x213   :  { %4637 = vmatprep.subr.bf16.mxu0 %v9834_v13  ;;  %v9867_v13 = vld [vmem:[%s13989_s2 + $0x124] ss:$16 sps:$4 sm:$0xff]  }
 0x214   :  { %8860 = vmatpush1.bf16.msra.mxu1 %v8859_v0  ;;  %v9880_v0 = vld [vmem:[%s13989_s2 + $0x168] ss:$16 sps:$4 sm:$0xff]  }
 0x215   :  { %8861 = vmatprep.subr.bf16.mxu1 %v10316_v54 }
 0x216   :  { %4638 = vmatpush1.bf16.msra.mxu0 %v9832_v49  ;;  %v9865_v49 = vld [vmem:[%s13989_s2 + $0x120] ss:$16 sps:$4 sm:$0xff]  }
 0x217   :  { %4639 = vmatprep.subr.bf16.mxu0 %v9840_v50  ;;  %v9873_v50 = vld [vmem:[%s13989_s2 + $0x144] ss:$16 sps:$4 sm:$0xff]  }
 0x218   :  { %8863 = vmatpush1.bf16.msra.mxu1 %v8862_v4 }
 0x219   :  { %8864 = vmatprep.subr.bf16.mxu1 %v10316_v54 }
 0x21a   :  { %4640 = vmatpush1.bf16.msra.mxu0 %v9838_v51  ;;  %v9871_v51 = vld [vmem:[%s13989_s2 + $0x140] ss:$16 sps:$4 sm:$0xff]  }
 0x21b   :  { %4641 = vmatprep.subr.bf16.mxu0 %v9846_v52  ;;  %v9879_v52 = vld [vmem:[%s13989_s2 + $0x164] ss:$16 sps:$4 sm:$0xff]  }
 0x21c   :  { %8866 = vmatpush1.bf16.msra.mxu1 %v8865_v7 }
 0x21d   :  { %8867 = vmatprep.subr.bf16.mxu1 %v10316_v54 }
 0x21e   :  { %4642 = vmatpush1.bf16.msra.mxu0 %v9844_v21  ;;  %v9877_v21 = vld [vmem:[%s13989_s2 + $0x160] ss:$16 sps:$4 sm:$0xff]  }
 0x21f   :  { %4643 = vmatprep.subr.bf16.mxu0 %v9852_v24  ;;  %v9885_v24 = vld [vmem:[%s13989_s2 + $0x184] ss:$16 sps:$4 sm:$0xff]  }
 0x220   :  { %8869 = vmatpush1.bf16.msra.mxu1 %v8868_v11 }
 0x221   :  { %8870 = vmatprep.subr.bf16.mxu1 %v10316_v54 }
 0x222   :  { %4644 = vmatpush1.bf16.msra.mxu0 %v9850_v53  ;;  %v9883_v53 = vld [vmem:[%s13989_s2 + $0x180] ss:$16 sps:$4 sm:$0xff]  }
 0x223   :  { %4645 = vmatprep.subr.bf16.mxu0 %v9858_v48  ;;  %v9891_v48 = vld [vmem:[%s13989_s2 + $0x1a4] ss:$16 sps:$4 sm:$0xff]  }
 0x224   :  { %8872 = vmatpush1.bf16.msra.mxu1 %v8871_v17 }
 0x225   :  { %3195 = vmatprep.subr.mxu1 %v10317_v18 }
 0x226   :  { %4646 = vmatpush1.bf16.msra.mxu0 %v9856_v55  ;;  %v9894_v55 = vld [vmem:[%s13989_s2 + $0x1ac] ss:$16 sps:$4 sm:$0xff]  }
 0x227   :  { %4647 = vmatprep.subr.bf16.mxu0 %v9864_v44  ;;  %v9889_v44 = vld [vmem:[%s13989_s2 + $0x1a0] ss:$16 sps:$4 sm:$0xff]  }
 0x228   :  { %3196 = vmatpush1.msra.mxu1 %v3018_v19 }
 0x229   :  { %3259 = vmatprep.subr.mxu1 %v3251_v40  ;;  %v9835_v40 = vld [vmem:[%s13989_s2 + $0x80] ss:$16 sps:$4 sm:$0xff]  }
 0x22a   :  { %4648 = vmatpush1.bf16.msra.mxu0 %v9862_v57  ;;  %v9892_v57 = vld [vmem:[%s13989_s2 + $0x1a8] ss:$16 sps:$4 sm:$0xff]  }
 0x22b   :  { %4649 = vmatprep.subr.bf16.mxu0 %v9870_v58  ;;  %v9897_v58 = vld [vmem:[%s13989_s2 + $0x1c4] ss:$16 sps:$4 sm:$0xff]  }
 0x22e   :  { %4650 = vmatpush1.bf16.msra.mxu0 %v9868_v59  ;;  %v9900_v59 = vld [vmem:[%s13989_s2 + $0x1cc] ss:$16 sps:$4 sm:$0xff]  }
 0x22f   :  { %4651 = vmatprep.subr.bf16.mxu0 %v9876_v61  ;;  %v9895_v61 = vld [vmem:[%s13989_s2 + $0x1c0] ss:$16 sps:$4 sm:$0xff]  }
 0x232   :  { %4652 = vmatpush1.bf16.msra.mxu0 %v9874_v62  ;;  %v9898_v62 = vld [vmem:[%s13989_s2 + $0x1c8] ss:$16 sps:$4 sm:$0xff]  }
 0x233   :  { %4653 = vmatprep.subr.bf16.mxu0 %v9882_v63  ;;  %v9903_v63 = vld [vmem:[%s13989_s2 + $0x1e4] ss:$16 sps:$4 sm:$0xff]  }
 0x236   :  { %4654 = vmatpush1.bf16.msra.mxu0 %v9880_v0  ;;  %v9906_v0 = vld [vmem:[%s13989_s2 + $0x1ec] ss:$16 sps:$4 sm:$0xff]  }
 0x237   :  { %4655 = vmatprep.subr.bf16.mxu0 %v9888_v1  ;;  %v9901_v1 = vld [vmem:[%s13989_s2 + $0x1e0] ss:$16 sps:$4 sm:$0xff]  }
 0x23a   :  { %4656 = vmatpush1.bf16.msra.mxu0 %v9886_v3  ;;  %v9904_v3 = vld [vmem:[%s13989_s2 + $0x1e8] ss:$16 sps:$4 sm:$0xff]  }
 0x23b   :  { %4657 = vmatprep.subr.bf16.mxu0 %v9894_v55  ;;  %v9936_v55 = vld [vmem:[%s13989_s2 + $0x28c] ss:$16 sps:$4 sm:$0xff]  }
 0x23e   :  { %4658 = vmatpush1.bf16.msra.mxu0 %v9892_v57  ;;  %v9934_v57 = vld [vmem:[%s13989_s2 + $0x288] ss:$16 sps:$4 sm:$0xff]  }
 0x23f   :  { %4659 = vmatprep.subr.bf16.mxu0 %v9900_v59  ;;  %v9942_v59 = vld [vmem:[%s13989_s2 + $0x2ac] ss:$16 sps:$4 sm:$0xff]  }
 0x242   :  { %4660 = vmatpush1.bf16.msra.mxu0 %v9898_v62  ;;  %v9940_v62 = vld [vmem:[%s13989_s2 + $0x2a8] ss:$16 sps:$4 sm:$0xff]  }
 0x243   :  { %4661 = vmatprep.subr.bf16.mxu0 %v9906_v0  ;;  %v9948_v0 = vld [vmem:[%s13989_s2 + $0x2cc] ss:$16 sps:$4 sm:$0xff]  }
 0x246   :  { %4662 = vmatpush1.bf16.msra.mxu0 %v9904_v3  ;;  %v9946_v3 = vld [vmem:[%s13989_s2 + $0x2c8] ss:$16 sps:$4 sm:$0xff]  }
 0x2b7   :  { %v8518_v20 = vpop.f32.mrb[4].mxu1 }
 0x2b8   :  { %v8519_v22 = vpop.f32.mrb[5].mxu1 }
 0x2b9   :  { %v8520_v23 = vadd.f32 %v8519_v22, %v8518_v20 }
 0x2d7   :  { %v8553_v33 = vpop.f32.mrb[6].mxu1 }
 0x2d8   :  { %v8554_v37 = vpop.f32.mrb[7].mxu1 }
 0x2d9   :  { %v8555_v25 = vadd.f32 %v8554_v37, %v8553_v33  ;;  %v3255_v37 = vld [vmem:[%s13988_s11 + $0x28] sm:$0xff] }
 0x2db   :  { %v11916_v12 = vadd.f32 %v8555_v25, %v8520_v23  ;;  %v3252_v23 = vld [vmem:[%s13988_s11 + $0x10] sm:$0xff]  ;;  %v3254_v25 = vld [vmem:[%s13988_s11 + $0x20] sm:$0xff] }
 0x2dc   :  { %v11918_v26 = vpop.f32.mrb[4].mxu0 }
 0x2dd   :  { %v2911_v27 = vmul.f32 %v11918_v26, %v11918_v26  ;;  %v11922_v28 = vpop.f32.mrb[5].mxu0 }
 0x2de   :  { %v2912_v29 = vmul.f32 %v11922_v28, %v11922_v28  ;;  %v2904_v32 = vpop.f32.mrb[6].mxu0 }
 0x2df   :  { %v2923_v34 = vrot.slane %v2911_v27, 6  ;;  %v2905_v35 = vpop.f32.mrb[7].mxu0  ;;  %v9811_v27 = vld [vmem:[%s13989_s2] ss:$16 sps:$4 sm:$0xff]  }
 0x2e0   :  { %v2924_v38 = vrot.slane %v2912_v29, 6  ;;  %v9819_v29 = vld [vmem:[%s13989_s2 + $0x24] ss:$16 sps:$4 sm:$0xff]   ;;  %v9817_v32 = vld [vmem:[%s13989_s2 + $0x20] ss:$16 sps:$4 sm:$0xff]  }
 0x2e1   :  { %v2936_v39 = vsel %vm2931_vm0, %v11918_v26, %v2923_v34  ;;  %v9825_v34 = vld [vmem:[%s13989_s2 + $0x44] ss:$16 sps:$4 sm:$0xff]   ;;  %v9823_v35 = vld [vmem:[%s13989_s2 + $0x40] ss:$16 sps:$4 sm:$0xff]  }
 0x2e2   :  { %v2937_v15 = vsel %vm2931_vm0, %v11922_v28, %v2924_v38  ;;  %v9831_v38 = vld [vmem:[%s13989_s2 + $0x64] ss:$16 sps:$4 sm:$0xff]  }
 0x2e3   :  { %8129 = vmatprep.mubr.msk.f32.mxu1 %vm3019_vm1, %v2937_v15  ;;  %v9829_v15 = vld [vmem:[%s13989_s2 + $0x60] ss:$16 sps:$4 sm:$0xff]  }
 0x2e4   :  { %3228 = vmatmul.mubr.f32.vlgmr.msra.gmra.mrb[8].mxu1 %v2936_v39  ;;  %v9837_v39 = vld [vmem:[%s13989_s2 + $0x84] ss:$16 sps:$4 sm:$0xff]  }
 0x2e5   :  { %3323 = vmatprep.mubr.f32.mxu1 %v10317_v18  ;;  %3260 = vmatpush1.msra.mxu1 %v3250_v41  ;;  %v9843_v41 = vld [vmem:[%s13989_s2 + $0xa4] ss:$16 sps:$4 sm:$0xff]  }
 0x2e6   :  { %3330 = vmatprep.subr.mxu1 %v3253_v42  ;;  %v9841_v42 = vld [vmem:[%s13989_s2 + $0xa0] ss:$16 sps:$4 sm:$0xff]  }
 0x3b7   :  { %v3229_v4 = vpop.f32.mrb[8].mxu1 }
 0x3b8   :  { %v3230_v5 = vadd.f32 %v3229_v4, %v11916_v12  ;;  %v3231_v6 = vpop.f32.mrb[9].mxu1  ;;  %v9813_v12 = vld [vmem:[%s13989_s2 + $0x4] ss:$16 sps:$4 sm:$0xff]  }
 0x3b9   :  { %v9909_v4 = vld [vmem:[%s13989_s2 + $0x204] ss:$16 sps:$4 sm:$0xff]  }
 0x3ba   :  { %v3233_v7 = vmul.f32 0.012345679, %v3230_v5  ;;  %v9912_v5 = vld [vmem:[%s13989_s2 + $0x20c] ss:$16 sps:$4 sm:$0xff]  }
 0x3bb   :  { %4672 = vmatprep.subr.bf16.mxu0 %v9912_v5  ;;  %v9954_v5 = vld [vmem:[%s13989_s2 + $0x2ec] ss:$16 sps:$4 sm:$0xff]  }
 0x3bc   :  { %v3234_v8 = vmul.f32 %v3233_v7, %v3233_v7 }
 0x3be   :  { %v3236_v9 = vrot.slane %v3234_v8, 6 }
 0x3c0   :  { %v3238_v11 = vsub.f32 %v3233_v7, %v3236_v9 }
 0x3c2   :  { %v3239_v14 = vmax.f32 %v3238_v11, 0.0 }
 0x3c4   :  { %v3240_v16 = vadd.f32 1e-05, %v3239_v14 }
 0x3c6   :  { %10305 = vrsqrt.f32 %v3240_v16 }
 0x3d0   :  { %v10306_v17 = vpop.eup %10305 }
 0x3d1   :  { %v3243_v19 = vrot.slane %v10306_v17, 2 }
 0x3d3   :  { %v3245_v20 = vmul.f32 %v3243_v19, %v3233_v7 }
 0x3d5   :  { %v3247_v22 = vrot.slane %v3245_v20, 6 }
 0x3d7   :  { %v3249_v33 = vsel %vm2931_vm0, %v3243_v19, %v3247_v22 }
 0x3d8   :  { %8130 = vmatmul.mubr.msk.f32.vlgmr.msra.gmra.mrb[10].mxu1 %vm3019_vm1, %v3249_v33 }
 0x3d9   :  { %3331 = vmatpush1.msra.mxu1 %v3252_v23  ;;  %3394 = vmatprep.mubr.f32.mxu1 %v10317_v18 }
 0x3da   :  { %3401 = vmatprep.subr.mxu1 %v3255_v37 }
 0x3dc   :  { %8131 = vmatmul.mubr.msk.f32.vlgmr.msra.gmra.mrb[12].mxu1 %vm3019_vm1, %v3249_v33 }
 0x3dd   :  { %3402 = vmatpush1.msra.mxu1 %v3254_v25  ;;  %3465 = vmatprep.mubr.f32.mxu1 %v10317_v18 }
 0x3de   :  { %4508 = vmatprep.subr.bf16.mxu1 %v9813_v12 }
 0x3e0   :  { %8132 = vmatmul.mubr.msk.f32.vlgmr.msra.gmra.mrb[14].mxu1 %vm3019_vm1, %v3249_v33 }
 0x3e1   :  { %4509 = vmatpush1.bf16.msra.mxu1 %v9811_v27 }
 0x3e2   :  { %4510 = vmatprep.subr.bf16.mxu1 %v9819_v29 }
 0x3e5   :  { %4511 = vmatpush1.bf16.msra.mxu1 %v9817_v32 }
 0x3e6   :  { %4512 = vmatprep.subr.bf16.mxu1 %v9825_v34 }
 0x3e9   :  { %4513 = vmatpush1.bf16.msra.mxu1 %v9823_v35 }
 0x3ea   :  { %4514 = vmatprep.subr.bf16.mxu1 %v9831_v38 }
 0x3ed   :  { %4515 = vmatpush1.bf16.msra.mxu1 %v9829_v15 }
 0x3ee   :  { %4516 = vmatprep.subr.bf16.mxu1 %v9837_v39 }
 0x3f1   :  { %4517 = vmatpush1.bf16.msra.mxu1 %v9835_v40 }
 0x3f2   :  { %4518 = vmatprep.subr.bf16.mxu1 %v9843_v41  ;;  %v9910_v41 = vld [vmem:[%s13989_s2 + $0x208] ss:$16 sps:$4 sm:$0xff]  }
 0x3f5   :  { %4519 = vmatpush1.bf16.msra.mxu1 %v9841_v42 }
 0x3f6   :  { %4520 = vmatprep.subr.bf16.mxu1 %v9849_v43 }
 0x3f9   :  { %4521 = vmatpush1.bf16.msra.mxu1 %v9847_v45  ;;  %v9918_v45 = vld [vmem:[%s13989_s2 + $0x22c] ss:$16 sps:$4 sm:$0xff]  }
 0x3fa   :  { %4522 = vmatprep.subr.bf16.mxu1 %v9855_v10 }
 0x3fd   :  { %4523 = vmatpush1.bf16.msra.mxu1 %v9853_v46  ;;  %v9913_v46 = vld [vmem:[%s13989_s2 + $0x220] ss:$16 sps:$4 sm:$0xff]  }
 0x3fe   :  { %4524 = vmatprep.subr.bf16.mxu1 %v9861_v47 }
 0x401   :  { %4525 = vmatpush1.bf16.msra.mxu1 %v9859_v2  ;;  %v9916_v2 = vld [vmem:[%s13989_s2 + $0x228] ss:$16 sps:$4 sm:$0xff]  }
 0x402   :  { %4526 = vmatprep.subr.bf16.mxu1 %v9867_v13  ;;  %v9921_v13 = vld [vmem:[%s13989_s2 + $0x244] ss:$16 sps:$4 sm:$0xff]  }
 0x405   :  { %4527 = vmatpush1.bf16.msra.mxu1 %v9865_v49  ;;  %v9924_v49 = vld [vmem:[%s13989_s2 + $0x24c] ss:$16 sps:$4 sm:$0xff]  }
 0x406   :  { %4528 = vmatprep.subr.bf16.mxu1 %v9873_v50  ;;  %v9919_v50 = vld [vmem:[%s13989_s2 + $0x240] ss:$16 sps:$4 sm:$0xff]  }
 0x409   :  { %4529 = vmatpush1.bf16.msra.mxu1 %v9871_v51  ;;  %v9922_v51 = vld [vmem:[%s13989_s2 + $0x248] ss:$16 sps:$4 sm:$0xff]  }
 0x40a   :  { %4530 = vmatprep.subr.bf16.mxu1 %v9879_v52  ;;  %v9927_v52 = vld [vmem:[%s13989_s2 + $0x264] ss:$16 sps:$4 sm:$0xff]  }
 0x40d   :  { %4531 = vmatpush1.bf16.msra.mxu1 %v9877_v21  ;;  %v9930_v21 = vld [vmem:[%s13989_s2 + $0x26c] ss:$16 sps:$4 sm:$0xff]  }
 0x40e   :  { %4532 = vmatprep.subr.bf16.mxu1 %v9885_v24  ;;  %v9925_v24 = vld [vmem:[%s13989_s2 + $0x260] ss:$16 sps:$4 sm:$0xff]  }
 0x411   :  { %4533 = vmatpush1.bf16.msra.mxu1 %v9883_v53  ;;  %v9928_v53 = vld [vmem:[%s13989_s2 + $0x268] ss:$16 sps:$4 sm:$0xff]  }
 0x412   :  { %4534 = vmatprep.subr.bf16.mxu1 %v9891_v48  ;;  %v9933_v48 = vld [vmem:[%s13989_s2 + $0x284] ss:$16 sps:$4 sm:$0xff]  }
 0x415   :  { %4535 = vmatpush1.bf16.msra.mxu1 %v9889_v44  ;;  %v9931_v44 = vld [vmem:[%s13989_s2 + $0x280] ss:$16 sps:$4 sm:$0xff]  }
 0x416   :  { %4536 = vmatprep.subr.bf16.mxu1 %v9897_v58  ;;  %v9939_v58 = vld [vmem:[%s13989_s2 + $0x2a4] ss:$16 sps:$4 sm:$0xff]  }
 0x419   :  { %4537 = vmatpush1.bf16.msra.mxu1 %v9895_v61  ;;  %v9937_v61 = vld [vmem:[%s13989_s2 + $0x2a0] ss:$16 sps:$4 sm:$0xff]  }
 0x41a   :  { %4538 = vmatprep.subr.bf16.mxu1 %v9903_v63  ;;  %v9945_v63 = vld [vmem:[%s13989_s2 + $0x2c4] ss:$16 sps:$4 sm:$0xff]  }
 0x41d   :  { %4539 = vmatpush1.bf16.msra.mxu1 %v9901_v1  ;;  %v9943_v1 = vld [vmem:[%s13989_s2 + $0x2c0] ss:$16 sps:$4 sm:$0xff]  }
 0x41e   :  { %4549 = vmatprep.subr.bf16.mxu1 %v9909_v4  ;;  %v9951_v4 = vld [vmem:[%s13989_s2 + $0x2e4] ss:$16 sps:$4 sm:$0xff]  }
 0x4ab   :  { %v3325_v6 = vpop.f32.mrb[10].mxu1 }
 0x4ac   :  { %v3472_v7 = vmul.f32 %v3325_v6, %v11684_v36  ;;  %v3484_v8 = vrot.slane %v3325_v6, 2  ;;  %v3327_v9 = vpop.f32.mrb[11].mxu1  ;;  %v9949_v6 = vld [vmem:[%s13989_s2 + $0x2e0] ss:$16 sps:$4 sm:$0xff]  }
 0x4ad   :  { %v3473_v11 = vmul.f32 %v3327_v9, %v11688_v30  ;;  %v3485_v14 = vrot.slane %v3327_v9, 2  ;;  %v9960_v9 = vld [vmem:[%s13989_s2 + $0x30c] ss:$16 sps:$4 sm:$0xff]  }
 0x4ae   :  { %v3496_v16 = vsub.f32 %v3472_v7, %v3484_v8  ;;  %v9952_v7 = vld [vmem:[%s13989_s2 + $0x2e8] ss:$16 sps:$4 sm:$0xff]   ;;  %v9957_v8 = vld [vmem:[%s13989_s2 + $0x304] ss:$16 sps:$4 sm:$0xff]  }
 0x4af   :  { %v3497_v17 = vsub.f32 %v3473_v11, %v3485_v14  ;;  %v3396_v19 = vpop.f32.mrb[12].mxu1  ;;  %v9955_v11 = vld [vmem:[%s13989_s2 + $0x300] ss:$16 sps:$4 sm:$0xff]   ;;  %v9958_v14 = vld [vmem:[%s13989_s2 + $0x308] ss:$16 sps:$4 sm:$0xff]  }
 0x4b0   :  { %v3502_v20 = vmul.f32 0.2, %v3496_v16  ;;  %v3474_v22 = vmul.f32 %v3396_v19, %v11741_v56  ;;  %v3486_v23 = vrot.slane %v3396_v19, 2  ;;  %v3398_v33 = vpop.f32.mrb[13].mxu1  ;;  %v9907_v56 = vld [vmem:[%s13989_s2 + $0x200] ss:$16 sps:$4 sm:$0xff]  }
 0x4b1   :  { %v3503_v37 = vmul.f32 0.2, %v3497_v17  ;;  %v3475_v25 = vmul.f32 %v3398_v33, %v11752_v60  ;;  %v3487_v12 = vrot.slane %v3398_v33, 2  ;;  %v9961_v19 = vld [vmem:[%s13989_s2 + $0x320] ss:$16 sps:$4 sm:$0xff]  }
 0x4b2   :  { %v3508_v27 = vmax.f32 %v3496_v16, %v3502_v20  ;;  %v12159_v29 = vsub.f32 %v3474_v22, %v3486_v23  ;;  %v9963_v16 = vld [vmem:[%s13989_s2 + $0x324] ss:$16 sps:$4 sm:$0xff]   ;;  %v9964_v20 = vld [vmem:[%s13989_s2 + $0x328] ss:$16 sps:$4 sm:$0xff]   ;;  %v9972_v23 = vld [vmem:[%s13989_s2 + $0x34c] ss:$16 sps:$4 sm:$0xff]  }
 0x4b3   :  { %v3499_v36 = vsub.f32 %v3475_v25, %v3487_v12  ;;  %v3467_v32 = vpop.f32.mrb[14].mxu1  ;;  %v3509_v34 = vmax.f32 %v3497_v17, %v3503_v37  ;;  %v9966_v17 = vld [vmem:[%s13989_s2 + $0x32c] ss:$16 sps:$4 sm:$0xff]   ;;  %v9969_v22 = vld [vmem:[%s13989_s2 + $0x344] ss:$16 sps:$4 sm:$0xff]  }
 0x4b4   :  { %v3476_v30 = vmul.f32 %v3467_v32, %v11918_v26  ;;  %v3488_v35 = vrot.slane %v3467_v32, 2  ;;  %v3469_v38 = vpop.f32.mrb[15].mxu1  ;;  %v3514_v42 = vpack.c.bf16 %v3508_v27, %v3508_v27  ;;  %v9915_v26 = vld [vmem:[%s13989_s2 + $0x224] ss:$16 sps:$4 sm:$0xff]   ;;  %v9967_v33 = vld [vmem:[%s13989_s2 + $0x340] ss:$16 sps:$4 sm:$0xff]  }
 0x4b5   :  { %v3505_v15 = vmul.f32 0.2, %v3499_v36  ;;  %v3477_v39 = vmul.f32 %v3469_v38, %v11922_v28  ;;  %v3489_v40 = vrot.slane %v3469_v38, 2  ;;  %v3515_v60 = vpack.c.bf16 %v3509_v34, %v3509_v34  ;;  %v9970_v37 = vld [vmem:[%s13989_s2 + $0x348] ss:$16 sps:$4 sm:$0xff]  }
 0x4b6   :  { %v12169_v43 = vsub.f32 %v3476_v30, %v3488_v35  ;;  %v9975_v25 = vld [vmem:[%s13989_s2 + $0x364] ss:$16 sps:$4 sm:$0xff]   ;;  %v9978_v12 = vld [vmem:[%s13989_s2 + $0x36c] ss:$16 sps:$4 sm:$0xff]   ;;  %v9973_v27 = vld [vmem:[%s13989_s2 + $0x360] ss:$16 sps:$4 sm:$0xff]  }
 0x4b7   :  { %v12177_v10 = vsub.f32 %v3477_v39, %v3489_v40  ;;  %4540 = vmatprep.mubr.bf16.mxu1 %v3515_v60  ;;  %4663 = vmatprep.mubr.bf16.mxu0 %v3515_v60  ;;  %v3511_v28 = vmax.f32 %v3499_v36, %v3505_v15  ;;  %v9976_v36 = vld [vmem:[%s13989_s2 + $0x368] ss:$16 sps:$4 sm:$0xff]   ;;  %v9981_v32 = vld [vmem:[%s13989_s2 + $0x384] ss:$16 sps:$4 sm:$0xff]   ;;  %v9984_v34 = vld [vmem:[%s13989_s2 + $0x38c] ss:$16 sps:$4 sm:$0xff]  }
 0x4b8   :  { %4541 = vmatmul.mubr.bf16.vlgmr.msra.gmra.mrb[16].mxu1 %v3514_v42  ;;  %4664 = vmatmul.mubr.bf16.vlgmr.msra.gmra.mrb[8].mxu0 %v3514_v42  ;;  %v9979_v30 = vld [vmem:[%s13989_s2 + $0x380] ss:$16 sps:$4 sm:$0xff]   ;;  %v9982_v35 = vld [vmem:[%s13989_s2 + $0x388] ss:$16 sps:$4 sm:$0xff]   ;;  %v9987_v38 = vld [vmem:[%s13989_s2 + $0x3a4] ss:$16 sps:$4 sm:$0xff]  }
 0x4b9   :  { %4550 = vmatpush1.bf16.msra.mxu1 %v9907_v56  ;;  %4673 = vmatpush1.bf16.msra.mxu0 %v9910_v41  ;;  %v3517_v47 = vpack.c.bf16 %v3511_v28, %v3511_v28  ;;  %v9990_v56 = vld [vmem:[%s13989_s2 + $0x3ac] ss:$16 sps:$4 sm:$0xff]   ;;  %v9985_v15 = vld [vmem:[%s13989_s2 + $0x3a0] ss:$16 sps:$4 sm:$0xff]   ;;  %v9988_v39 = vld [vmem:[%s13989_s2 + $0x3a8] ss:$16 sps:$4 sm:$0xff]  }
 0x4ba   :  { %4551 = vmatprep.subr.bf16.mxu1 %v9915_v26  ;;  %4674 = vmatprep.subr.bf16.mxu0 %v9918_v45  ;;  %v9993_v40 = vld [vmem:[%s13989_s2 + $0x3c4] ss:$16 sps:$4 sm:$0xff]   ;;  %v9996_v60 = vld [vmem:[%s13989_s2 + $0x3cc] ss:$16 sps:$4 sm:$0xff]   ;;  %v9991_v41 = vld [vmem:[%s13989_s2 + $0x3c0] ss:$16 sps:$4 sm:$0xff]  }
 0x4bb   :  { %4581 = vmatprep.mubr.bf16.mxu1 %v3517_v47  ;;  %4704 = vmatprep.mubr.bf16.mxu0 %v3517_v47  ;;  %v9994_v42 = vld [vmem:[%s13989_s2 + $0x3c8] ss:$16 sps:$4 sm:$0xff]   ;;  %v3504_v26 = vmul.f32 0.2, %v12159_v29  ;;  %v9999_v45 = vld [vmem:[%s13989_s2 + $0x3e4] ss:$16 sps:$4 sm:$0xff]  }
 0x4bc   :  { %v10002_v28 = vld [vmem:[%s13989_s2 + $0x3ec] ss:$16 sps:$4 sm:$0xff]   ;;  %v9997_v47 = vld [vmem:[%s13989_s2 + $0x3e0] ss:$16 sps:$4 sm:$0xff]  }
 0x4bd   :  { %4552 = vmatpush1.bf16.msra.mxu1 %v9913_v46  ;;  %4675 = vmatpush1.bf16.msra.mxu0 %v9916_v2  ;;  %v3507_v46 = vmul.f32 0.2, %v12177_v10  ;;  %v10000_v2 = vld [vmem:[%s13989_s2 + $0x3e8] ss:$16 sps:$4 sm:$0xff]  }
 0x4be   :  { %4553 = vmatprep.subr.bf16.mxu1 %v9921_v13  ;;  %4676 = vmatprep.subr.bf16.mxu0 %v9924_v49  ;;  %v3510_v13 = vmax.f32 %v12159_v29, %v3504_v26  ;;  %v10005_v49 = vld [vmem:[%s13989_s2 + $0x404] ss:$16 sps:$4 sm:$0xff]   ;;  %v10006_v29 = vld [vmem:[%s13989_s2 + $0x408] ss:$16 sps:$4 sm:$0xff]  }
 0x4c1   :  { %4554 = vmatpush1.bf16.msra.mxu1 %v9919_v50  ;;  %4677 = vmatpush1.bf16.msra.mxu0 %v9922_v51  ;;  %v10008_v50 = vld [vmem:[%s13989_s2 + $0x40c] ss:$16 sps:$4 sm:$0xff]   ;;  %v3513_v51 = vmax.f32 %v12177_v10, %v3507_v46  ;;  %v4794_v46 = vld [vmem:[%s13990_s7 + $0xa0] sm:$0xff] }
 0x4c2   :  { %4555 = vmatprep.subr.bf16.mxu1 %v9927_v52  ;;  %4678 = vmatprep.subr.bf16.mxu0 %v9930_v21  ;;  %v10003_v52 = vld [vmem:[%s13989_s2 + $0x400] ss:$16 sps:$4 sm:$0xff]   ;;  %v3516_v21 = vpack.c.bf16 %v3510_v13, %v3510_v13  ;;  %v10014_v10 = vld [vmem:[%s13989_s2 + $0x42c] ss:$16 sps:$4 sm:$0xff]  }
 0x4c5   :  { %4556 = vmatpush1.bf16.msra.mxu1 %v9925_v24  ;;  %4679 = vmatpush1.bf16.msra.mxu0 %v9928_v53  ;;  %v3519_v24 = vpack.c.bf16 %v3513_v51, %v3513_v51  ;;  %v10011_v53 = vld [vmem:[%s13989_s2 + $0x424] ss:$16 sps:$4 sm:$0xff]  }
 0x4c6   :  { %4557 = vmatprep.subr.bf16.mxu1 %v9933_v48  ;;  %4680 = vmatprep.subr.bf16.mxu0 %v9936_v55  ;;  %v10009_v48 = vld [vmem:[%s13989_s2 + $0x420] ss:$16 sps:$4 sm:$0xff]   ;;  %v10012_v55 = vld [vmem:[%s13989_s2 + $0x428] ss:$16 sps:$4 sm:$0xff]  }
 0x4c7   :  { %v4796_v51 = vld [vmem:[%s13990_s7 + $0xb0] sm:$0xff] }
 0x4c9   :  { %4558 = vmatpush1.bf16.msra.mxu1 %v9931_v44  ;;  %4681 = vmatpush1.bf16.msra.mxu0 %v9934_v57  ;;  %v10017_v44 = vld [vmem:[%s13989_s2 + $0x444] ss:$16 sps:$4 sm:$0xff]   ;;  %v10020_v57 = vld [vmem:[%s13989_s2 + $0x44c] ss:$16 sps:$4 sm:$0xff]  }
 0x4ca   :  { %4559 = vmatprep.subr.bf16.mxu1 %v9939_v58  ;;  %4682 = vmatprep.subr.bf16.mxu0 %v9942_v59  ;;  %v10015_v58 = vld [vmem:[%s13989_s2 + $0x440] ss:$16 sps:$4 sm:$0xff]   ;;  %v10018_v59 = vld [vmem:[%s13989_s2 + $0x448] ss:$16 sps:$4 sm:$0xff]  }
 0x4cd   :  { %4560 = vmatpush1.bf16.msra.mxu1 %v9937_v61  ;;  %4683 = vmatpush1.bf16.msra.mxu0 %v9940_v62  ;;  %v10023_v61 = vld [vmem:[%s13989_s2 + $0x464] ss:$16 sps:$4 sm:$0xff]   ;;  %v10026_v62 = vld [vmem:[%s13989_s2 + $0x46c] ss:$16 sps:$4 sm:$0xff]  }
 0x4ce   :  { %4561 = vmatprep.subr.bf16.mxu1 %v9945_v63  ;;  %4684 = vmatprep.subr.bf16.mxu0 %v9948_v0  ;;  %v10021_v63 = vld [vmem:[%s13989_s2 + $0x460] ss:$16 sps:$4 sm:$0xff]   ;;  %v10024_v0 = vld [vmem:[%s13989_s2 + $0x468] ss:$16 sps:$4 sm:$0xff]  }
 0x4d1   :  { %4562 = vmatpush1.bf16.msra.mxu1 %v9943_v1  ;;  %4685 = vmatpush1.bf16.msra.mxu0 %v9946_v3  ;;  %v10029_v1 = vld [vmem:[%s13989_s2 + $0x484] ss:$16 sps:$4 sm:$0xff]   ;;  %v10032_v3 = vld [vmem:[%s13989_s2 + $0x48c] ss:$16 sps:$4 sm:$0xff]  }
 0x4d2   :  { %4563 = vmatprep.subr.bf16.mxu1 %v9951_v4  ;;  %4686 = vmatprep.subr.bf16.mxu0 %v9954_v5  ;;  %v10027_v4 = vld [vmem:[%s13989_s2 + $0x480] ss:$16 sps:$4 sm:$0xff]   ;;  %v10030_v5 = vld [vmem:[%s13989_s2 + $0x488] ss:$16 sps:$4 sm:$0xff]  }
 0x4d5   :  { %4564 = vmatpush1.bf16.msra.mxu1 %v9949_v6  ;;  %4687 = vmatpush1.bf16.msra.mxu0 %v9952_v7  ;;  %v10035_v6 = vld [vmem:[%s13989_s2 + $0x4a4] ss:$16 sps:$4 sm:$0xff]   ;;  %v10038_v7 = vld [vmem:[%s13989_s2 + $0x4ac] ss:$16 sps:$4 sm:$0xff]  }
 0x4d6   :  { %4565 = vmatprep.subr.bf16.mxu1 %v9957_v8  ;;  %4688 = vmatprep.subr.bf16.mxu0 %v9960_v9  ;;  %v10033_v8 = vld [vmem:[%s13989_s2 + $0x4a0] ss:$16 sps:$4 sm:$0xff]   ;;  %v10036_v9 = vld [vmem:[%s13989_s2 + $0x4a8] ss:$16 sps:$4 sm:$0xff]  }
 0x4d9   :  { %4566 = vmatpush1.bf16.msra.mxu1 %v9955_v11  ;;  %4689 = vmatpush1.bf16.msra.mxu0 %v9958_v14  ;;  %v10041_v11 = vld [vmem:[%s13989_s2 + $0x4c4] ss:$16 sps:$4 sm:$0xff]   ;;  %v10044_v14 = vld [vmem:[%s13989_s2 + $0x4cc] ss:$16 sps:$4 sm:$0xff]  }
 0x4da   :  { %4567 = vmatprep.subr.bf16.mxu1 %v9963_v16  ;;  %4690 = vmatprep.subr.bf16.mxu0 %v9966_v17  ;;  %v10039_v16 = vld [vmem:[%s13989_s2 + $0x4c0] ss:$16 sps:$4 sm:$0xff]   ;;  %v10042_v17 = vld [vmem:[%s13989_s2 + $0x4c8] ss:$16 sps:$4 sm:$0xff]  }
 0x4dd   :  { %4568 = vmatpush1.bf16.msra.mxu1 %v9961_v19  ;;  %4691 = vmatpush1.bf16.msra.mxu0 %v9964_v20  ;;  %v10047_v19 = vld [vmem:[%s13989_s2 + $0x4e4] ss:$16 sps:$4 sm:$0xff]   ;;  %v10050_v20 = vld [vmem:[%s13989_s2 + $0x4ec] ss:$16 sps:$4 sm:$0xff]  }
 0x4de   :  { %4569 = vmatprep.subr.bf16.mxu1 %v9969_v22  ;;  %4692 = vmatprep.subr.bf16.mxu0 %v9972_v23  ;;  %v3680_v22 = vld [vmem:[%s13989_s2 + $0x500] sm:$0xff]  ;;  %v3681_v23 = vld [vmem:[%s13989_s2 + $0x508] sm:$0xff] }
 0x4e1   :  { %4570 = vmatpush1.bf16.msra.mxu1 %v9967_v33  ;;  %4693 = vmatpush1.bf16.msra.mxu0 %v9970_v37  ;;  %v10045_v33 = vld [vmem:[%s13989_s2 + $0x4e0] ss:$16 sps:$4 sm:$0xff]   ;;  %v3506_v37 = vmul.f32 0.2, %v12169_v43 }
 0x4e2   :  { %4571 = vmatprep.subr.bf16.mxu1 %v9975_v25  ;;  %4694 = vmatprep.subr.bf16.mxu0 %v9978_v12  ;;  %v10048_v25 = vld [vmem:[%s13989_s2 + $0x4e8] ss:$16 sps:$4 sm:$0xff]   ;;  %v8294_v12 = vcombine.high %v3680_v22, %v3680_v22 }
 0x4e5   :  { %4572 = vmatpush1.bf16.msra.mxu1 %v9973_v27  ;;  %4695 = vmatpush1.bf16.msra.mxu0 %v9976_v36  ;;  %v8293_v27 = vcombine.low %v3680_v22, %v3680_v22  ;;  %v8296_v36 = vcombine.high %v3681_v23, %v3681_v23 }
 0x4e6   :  { %4573 = vmatprep.subr.bf16.mxu1 %v9981_v32  ;;  %4696 = vmatprep.subr.bf16.mxu0 %v9984_v34  ;;  %v8295_v32 = vcombine.low %v3681_v23, %v3681_v23  ;;  %v4790_v34 = vld [vmem:[%s13990_s7 + $0x80] sm:$0xff] }
 0x4e9   :  { %4574 = vmatpush1.bf16.msra.mxu1 %v9979_v30  ;;  %4697 = vmatpush1.bf16.msra.mxu0 %v9982_v35  ;;  %v4791_v30 = vld [vmem:[%s13990_s7 + $0x88] sm:$0xff]  ;;  %v3512_v35 = vmax.f32 %v12169_v43, %v3506_v37  ;;  %v4793_v43 = vld [vmem:[%s13990_s7 + $0x98] sm:$0xff] }
 0x4ea   :  { %4575 = vmatprep.subr.bf16.mxu1 %v9987_v38  ;;  %4698 = vmatprep.subr.bf16.mxu0 %v9990_v56  ;;  %v4497_v38 = vsel %vm4495_vm2, %v8293_v27, 0  ;;  %v8873_v56 = vpack.c.bf16 %v4791_v30, %v4790_v34 }
 0x4ed   :  { %4576 = vmatpush1.bf16.msra.mxu1 %v9985_v15  ;;  %4699 = vmatpush1.bf16.msra.mxu0 %v9988_v39  ;;  %v4774_v15 = vld [vmem:[%s13990_s7] sm:$0xff]  ;;  %v4775_v39 = vld [vmem:[%s13990_s7 + $0x8] sm:$0xff] }
 0x4ee   :  { %4577 = vmatprep.subr.bf16.mxu1 %v9993_v40  ;;  %4700 = vmatprep.subr.bf16.mxu0 %v9996_v60  ;;  %v4503_v40 = vsel %vm4495_vm2, %v8295_v32, 0  ;;  %v4792_v60 = vld [vmem:[%s13990_s7 + $0x90] sm:$0xff]  ;;  %v4807_v32 = vld [vmem:[%s13990_s7 + $0x108] sm:$0xff] }
 0x4ef   :  { %v8877_v26 = vpack.c.bf16 %v4793_v43, %v4792_v60  ;;  %v4808_v43 = vld [vmem:[%s13990_s7 + $0x110] sm:$0xff] }
 0x4f1   :  { %4578 = vmatpush1.bf16.msra.mxu1 %v9991_v41  ;;  %4701 = vmatpush1.bf16.msra.mxu0 %v9994_v42  ;;  %v8875_v41 = vpack.c.bf16 %v4775_v39, %v4774_v15  ;;  %v3518_v42 = vpack.c.bf16 %v3512_v35, %v3512_v35 }
 0x4f2   :  { %4579 = vmatprep.subr.bf16.mxu1 %v9999_v45  ;;  %4702 = vmatprep.subr.bf16.mxu0 %v10002_v28  ;;  %v4776_v45 = vld [vmem:[%s13990_s7 + $0x10] sm:$0xff]  ;;  %v4777_v28 = vld [vmem:[%s13990_s7 + $0x18] sm:$0xff] }
 0x4f5   :  { %4580 = vmatpush1.bf16.msra.mxu1 %v9997_v47  ;;  %4703 = vmatpush1.bf16.msra.mxu0 %v10000_v2  ;;  %v4795_v47 = vld [vmem:[%s13990_s7 + $0xa8] sm:$0xff]  ;;  %v8879_v2 = vpack.c.bf16 %v4777_v28, %v4776_v45  ;;  %v4810_v28 = vld [vmem:[%s13990_s7 + $0x120] sm:$0xff] }
 0x4f6   :  { %4590 = vmatprep.subr.bf16.mxu1 %v10005_v49  ;;  %4713 = vmatprep.subr.bf16.mxu0 %v10008_v50  ;;  %v8881_v13 = vpack.c.bf16 %v4795_v47, %v4794_v46  ;;  %v4778_v49 = vld [vmem:[%s13990_s7 + $0x20] sm:$0xff]  ;;  %v4779_v50 = vld [vmem:[%s13990_s7 + $0x28] sm:$0xff] }
 0x4f7   :  { %v4811_v46 = vld [vmem:[%s13990_s7 + $0x128] sm:$0xff] }
 0x4f8   :  { %4582 = vmatmul.mubr.bf16.vlgmr.msra.gmra.mrb[16].mxu1 %v3516_v21  ;;  %4705 = vmatmul.mubr.bf16.vlgmr.msra.gmra.mrb[8].mxu0 %v3516_v21  ;;  %v8883_v21 = vpack.c.bf16 %v4779_v50, %v4778_v49  ;;  %v8912_v47 = vpack.c.bf16 %v4811_v46, %v4810_v28  ;;  %v4814_v50 = vld [vmem:[%s13990_s7 + $0x140] sm:$0xff]  ;;  %v4987_v28 = vld [vmem:[%s13991_s12 + $0x10] sm:$0xff] }
 0x4f9   :  { %4591 = vmatpush1.bf16.msra.mxu1 %v10003_v52  ;;  %8298 = vmatprep.mubr.msk.bf16.mxu1 %vm3019_vm1, %v3519_v24  ;;  %v4797_v52 = vld [vmem:[%s13990_s7 + $0xb8] sm:$0xff]  ;;  %v4991_v46 = vld [vmem:[%s13991_s12 + $0x30] sm:$0xff] }
 0x4fa   :  { %4714 = vmatpush1.bf16.msra.mxu0 %v10006_v29  ;;  %8300 = vmatprep.mubr.msk.bf16.mxu0 %vm3019_vm1, %v3519_v24  ;;  %v8885_v29 = vpack.c.bf16 %v4797_v52, %v4796_v51  ;;  %v4780_v24 = vld [vmem:[%s13990_s7 + $0x30] sm:$0xff]  ;;  %v4815_v51 = vld [vmem:[%s13990_s7 + $0x148] sm:$0xff] }
 0x4fb   :  { %4592 = vmatprep.subr.bf16.mxu1 %v10011_v53  ;;  %4715 = vmatprep.subr.bf16.mxu0 %v10014_v10  ;;  %v4781_v53 = vld [vmem:[%s13990_s7 + $0x38] sm:$0xff]  ;;  %v4798_v10 = vld [vmem:[%s13990_s7 + $0xc0] sm:$0xff]  ;;  %v8918_v52 = vpack.c.bf16 %v4815_v51, %v4814_v50 }
 0x4fc   :  { %v10055_v51 = vld [vmem:[%s13992_s3] ss:$12 sps:$4 sm:$0xff]  }
 0x4fd   :  { %4593 = vmatpush1.bf16.msra.mxu1 %v10009_v48  ;;  %v4799_v48 = vld [vmem:[%s13990_s7 + $0xc8] sm:$0xff] }
 0x4fe   :  { %4716 = vmatpush1.bf16.msra.mxu0 %v10012_v55  ;;  %4594 = vmatprep.subr.bf16.mxu1 %v10017_v44  ;;  %v8887_v55 = vpack.c.bf16 %v4781_v53, %v4780_v24  ;;  %v8889_v44 = vpack.c.bf16 %v4799_v48, %v4798_v10  ;;  %v4818_v53 = vld [vmem:[%s13990_s7 + $0x160] sm:$0xff]  ;;  %v4819_v10 = vld [vmem:[%s13990_s7 + $0x168] sm:$0xff] }
 0x4ff   :  { %4717 = vmatprep.subr.bf16.mxu0 %v10020_v57  ;;  %v4782_v57 = vld [vmem:[%s13990_s7 + $0x40] sm:$0xff]  ;;  %v8924_v48 = vpack.c.bf16 %v4819_v10, %v4818_v53  ;;  %v10066_v53 = vld [vmem:[%s13992_s3 + $0x4c] ss:$12 sps:$4 sm:$0xff]   ;;  %v10064_v10 = vld [vmem:[%s13992_s3 + $0x48] ss:$12 sps:$4 sm:$0xff]  }
 0x501   :  { %4595 = vmatpush1.bf16.msra.mxu1 %v10015_v58  ;;  %v4783_v58 = vld [vmem:[%s13990_s7 + $0x48] sm:$0xff] }
 0x502   :  { %4718 = vmatpush1.bf16.msra.mxu0 %v10018_v59  ;;  %4596 = vmatprep.subr.bf16.mxu1 %v10023_v61  ;;  %v4800_v59 = vld [vmem:[%s13990_s7 + $0xd0] sm:$0xff]  ;;  %v4801_v61 = vld [vmem:[%s13990_s7 + $0xd8] sm:$0xff] }
 0x503   :  { %4719 = vmatprep.subr.bf16.mxu0 %v10026_v62  ;;  %v8891_v62 = vpack.c.bf16 %v4783_v58, %v4782_v57  ;;  %v4822_v58 = vld [vmem:[%s13990_s7 + $0x180] sm:$0xff] }
 0x505   :  { %4597 = vmatpush1.bf16.msra.mxu1 %v10021_v63  ;;  %v8893_v63 = vpack.c.bf16 %v4801_v61, %v4800_v59  ;;  %v4823_v59 = vld [vmem:[%s13990_s7 + $0x188] sm:$0xff] }
 0x506   :  { %4720 = vmatpush1.bf16.msra.mxu0 %v10024_v0  ;;  %4598 = vmatprep.subr.bf16.mxu1 %v10029_v1  ;;  %v4784_v0 = vld [vmem:[%s13990_s7 + $0x50] sm:$0xff]  ;;  %v4785_v1 = vld [vmem:[%s13990_s7 + $0x58] sm:$0xff] }
 0x507   :  { %4721 = vmatprep.subr.bf16.mxu0 %v10032_v3  ;;  %v4802_v3 = vld [vmem:[%s13990_s7 + $0xe0] sm:$0xff] }
 0x509   :  { %4599 = vmatpush1.bf16.msra.mxu1 %v10027_v4  ;;  %v4803_v4 = vld [vmem:[%s13990_s7 + $0xe8] sm:$0xff] }
 0x50a   :  { %4722 = vmatpush1.bf16.msra.mxu0 %v10030_v5  ;;  %4600 = vmatprep.subr.bf16.mxu1 %v10035_v6  ;;  %v8895_v5 = vpack.c.bf16 %v4785_v1, %v4784_v0  ;;  %v8897_v6 = vpack.c.bf16 %v4803_v4, %v4802_v3  ;;  %v4986_v1 = vld [vmem:[%s13991_s12 + $0x8] sm:$0xff] }
 0x50b   :  { %4723 = vmatprep.subr.bf16.mxu0 %v10038_v7  ;;  %v4786_v7 = vld [vmem:[%s13990_s7 + $0x60] sm:$0xff]  ;;  %v4990_v3 = vld [vmem:[%s13991_s12 + $0x28] sm:$0xff] }
 0x50c   :  { %v8932_v4 = vpack.c.bf16 %v4990_v3, %v4986_v1  ;;  %v10086_v1 = vld [vmem:[%s13992_s3 + $0xdc] ss:$12 sps:$4 sm:$0xff]   ;;  %v10084_v3 = vld [vmem:[%s13992_s3 + $0xd8] ss:$12 sps:$4 sm:$0xff]  }
 0x50d   :  { %4601 = vmatpush1.bf16.msra.mxu1 %v10033_v8  ;;  %v4787_v8 = vld [vmem:[%s13990_s7 + $0x68] sm:$0xff] }
 0x50e   :  { %4724 = vmatpush1.bf16.msra.mxu0 %v10036_v9  ;;  %4602 = vmatprep.subr.bf16.mxu1 %v10041_v11  ;;  %v8899_v9 = vpack.c.bf16 %v4787_v8, %v4786_v7  ;;  %v4804_v11 = vld [vmem:[%s13990_s7 + $0xf0] sm:$0xff]  ;;  %v4988_v8 = vld [vmem:[%s13991_s12 + $0x18] sm:$0xff] }
 0x50f   :  { %4725 = vmatprep.subr.bf16.mxu0 %v10044_v14  ;;  %v4805_v14 = vld [vmem:[%s13990_s7 + $0xf8] sm:$0xff] }
 0x511   :  { %4603 = vmatpush1.bf16.msra.mxu1 %v10039_v16  ;;  %v8901_v16 = vpack.c.bf16 %v4805_v14, %v4804_v11  ;;  %v10082_v14 = vld [vmem:[%s13992_s3 + $0xc8] ss:$12 sps:$4 sm:$0xff]  }
 0x512   :  { %4726 = vmatpush1.bf16.msra.mxu0 %v10042_v17  ;;  %4604 = vmatprep.subr.bf16.mxu1 %v10047_v19  ;;  %v4788_v17 = vld [vmem:[%s13990_s7 + $0x70] sm:$0xff]  ;;  %v4789_v19 = vld [vmem:[%s13990_s7 + $0x78] sm:$0xff] }
 0x513   :  { %4727 = vmatprep.subr.bf16.mxu0 %v10050_v20  ;;  %v8903_v20 = vpack.c.bf16 %v4789_v19, %v4788_v17  ;;  %v10087_v17 = vld [vmem:[%s13992_s3 + $0xe0] ss:$12 sps:$4 sm:$0xff]  }
 0x514   :  { %v10088_v19 = vld [vmem:[%s13992_s3 + $0x20] ss:$12 sps:$4 sm:$0xff]  }
 0x515   :  { %4605 = vmatpush1.bf16.msra.mxu1 %v10045_v33 }
 0x516   :  { %4728 = vmatpush1.bf16.msra.mxu0 %v10048_v25  ;;  %8297 = vmatprep.subr.msk.bf16.mxu1 %vm4495_vm2, %v8294_v12 }
 0x517   :  { %8299 = vmatprep.subr.msk.bf16.mxu0 %vm4495_vm2, %v8296_v36  ;;  %v4806_v36 = vld [vmem:[%s13990_s7 + $0x100] sm:$0xff] }
 0x519   :  { %4607 = vmatpush1.bf16.msra.mxu1 %v4497_v38 }
 0x51a   :  { %4730 = vmatpush1.bf16.msra.mxu0 %v4503_v40  ;;  %8874 = vmatprep.subr.bf16.mxu1 %v8873_v56  ;;  %v8906_v40 = vpack.c.bf16 %v4807_v32, %v4806_v36  ;;  %v10102_v36 = vld [vmem:[%s13992_s3 + $0x128] ss:$12 sps:$4 sm:$0xff]  }
 0x51b   :  { %8591 = vmatprep.subr.bf16.mxu0 %v10082_v14  ;;  %v10103_v32 = vld [vmem:[%s13992_s3 + $0x68] ss:$12 sps:$4 sm:$0xff]   ;;  %v10104_v14 = vld [vmem:[%s13992_s3 + $0x138] ss:$12 sps:$4 sm:$0xff]  }
 0x51c   :  { %4623 = vmatmul.mubr.bf16.vlgmr.msra.gmra.mrb[16].mxu1 %v3518_v42 }
 0x51d   :  { %4746 = vmatmul.mubr.bf16.vlgmr.msra.gmra.mrb[8].mxu0 %v3518_v42  ;;  %8876 = vmatpush3.bf16.msra.mxu1 %v8875_v41  ;;  %v4809_v41 = vld [vmem:[%s13990_s7 + $0x118] sm:$0xff] }
 0x51e   :  { %8878 = vmatprep.subr.bf16.mxu1 %v8877_v26  ;;  %v8909_v45 = vpack.c.bf16 %v4809_v41, %v4808_v43 }
 0x521   :  { %8880 = vmatpush3.bf16.msra.mxu1 %v8879_v2  ;;  %v4812_v2 = vld [vmem:[%s13990_s7 + $0x130] sm:$0xff] }
 0x522   :  { %8882 = vmatprep.subr.bf16.mxu1 %v8881_v13  ;;  %v4813_v13 = vld [vmem:[%s13990_s7 + $0x138] sm:$0xff] }
 0x523   :  { %v8915_v49 = vpack.c.bf16 %v4813_v13, %v4812_v2  ;;  %v8938_v13 = vpack.c.bf16 %v4991_v46, %v4987_v28 }
 0x525   :  { %8884 = vmatpush3.bf16.msra.mxu1 %v8883_v21  ;;  %v4816_v21 = vld [vmem:[%s13990_s7 + $0x150] sm:$0xff] }
 0x526   :  { %8886 = vmatprep.subr.bf16.mxu1 %v8885_v29  ;;  %v4817_v29 = vld [vmem:[%s13990_s7 + $0x158] sm:$0xff] }
 0x527   :  { %v8921_v24 = vpack.c.bf16 %v4817_v29, %v4816_v21  ;;  %v10058_v21 = vld [vmem:[%s13992_s3 + $0x18] ss:$12 sps:$4 sm:$0xff]   ;;  %v10063_v29 = vld [vmem:[%s13992_s3 + $0x34] ss:$12 sps:$4 sm:$0xff]  }
 0x529   :  { %8888 = vmatpush3.bf16.msra.mxu1 %v8887_v55  ;;  %v4820_v55 = vld [vmem:[%s13990_s7 + $0x170] sm:$0xff] }
 0x52a   :  { %8890 = vmatprep.subr.bf16.mxu1 %v8889_v44  ;;  %v4821_v44 = vld [vmem:[%s13990_s7 + $0x178] sm:$0xff] }
 0x52b   :  { %v8927_v57 = vpack.c.bf16 %v4821_v44, %v4820_v55  ;;  %v10067_v55 = vld [vmem:[%s13992_s3 + $0x60] ss:$12 sps:$4 sm:$0xff]   ;;  %v10072_v44 = vld [vmem:[%s13992_s3 + $0x7c] ss:$12 sps:$4 sm:$0xff]  }
 0x52d   :  { %8892 = vmatpush3.bf16.msra.mxu1 %v8891_v62  ;;  %v8930_v62 = vpack.c.bf16 %v4823_v59, %v4822_v58  ;;  %v10075_v58 = vld [vmem:[%s13992_s3 + $0x94] ss:$12 sps:$4 sm:$0xff]   ;;  %v10073_v59 = vld [vmem:[%s13992_s3 + $0x90] ss:$12 sps:$4 sm:$0xff]  }
 0x52e   :  { %8894 = vmatprep.subr.bf16.mxu1 %v8893_v63 }
 0x531   :  { %8896 = vmatpush3.bf16.msra.mxu1 %v8895_v5  ;;  %v4985_v5 = vld [vmem:[%s13991_s12] sm:$0xff] }
 0x532   :  { %8898 = vmatprep.subr.bf16.mxu1 %v8897_v6  ;;  %v4989_v6 = vld [vmem:[%s13991_s12 + $0x20] sm:$0xff] }
 0x533   :  { %v8934_v7 = vpack.c.bf16 %v4989_v6, %v4985_v5  ;;  %v10089_v5 = vld [vmem:[%s13992_s3 + $0xf0] ss:$12 sps:$4 sm:$0xff]   ;;  %v10096_v6 = vld [vmem:[%s13992_s3 + $0x10c] ss:$12 sps:$4 sm:$0xff]  }
 0x535   :  { %8900 = vmatpush3.bf16.msra.mxu1 %v8899_v9  ;;  %v4992_v9 = vld [vmem:[%s13991_s12 + $0x38] sm:$0xff] }
 0x536   :  { %8902 = vmatprep.subr.bf16.mxu1 %v8901_v16  ;;  %v8936_v11 = vpack.c.bf16 %v4992_v9, %v4988_v8  ;;  %v10083_v16 = vld [vmem:[%s13992_s3 + $0x8] ss:$12 sps:$4 sm:$0xff]   ;;  %v10101_v8 = vld [vmem:[%s13992_s3 + $0x124] ss:$12 sps:$4 sm:$0xff]   ;;  %v10099_v9 = vld [vmem:[%s13992_s3 + $0x120] ss:$12 sps:$4 sm:$0xff]  }
 0x537   :  { %8592 = vmatpush3.bf16.msra.mxu0 %v10083_v16  ;;  %v10107_v16 = vld [vmem:[%s13992_s3 + $0x140] ss:$12 sps:$4 sm:$0xff]  }
 0x538   :  { %8593 = vmatprep.subr.bf16.mxu0 %v10087_v17  ;;  %v10108_v17 = vld [vmem:[%s13992_s3 + $0x80] ss:$12 sps:$4 sm:$0xff]  }
 0x539   :  { %8904 = vmatpush3.bf16.msra.mxu1 %v8903_v20  ;;  %v10092_v20 = vld [vmem:[%s13992_s3 + $0xf8] ss:$12 sps:$4 sm:$0xff]  }
 0x53a   :  { %8905 = vmatprep.subr.bf16.mxu1 %v10316_v54 }
 0x53b   :  { %8594 = vmatpush3.bf16.msra.mxu0 %v10088_v19  ;;  %v10111_v19 = vld [vmem:[%s13992_s3 + $0x154] ss:$12 sps:$4 sm:$0xff]  }
 0x53c   :  { %8595 = vmatprep.subr.bf16.mxu0 %v10092_v20  ;;  %v10109_v20 = vld [vmem:[%s13992_s3 + $0x150] ss:$12 sps:$4 sm:$0xff]  }
 0x5ef   :  { %v12560_v22 = vpop.f32.mrb[16].mxu1 }
 0x5f0   :  { %v4754_v23 = vmul.f32 %v12560_v22, %v12560_v22  ;;  %v12564_v33 = vpop.f32.mrb[8].mxu0  ;;  %v12566_v37 = vpop.f32.mrb[17].mxu1 }
 0x5f1   :  { %v4755_v25 = vmul.f32 %v12566_v37, %v12566_v37  ;;  %v12570_v12 = vpop.f32.mrb[9].mxu0  ;;  %v4628_v27 = vpop.f32.mrb[18].mxu1  ;;  %v4756_v61 = vmul.f32 %v12564_v33, %v12564_v33 }
 0x5f2   :  { %v4762_v34 = vrot.slane %v4754_v23, 6  ;;  %v4757_v30 = vmul.f32 %v12570_v12, %v12570_v12  ;;  %v4751_v35 = vpop.f32.mrb[10].mxu0  ;;  %v4629_v38 = vpop.f32.mrb[19].mxu1  ;;  %v10093_v23 = vld [vmem:[%s13992_s3 + $0x38] ss:$12 sps:$4 sm:$0xff]  }
 0x5f3   :  { %v4763_v56 = vrot.slane %v4755_v25, 6  ;;  %v4752_v15 = vpop.f32.mrb[11].mxu0  ;;  %v4764_v63 = vrot.slane %v4756_v61, 6  ;;  %8596 = vmatpush3.bf16.msra.mxu0 %v10093_v23  ;;  %v10097_v25 = vld [vmem:[%s13992_s3 + $0x110] ss:$12 sps:$4 sm:$0xff]  }
 0x5f4   :  { %v4765_v39 = vrot.slane %v4757_v30, 6  ;;  %v4770_v42 = vsel %vm2931_vm0, %v12560_v22, %v4762_v34  ;;  %v10098_v27 = vld [vmem:[%s13992_s3 + $0x50] ss:$12 sps:$4 sm:$0xff]   ;;  %8597 = vmatprep.subr.bf16.mxu0 %v10097_v25  ;;  %v10078_v61 = vld [vmem:[%s13992_s3 + $0xac] ss:$12 sps:$4 sm:$0xff]  }
 0x5f5   :  { %v4771_v60 = vsel %vm2931_vm0, %v12566_v37, %v4763_v56  ;;  %v4772_v0 = vsel %vm2931_vm0, %v12564_v33, %v4764_v63  ;;  %v10081_v63 = vld [vmem:[%s13992_s3 + $0xc4] ss:$12 sps:$4 sm:$0xff]  }
 0x5f6   :  { %4892 = vmatprep.mubr.f32.mxu1 %v4771_v60  ;;  %v4773_v26 = vsel %vm2931_vm0, %v12570_v12, %v4765_v39  ;;  %v10112_v23 = vld [vmem:[%s13992_s3 + $0x158] ss:$12 sps:$4 sm:$0xff]  }
 0x5f7   :  { %4893 = vmatmul.mubr.f32.vlgmr.msra.gmra.mrb[20].mxu1 %v4770_v42  ;;  %8598 = vmatpush3.bf16.msra.mxu0 %v10098_v27  ;;  %v10113_v25 = vld [vmem:[%s13992_s3 + $0x98] ss:$12 sps:$4 sm:$0xff]  }
 0x5f8   :  { %8907 = vmatpush1.bf16.msra.mxu1 %v8906_v40  ;;  %8301 = vmatprep.mubr.msk.f32.mxu1 %vm4824_vm3, %v4773_v26  ;;  %v10116_v27 = vld [vmem:[%s13992_s3 + $0x16c] ss:$12 sps:$4 sm:$0xff]  }
 0x5f9   :  { %8908 = vmatprep.subr.bf16.mxu1 %v10316_v54  ;;  %8599 = vmatprep.subr.bf16.mxu0 %v10102_v36  ;;  %v10114_v36 = vld [vmem:[%s13992_s3 + $0x168] ss:$12 sps:$4 sm:$0xff]  }
 0x5fb   :  { %8600 = vmatpush3.bf16.msra.mxu0 %v10103_v32  ;;  %v10117_v32 = vld [vmem:[%s13992_s3 + $0x170] ss:$12 sps:$4 sm:$0xff]  }
 0x5fc   :  { %8910 = vmatpush1.bf16.msra.mxu1 %v8909_v45  ;;  %8601 = vmatprep.subr.bf16.mxu0 %v10107_v16  ;;  %v10150_v16 = vld [vmem:[%s13992_s3 + $0x1e8] ss:$12 sps:$4 sm:$0xff]  }
 0x5fd   :  { %8911 = vmatprep.subr.bf16.mxu1 %v10316_v54 }
 0x5ff   :  { %8602 = vmatpush3.bf16.msra.mxu0 %v10108_v17  ;;  %v10151_v17 = vld [vmem:[%s13992_s3 + $0x200] ss:$12 sps:$4 sm:$0xff]  }
 0x600   :  { %8913 = vmatpush1.bf16.msra.mxu1 %v8912_v47  ;;  %8603 = vmatprep.subr.bf16.mxu0 %v10112_v23  ;;  %v10154_v23 = vld [vmem:[%s13992_s3 + $0x248] ss:$12 sps:$4 sm:$0xff]  }
 0x601   :  { %8914 = vmatprep.subr.bf16.mxu1 %v10316_v54 }
 0x603   :  { %8604 = vmatpush3.bf16.msra.mxu0 %v10113_v25  ;;  %v5866_v25 = vld [vmem:[%s13993_s8 + $0x80] sm:$0xff] }
 0x604   :  { %8916 = vmatpush1.bf16.msra.mxu1 %v8915_v49  ;;  %v10057_v49 = vld [vmem:[%s13992_s3 + $0x4] ss:$12 sps:$4 sm:$0xff]   ;;  %8605 = vmatprep.subr.bf16.mxu0 %v10117_v32 }
 0x605   :  { %8917 = vmatprep.subr.bf16.mxu1 %v10316_v54 }
 0x608   :  { %8919 = vmatpush1.bf16.msra.mxu1 %v8918_v52  ;;  %v10060_v52 = vld [vmem:[%s13992_s3 + $0x1c] ss:$12 sps:$4 sm:$0xff]  }
 0x609   :  { %8920 = vmatprep.subr.bf16.mxu1 %v10316_v54 }
 0x60c   :  { %8922 = vmatpush1.bf16.msra.mxu1 %v8921_v24  ;;  %v10061_v24 = vld [vmem:[%s13992_s3 + $0x30] ss:$12 sps:$4 sm:$0xff]  }
 0x60d   :  { %8923 = vmatprep.subr.bf16.mxu1 %v10316_v54 }
 0x610   :  { %8925 = vmatpush1.bf16.msra.mxu1 %v8924_v48  ;;  %v10069_v48 = vld [vmem:[%s13992_s3 + $0x64] ss:$12 sps:$4 sm:$0xff]  }
 0x611   :  { %8926 = vmatprep.subr.bf16.mxu1 %v10316_v54 }
 0x614   :  { %8928 = vmatpush1.bf16.msra.mxu1 %v8927_v57  ;;  %v10070_v57 = vld [vmem:[%s13992_s3 + $0x78] ss:$12 sps:$4 sm:$0xff]  }
 0x615   :  { %8929 = vmatprep.subr.bf16.mxu1 %v10316_v54 }
 0x618   :  { %8931 = vmatpush1.bf16.msra.mxu1 %v8930_v62  ;;  %v10076_v62 = vld [vmem:[%s13992_s3 + $0xa8] ss:$12 sps:$4 sm:$0xff]  }
 0x619   :  { %8933 = vmatprep.subr.bf16.mxu1 %v8932_v4  ;;  %v10091_v4 = vld [vmem:[%s13992_s3 + $0xf4] ss:$12 sps:$4 sm:$0xff]  }
 0x61b   :  { %4963 = vmatmul.mubr.f32.vlgmr.msra.gmra.mrb[22].mxu1 %v4772_v0  ;;  %v10079_v0 = vld [vmem:[%s13992_s3 + $0xc0] ss:$12 sps:$4 sm:$0xff]  }
 0x61c   :  { %5060 = vmatprep.mubr.f32.mxu1 %v10317_v18  ;;  %8935 = vmatpush1.bf16.msra.mxu1 %v8934_v7  ;;  %v10094_v7 = vld [vmem:[%s13992_s3 + $0x108] ss:$12 sps:$4 sm:$0xff]  }
 0x61d   :  { %8937 = vmatprep.subr.bf16.mxu1 %v8936_v11  ;;  %v10106_v11 = vld [vmem:[%s13992_s3 + $0x13c] ss:$12 sps:$4 sm:$0xff]  }
 0x6ca   :  { %v8588_v34 = vpop.f32.mrb[20].mxu1 }
 0x6cb   :  { %v8589_v30 = vpop.f32.mrb[21].mxu1 }
 0x6cc   :  { %v8590_v35 = vadd.f32 %v8589_v30, %v8588_v34  ;;  %v10118_v34 = vld [vmem:[%s13992_s3 + $0xb0] ss:$12 sps:$4 sm:$0xff]  }
 0x6cd   :  { %8606 = vmatpush3.bf16.msra.mxu0 %v10118_v34  ;;  %v10121_v30 = vld [vmem:[%s13992_s3 + $0x184] ss:$12 sps:$4 sm:$0xff]   ;;  %v5851_v34 = vld [vmem:[%s13993_s8 + $0x8] sm:$0xff] }
 0x6ee   :  { %v4964_v38 = vpop.f32.mrb[22].mxu1 }
 0x6ef   :  { %v4965_v56 = vadd.f32 %v8590_v35, %v4964_v38  ;;  %v4966_v15 = vpop.f32.mrb[23].mxu1 }
 0x6f1   :  { %v4968_v39 = vmul.f32 0.04, %v4965_v56 }
 0x6f3   :  { %v4969_v40 = vmul.f32 %v4968_v39, %v4968_v39 }
 0x6f5   :  { %v4971_v60 = vrot.slane %v4969_v40, 6 }
 0x6f7   :  { %v4973_v43 = vsub.f32 %v4968_v39, %v4971_v60 }
 0x6f9   :  { %v4974_v41 = vmax.f32 %v4973_v43, 0.0 }
 0x6fb   :  { %v4975_v42 = vadd.f32 1e-05, %v4974_v41 }
 0x6fd   :  { %10307 = vrsqrt.f32 %v4975_v42 }
 0x707   :  { %v10308_v26 = vpop.eup %10307 }
 0x708   :  { %v4978_v45 = vrot.slane %v10308_v26, 2 }
 0x70a   :  { %v4980_v47 = vmul.f32 %v4978_v45, %v4968_v39 }
 0x70c   :  { %v4982_v2 = vrot.slane %v4980_v47, 6 }
 0x70e   :  { %v4984_v50 = vsel %vm2931_vm0, %v4978_v45, %v4982_v2 }
 0x70f   :  { %8302 = vmatmul.mubr.msk.f32.vlgmr.msra.gmra.mrb[24].mxu1 %vm4824_vm3, %v4984_v50 }
 0x710   :  { %8939 = vmatpush1.bf16.msra.mxu1 %v8938_v13  ;;  %5131 = vmatprep.mubr.f32.mxu1 %v10317_v18 }
 0x711   :  { %5673 = vmatprep.subr.bf16.mxu1 %v10057_v49 }
 0x713   :  { %8303 = vmatmul.mubr.msk.f32.vlgmr.msra.gmra.mrb[26].mxu1 %vm4824_vm3, %v4984_v50 }
 0x714   :  { %5674 = vmatpush1.bf16.msra.mxu1 %v10055_v51 }
 0x715   :  { %5675 = vmatprep.subr.bf16.mxu1 %v10060_v52 }
 0x718   :  { %5676 = vmatpush1.bf16.msra.mxu1 %v10058_v21 }
 0x719   :  { %5677 = vmatprep.subr.bf16.mxu1 %v10063_v29 }
 0x71c   :  { %5678 = vmatpush1.bf16.msra.mxu1 %v10061_v24  ;;  %v10122_v24 = vld [vmem:[%s13992_s3 + $0x198] ss:$12 sps:$4 sm:$0xff]  }
 0x71d   :  { %5679 = vmatprep.subr.bf16.mxu1 %v10066_v53  ;;  %v10127_v53 = vld [vmem:[%s13992_s3 + $0x1b4] ss:$12 sps:$4 sm:$0xff]  }
 0x720   :  { %5680 = vmatpush1.bf16.msra.mxu1 %v10064_v10  ;;  %v10125_v10 = vld [vmem:[%s13992_s3 + $0x1b0] ss:$12 sps:$4 sm:$0xff]  }
 0x721   :  { %5681 = vmatprep.subr.bf16.mxu1 %v10069_v48  ;;  %v10130_v48 = vld [vmem:[%s13992_s3 + $0x1cc] ss:$12 sps:$4 sm:$0xff]  }
 0x724   :  { %5682 = vmatpush1.bf16.msra.mxu1 %v10067_v55  ;;  %v10128_v55 = vld [vmem:[%s13992_s3 + $0x1c8] ss:$12 sps:$4 sm:$0xff]  }
 0x725   :  { %5683 = vmatprep.subr.bf16.mxu1 %v10072_v44  ;;  %v10133_v44 = vld [vmem:[%s13992_s3 + $0x1e4] ss:$12 sps:$4 sm:$0xff]  }
 0x728   :  { %5684 = vmatpush1.bf16.msra.mxu1 %v10070_v57  ;;  %v10131_v57 = vld [vmem:[%s13992_s3 + $0x1e0] ss:$12 sps:$4 sm:$0xff]  }
 0x729   :  { %5685 = vmatprep.subr.bf16.mxu1 %v10075_v58  ;;  %v10136_v58 = vld [vmem:[%s13992_s3 + $0x1fc] ss:$12 sps:$4 sm:$0xff]  }
 0x72c   :  { %5686 = vmatpush1.bf16.msra.mxu1 %v10073_v59  ;;  %v10134_v59 = vld [vmem:[%s13992_s3 + $0x1f8] ss:$12 sps:$4 sm:$0xff]  }
 0x72d   :  { %5687 = vmatprep.subr.bf16.mxu1 %v10078_v61  ;;  %v10139_v61 = vld [vmem:[%s13992_s3 + $0x214] ss:$12 sps:$4 sm:$0xff]  }
 0x730   :  { %5688 = vmatpush1.bf16.msra.mxu1 %v10076_v62  ;;  %v10137_v62 = vld [vmem:[%s13992_s3 + $0x210] ss:$12 sps:$4 sm:$0xff]  }
 0x731   :  { %5689 = vmatprep.subr.bf16.mxu1 %v10081_v63  ;;  %v10142_v63 = vld [vmem:[%s13992_s3 + $0x22c] ss:$12 sps:$4 sm:$0xff]  }
 0x734   :  { %5690 = vmatpush1.bf16.msra.mxu1 %v10079_v0  ;;  %v10140_v0 = vld [vmem:[%s13992_s3 + $0x228] ss:$12 sps:$4 sm:$0xff]  }
 0x735   :  { %5691 = vmatprep.subr.bf16.mxu1 %v10086_v1 }
 0x738   :  { %5692 = vmatpush1.bf16.msra.mxu1 %v10084_v3  ;;  %v10145_v3 = vld [vmem:[%s13992_s3 + $0x244] ss:$12 sps:$4 sm:$0xff]  }
 0x739   :  { %5693 = vmatprep.subr.bf16.mxu1 %v10091_v4  ;;  %v10143_v4 = vld [vmem:[%s13992_s3 + $0x240] ss:$12 sps:$4 sm:$0xff]  }
 0x73c   :  { %5694 = vmatpush1.bf16.msra.mxu1 %v10089_v5 }
 0x73d   :  { %5695 = vmatprep.subr.bf16.mxu1 %v10096_v6  ;;  %v10146_v6 = vld [vmem:[%s13992_s3 + $0x188] ss:$12 sps:$4 sm:$0xff]  }
 0x740   :  { %5696 = vmatpush1.bf16.msra.mxu1 %v10094_v7 }
 0x741   :  { %5697 = vmatprep.subr.bf16.mxu1 %v10101_v8  ;;  %v10318_v8 = vmov 0  }
 0x744   :  { %5698 = vmatpush1.bf16.msra.mxu1 %v10099_v9  ;;  %v10147_v9 = vld [vmem:[%s13992_s3 + $0x1a0] ss:$12 sps:$4 sm:$0xff]  }
 0x745   :  { %5699 = vmatprep.subr.bf16.mxu1 %v10106_v11  ;;  %v10148_v11 = vld [vmem:[%s13992_s3 + $0x1b8] ss:$12 sps:$4 sm:$0xff]  }
 0x748   :  { %5700 = vmatpush1.bf16.msra.mxu1 %v10104_v14  ;;  %v10149_v14 = vld [vmem:[%s13992_s3 + $0x1d0] ss:$12 sps:$4 sm:$0xff]  }
 0x749   :  { %5701 = vmatprep.subr.bf16.mxu1 %v10111_v19  ;;  %v10152_v19 = vld [vmem:[%s13992_s3 + $0x218] ss:$12 sps:$4 sm:$0xff]  }
 0x74c   :  { %5702 = vmatpush1.bf16.msra.mxu1 %v10109_v20  ;;  %v10153_v20 = vld [vmem:[%s13992_s3 + $0x230] ss:$12 sps:$4 sm:$0xff]  }
 0x74d   :  { %5703 = vmatprep.subr.bf16.mxu1 %v10116_v27  ;;  %v5867_v27 = vld [vmem:[%s13993_s8 + $0x88] sm:$0xff] }
 0x74e   :  { %v8940_v32 = vpack.c.bf16 %v5867_v27, %v5866_v25 }
 0x750   :  { %5704 = vmatpush1.bf16.msra.mxu1 %v10114_v36  ;;  %v5850_v36 = vld [vmem:[%s13993_s8] sm:$0xff]  ;;  %8941 = vmatprep.subr.bf16.mxu0 %v8940_v32 }
 0x751   :  { %5714 = vmatprep.subr.bf16.mxu1 %v10121_v30  ;;  %v5868_v30 = vld [vmem:[%s13993_s8 + $0x90] sm:$0xff] }
 0x7e2   :  { %v5062_v35 = vpop.f32.mrb[24].mxu1 }
 0x7e3   :  { %v5138_v38 = vmul.f32 %v5062_v35, %v12560_v22  ;;  %v5146_v56 = vrot.slane %v5062_v35, 2  ;;  %v5064_v15 = vpop.f32.mrb[25].mxu1  ;;  %v5869_v35 = vld [vmem:[%s13993_s8 + $0x98] sm:$0xff] }
 0x7e4   :  { %v5139_v39 = vmul.f32 %v5064_v15, %v12566_v37  ;;  %v5147_v40 = vrot.slane %v5064_v15, 2  ;;  %v10119_v37 = vld [vmem:[%s13992_s3 + $0x180] ss:$12 sps:$4 sm:$0xff]   ;;  %v5852_v15 = vld [vmem:[%s13993_s8 + $0x10] sm:$0xff] }
 0x7e5   :  { %v5154_v60 = vsub.f32 %v5138_v38, %v5146_v56  ;;  %v8942_v38 = vpack.c.bf16 %v5851_v34, %v5850_v36  ;;  %v8944_v56 = vpack.c.bf16 %v5869_v35, %v5868_v30  ;;  %v5884_v30 = vld [vmem:[%s13993_s8 + $0x110] sm:$0xff]  ;;  %v5885_v35 = vld [vmem:[%s13993_s8 + $0x118] sm:$0xff] }
 0x7e6   :  { %v5155_v43 = vsub.f32 %v5139_v39, %v5147_v40  ;;  %v5133_v41 = vpop.f32.mrb[26].mxu1  ;;  %v5853_v39 = vld [vmem:[%s13993_s8 + $0x18] sm:$0xff]  ;;  %v5870_v40 = vld [vmem:[%s13993_s8 + $0xa0] sm:$0xff] }
 0x7e7   :  { %v5158_v42 = vmul.f32 0.2, %v5154_v60  ;;  %v5140_v26 = vmul.f32 %v5133_v41, %v12564_v33  ;;  %v5148_v45 = vrot.slane %v5133_v41, 2  ;;  %v5135_v28 = vpop.f32.mrb[27].mxu1  ;;  %v10124_v33 = vld [vmem:[%s13992_s3 + $0x19c] ss:$12 sps:$4 sm:$0xff]  }
 0x7e8   :  { %v5159_v46 = vmul.f32 0.2, %v5155_v43  ;;  %v5141_v47 = vmul.f32 %v5135_v28, %v12570_v12  ;;  %v5149_v2 = vrot.slane %v5135_v28, 2  ;;  %v5873_v28 = vld [vmem:[%s13993_s8 + $0xb8] sm:$0xff] }
 0x7e9   :  { %v5162_v13 = vmax.f32 %v5154_v60, %v5158_v42  ;;  %v5156_v49 = vsub.f32 %v5140_v26, %v5148_v45  ;;  %v5871_v60 = vld [vmem:[%s13993_s8 + $0xa8] sm:$0xff]  ;;  %v5854_v42 = vld [vmem:[%s13993_s8 + $0x20] sm:$0xff]  ;;  %v5872_v45 = vld [vmem:[%s13993_s8 + $0xb0] sm:$0xff] }
 0x7ea   :  { %v5157_v22 = vsub.f32 %v5141_v47, %v5149_v2  ;;  %v5163_v50 = vmax.f32 %v5155_v43, %v5159_v46  ;;  %v8946_v43 = vpack.c.bf16 %v5853_v39, %v5852_v15  ;;  %v8948_v41 = vpack.c.bf16 %v5871_v60, %v5870_v40  ;;  %v5855_v26 = vld [vmem:[%s13993_s8 + $0x28] sm:$0xff]  ;;  %v5856_v2 = vld [vmem:[%s13993_s8 + $0x30] sm:$0xff] }
 0x7eb   :  { %v5166_v21 = vpack.c.bf16 %v5162_v13, %v5162_v13  ;;  %v5160_v1 = vmul.f32 0.2, %v5156_v49  ;;  %v8950_v46 = vpack.c.bf16 %v5855_v26, %v5854_v42  ;;  %v8952_v47 = vpack.c.bf16 %v5873_v28, %v5872_v45  ;;  %v5857_v13 = vld [vmem:[%s13993_s8 + $0x38] sm:$0xff]  ;;  %v6048_v45 = vld [vmem:[%s13994_s13 + $0x8] sm:$0xff]  ;;  %v6051_v28 = vld [vmem:[%s13994_s13 + $0x20] sm:$0xff] }
 0x7ec   :  { %v5161_v51 = vmul.f32 0.2, %v5157_v22  ;;  %v5167_v52 = vpack.c.bf16 %v5163_v50, %v5163_v50  ;;  %v8954_v50 = vpack.c.bf16 %v5857_v13, %v5856_v2  ;;  %v6050_v2 = vld [vmem:[%s13994_s13 + $0x18] sm:$0xff] }
 0x7ed   :  { %v5164_v5 = vmax.f32 %v5156_v49, %v5160_v1  ;;  %v5874_v49 = vld [vmem:[%s13993_s8 + $0xc0] sm:$0xff]  ;;  %v5865_v1 = vld [vmem:[%s13993_s8 + $0x78] sm:$0xff] }
 0x7ee   :  { %v5165_v29 = vmax.f32 %v5157_v22, %v5161_v51  ;;  %5705 = vmatprep.mubr.bf16.mxu1 %v5167_v52  ;;  %5787 = vmatprep.mubr.bf16.mxu0 %v5167_v52  ;;  %v5875_v22 = vld [vmem:[%s13993_s8 + $0xc8] sm:$0xff]  ;;  %v5858_v52 = vld [vmem:[%s13993_s8 + $0x40] sm:$0xff] }
 0x7ef   :  { %5706 = vmatmul.mubr.bf16.vlgmr.msra.gmra.mrb[28].mxu1 %v5166_v21  ;;  %5788 = vmatmul.mubr.bf16.vlgmr.msra.gmra.mrb[12].mxu0 %v5166_v21  ;;  %v5168_v7 = vpack.c.bf16 %v5164_v5, %v5164_v5  ;;  %v8956_v51 = vpack.c.bf16 %v5875_v22, %v5874_v49  ;;  %v5876_v21 = vld [vmem:[%s13993_s8 + $0xd0] sm:$0xff]  ;;  %v6054_v49 = vld [vmem:[%s13994_s13 + $0x38] sm:$0xff] }
 0x7f0   :  { %v5169_v12 = vpack.c.bf16 %v5165_v29, %v5165_v29  ;;  %5715 = vmatpush1.bf16.msra.mxu1 %v10119_v37  ;;  %8943 = vmatpush3.bf16.msra.mxu0 %v8942_v38  ;;  %v5859_v37 = vld [vmem:[%s13993_s8 + $0x48] sm:$0xff]  ;;  %v6057_v22 = vld [vmem:[%s13994_s13 + $0x50] sm:$0xff] }
 0x7f1   :  { %5716 = vmatprep.subr.bf16.mxu1 %v10124_v33  ;;  %8945 = vmatprep.subr.bf16.mxu0 %v8944_v56  ;;  %v5877_v33 = vld [vmem:[%s13993_s8 + $0xd8] sm:$0xff]  ;;  %v8958_v29 = vpack.c.bf16 %v5859_v37, %v5858_v52  ;;  %v8976_v56 = vpack.c.bf16 %v5885_v35, %v5884_v30  ;;  %v6056_v52 = vld [vmem:[%s13994_s13 + $0x48] sm:$0xff] }
 0x7f2   :  { %8379 = vmatprep.mubr.msk.bf16.mxu1 %vm4824_vm3, %v5169_v12 }
 0x7f4   :  { %5717 = vmatpush1.bf16.msra.mxu1 %v10122_v24  ;;  %8947 = vmatpush3.bf16.msra.mxu0 %v8946_v43  ;;  %v5860_v24 = vld [vmem:[%s13993_s8 + $0x50] sm:$0xff] }
 0x7f5   :  { %5718 = vmatprep.subr.bf16.mxu1 %v10127_v53  ;;  %8949 = vmatprep.subr.bf16.mxu0 %v8948_v41  ;;  %v5861_v53 = vld [vmem:[%s13993_s8 + $0x58] sm:$0xff] }
 0x7f8   :  { %5719 = vmatpush1.bf16.msra.mxu1 %v10125_v10  ;;  %8951 = vmatpush3.bf16.msra.mxu0 %v8950_v46  ;;  %v8962_v10 = vpack.c.bf16 %v5861_v53, %v5860_v24  ;;  %v8978_v46 = vpack.c.bf16 %v6051_v28, %v6048_v45  ;;  %v10163_v24 = vld [vmem:[%s13995_s4 + $0x24] ss:$8 sps:$4 sm:$0xff]   ;;  %v10161_v53 = vld [vmem:[%s13995_s4 + $0x20] ss:$8 sps:$4 sm:$0xff]   ;;  %v6058_v28 = vld [vmem:[%s13994_s13 + $0x58] sm:$0xff] }
 0x7f9   :  { %5720 = vmatprep.subr.bf16.mxu1 %v10130_v48  ;;  %8953 = vmatprep.subr.bf16.mxu0 %v8952_v47  ;;  %v5878_v48 = vld [vmem:[%s13993_s8 + $0xe0] sm:$0xff] }
 0x7fa   :  { %v6047_v47 = vld [vmem:[%s13994_s13] sm:$0xff] }
 0x7fb   :  { %v8980_v13 = vpack.c.bf16 %v6050_v2, %v6047_v47  ;;  %v6055_v45 = vld [vmem:[%s13994_s13 + $0x40] sm:$0xff]  ;;  %v10196_v2 = vld [vmem:[%s13995_s4 + $0xd4] ss:$8 sps:$4 sm:$0xff]  }
 0x7fc   :  { %5721 = vmatpush1.bf16.msra.mxu1 %v10128_v55  ;;  %8955 = vmatpush3.bf16.msra.mxu0 %v8954_v50  ;;  %v5879_v55 = vld [vmem:[%s13993_s8 + $0xe8] sm:$0xff]  ;;  %v8982_v50 = vpack.c.bf16 %v6057_v22, %v6054_v49  ;;  %v8990_v47 = vpack.c.bf16 %v6058_v28, %v6055_v45  ;;  %v10202_v22 = vld [vmem:[%s13995_s4 + $0xf4] ss:$8 sps:$4 sm:$0xff]  }
 0x7fd   :  { %5722 = vmatprep.subr.bf16.mxu1 %v10133_v44  ;;  %8957 = vmatprep.subr.bf16.mxu0 %v8956_v51  ;;  %v8964_v44 = vpack.c.bf16 %v5879_v55, %v5878_v48  ;;  %v6053_v51 = vld [vmem:[%s13994_s13 + $0x30] sm:$0xff]  ;;  %v10169_v55 = vld [vmem:[%s13995_s4 + $0x44] ss:$8 sps:$4 sm:$0xff]  }
 0x7fe   :  { %v8984_v37 = vpack.c.bf16 %v6056_v52, %v6053_v51  ;;  %v10164_v48 = vld [vmem:[%s13995_s4 + $0x30] ss:$8 sps:$4 sm:$0xff]   ;;  %v10199_v49 = vld [vmem:[%s13995_s4 + $0xe4] ss:$8 sps:$4 sm:$0xff]  }
 0x7ff   :  { %v10205_v51 = vld [vmem:[%s13995_s4 + $0x104] ss:$8 sps:$4 sm:$0xff]  }
 0x800   :  { %5723 = vmatpush1.bf16.msra.mxu1 %v10131_v57  ;;  %8959 = vmatpush3.bf16.msra.mxu0 %v8958_v29  ;;  %v5862_v57 = vld [vmem:[%s13993_s8 + $0x60] sm:$0xff]  ;;  %v10160_v29 = vld [vmem:[%s13995_s4 + $0x14] ss:$8 sps:$4 sm:$0xff]  }
 0x801   :  { %5724 = vmatprep.subr.bf16.mxu1 %v10136_v58  ;;  %v5863_v58 = vld [vmem:[%s13993_s8 + $0x68] sm:$0xff]  ;;  %v6554_v52 = vld [vmem:[%s13996_s9 + $0x80] sm:$0xff] }
 0x804   :  { %5725 = vmatpush1.bf16.msra.mxu1 %v10134_v59  ;;  %v8966_v59 = vpack.c.bf16 %v5863_v58, %v5862_v57  ;;  %v10172_v57 = vld [vmem:[%s13995_s4 + $0x54] ss:$8 sps:$4 sm:$0xff]   ;;  %v10170_v58 = vld [vmem:[%s13995_s4 + $0x50] ss:$8 sps:$4 sm:$0xff]  }
 0x805   :  { %5726 = vmatprep.subr.bf16.mxu1 %v10139_v61  ;;  %v5880_v61 = vld [vmem:[%s13993_s8 + $0xf0] sm:$0xff] }
 0x808   :  { %5727 = vmatpush1.bf16.msra.mxu1 %v10137_v62  ;;  %v5881_v62 = vld [vmem:[%s13993_s8 + $0xf8] sm:$0xff] }
 0x809   :  { %5728 = vmatprep.subr.bf16.mxu1 %v10142_v63  ;;  %v8968_v63 = vpack.c.bf16 %v5881_v62, %v5880_v61  ;;  %v10173_v61 = vld [vmem:[%s13995_s4 + $0x60] ss:$8 sps:$4 sm:$0xff]   ;;  %v10178_v62 = vld [vmem:[%s13995_s4 + $0x74] ss:$8 sps:$4 sm:$0xff]  }
 0x80c   :  { %5729 = vmatpush1.bf16.msra.mxu1 %v10140_v0  ;;  %v5864_v0 = vld [vmem:[%s13993_s8 + $0x70] sm:$0xff] }
 0x80d   :  { %5730 = vmatprep.subr.bf16.mxu1 %v10145_v3  ;;  %v8970_v3 = vpack.c.bf16 %v5865_v1, %v5864_v0  ;;  %v10181_v0 = vld [vmem:[%s13995_s4 + $0x84] ss:$8 sps:$4 sm:$0xff]   ;;  %v10179_v1 = vld [vmem:[%s13995_s4 + $0x80] ss:$8 sps:$4 sm:$0xff]  }
 0x810   :  { %5731 = vmatpush1.bf16.msra.mxu1 %v10143_v4 }
 0x811   :  { %5795 = vmatprep.subr.bf16.mxu1 %v10318_v8 }
 0x813   :  { %5747 = vmatmul.mubr.bf16.vlgmr.msra.gmra.mrb[28].mxu1 %v5168_v7 }
 0x814   :  { %5796 = vmatpush1.bf16.msra.mxu1 %v10146_v6  ;;  %8380 = vmatprep.mubr.msk.bf16.mxu1 %vm4824_vm3, %v5169_v12  ;;  %v8960_v12 = vpack.c.bf16 %v5877_v33, %v5876_v21  ;;  %v10155_v21 = vld [vmem:[%s13995_s4] ss:$8 sps:$4 sm:$0xff]   ;;  %v10157_v33 = vld [vmem:[%s13995_s4 + $0x4] ss:$8 sps:$4 sm:$0xff]  }
 0x815   :  { %5797 = vmatprep.subr.bf16.mxu1 %v10318_v8 }
 0x816   :  { %8961 = vmatprep.subr.bf16.mxu0 %v8960_v12  ;;  %v10158_v12 = vld [vmem:[%s13995_s4 + $0x10] ss:$8 sps:$4 sm:$0xff]  }
 0x817   :  { %8963 = vmatpush3.bf16.msra.mxu0 %v8962_v10  ;;  %v10166_v10 = vld [vmem:[%s13995_s4 + $0x34] ss:$8 sps:$4 sm:$0xff]  }
 0x818   :  { %5798 = vmatpush1.bf16.msra.mxu1 %v10147_v9  ;;  %8965 = vmatprep.subr.bf16.mxu0 %v8964_v44  ;;  %v10167_v44 = vld [vmem:[%s13995_s4 + $0x40] ss:$8 sps:$4 sm:$0xff]  }
 0x819   :  { %5799 = vmatprep.subr.bf16.mxu1 %v10318_v8 }
 0x81b   :  { %8967 = vmatpush3.bf16.msra.mxu0 %v8966_v59  ;;  %v10175_v59 = vld [vmem:[%s13995_s4 + $0x64] ss:$8 sps:$4 sm:$0xff]  }
 0x81c   :  { %5800 = vmatpush1.bf16.msra.mxu1 %v10148_v11  ;;  %8969 = vmatprep.subr.bf16.mxu0 %v8968_v63  ;;  %v10176_v63 = vld [vmem:[%s13995_s4 + $0x70] ss:$8 sps:$4 sm:$0xff]  }
 0x81d   :  { %5801 = vmatprep.subr.bf16.mxu1 %v10318_v8 }
 0x81f   :  { %8971 = vmatpush3.bf16.msra.mxu0 %v8970_v3  ;;  %v10184_v3 = vld [vmem:[%s13995_s4 + $0x94] ss:$8 sps:$4 sm:$0xff]  }
 0x820   :  { %5802 = vmatpush1.bf16.msra.mxu1 %v10149_v14  ;;  %8972 = vmatprep.subr.bf16.mxu0 %v10316_v54 }
 0x821   :  { %5803 = vmatprep.subr.bf16.mxu1 %v10318_v8 }
 0x824   :  { %5804 = vmatpush1.bf16.msra.mxu1 %v10150_v16 }
 0x825   :  { %5805 = vmatprep.subr.bf16.mxu1 %v10318_v8 }
 0x828   :  { %5806 = vmatpush1.bf16.msra.mxu1 %v10151_v17 }
 0x829   :  { %5807 = vmatprep.subr.bf16.mxu1 %v10318_v8 }
 0x82c   :  { %5808 = vmatpush1.bf16.msra.mxu1 %v10152_v19 }
 0x82d   :  { %5809 = vmatprep.subr.bf16.mxu1 %v10318_v8 }
 0x830   :  { %5810 = vmatpush1.bf16.msra.mxu1 %v10153_v20  ;;  %v5882_v20 = vld [vmem:[%s13993_s8 + $0x100] sm:$0xff] }
 0x831   :  { %5811 = vmatprep.subr.bf16.mxu1 %v10318_v8 }
 0x834   :  { %5812 = vmatpush1.bf16.msra.mxu1 %v10154_v23  ;;  %v5883_v23 = vld [vmem:[%s13993_s8 + $0x108] sm:$0xff] }
 0x835   :  { %v8973_v32 = vpack.c.bf16 %v5883_v23, %v5882_v20  ;;  %6446 = vmatprep.subr.bf16.mxu1 %v10157_v33 }
 0x837   :  { %5828 = vmatmul.mubr.bf16.vlgmr.msra.gmra.mrb[32].mxu1 %v5168_v7 }
 0x838   :  { %6447 = vmatpush1.bf16.msra.mxu1 %v10155_v21  ;;  %v6538_v21 = vld [vmem:[%s13996_s9] sm:$0xff] }
 0x839   :  { %6448 = vmatprep.subr.bf16.mxu1 %v10160_v29  ;;  %v6539_v29 = vld [vmem:[%s13996_s9 + $0x8] sm:$0xff] }
 0x83c   :  { %6449 = vmatpush1.bf16.msra.mxu1 %v10158_v12  ;;  %v6556_v12 = vld [vmem:[%s13996_s9 + $0x90] sm:$0xff] }
 0x83d   :  { %6450 = vmatprep.subr.bf16.mxu1 %v10163_v24  ;;  %v6557_v24 = vld [vmem:[%s13996_s9 + $0x98] sm:$0xff] }
 0x840   :  { %6451 = vmatpush1.bf16.msra.mxu1 %v10161_v53  ;;  %v8994_v53 = vpack.c.bf16 %v6539_v29, %v6538_v21 }
 0x841   :  { %6452 = vmatprep.subr.bf16.mxu1 %v10166_v10  ;;  %v8996_v10 = vpack.c.bf16 %v6557_v24, %v6556_v12  ;;  %v6568_v12 = vld [vmem:[%s13996_s9 + $0xf0] sm:$0xff]  ;;  %v6569_v24 = vld [vmem:[%s13996_s9 + $0xf8] sm:$0xff] }
 0x844   :  { %6453 = vmatpush1.bf16.msra.mxu1 %v10164_v48  ;;  %v6540_v48 = vld [vmem:[%s13996_s9 + $0x10] sm:$0xff] }
 0x845   :  { %6454 = vmatprep.subr.bf16.mxu1 %v10169_v55  ;;  %v6541_v55 = vld [vmem:[%s13996_s9 + $0x18] sm:$0xff] }
 0x848   :  { %6455 = vmatpush1.bf16.msra.mxu1 %v10167_v44  ;;  %v6558_v44 = vld [vmem:[%s13996_s9 + $0xa0] sm:$0xff] }
 0x849   :  { %6456 = vmatprep.subr.bf16.mxu1 %v10172_v57  ;;  %v6559_v57 = vld [vmem:[%s13996_s9 + $0xa8] sm:$0xff] }
 0x84c   :  { %6457 = vmatpush1.bf16.msra.mxu1 %v10170_v58  ;;  %v8998_v58 = vpack.c.bf16 %v6541_v55, %v6540_v48  ;;  %v6553_v48 = vld [vmem:[%s13996_s9 + $0x78] sm:$0xff] }
 0x84d   :  { %6458 = vmatprep.subr.bf16.mxu1 %v10175_v59  ;;  %v9000_v59 = vpack.c.bf16 %v6559_v57, %v6558_v44 }
 0x850   :  { %6459 = vmatpush1.bf16.msra.mxu1 %v10173_v61  ;;  %v6542_v61 = vld [vmem:[%s13996_s9 + $0x20] sm:$0xff] }
 0x851   :  { %6460 = vmatprep.subr.bf16.mxu1 %v10178_v62  ;;  %v6543_v62 = vld [vmem:[%s13996_s9 + $0x28] sm:$0xff] }
 0x854   :  { %6461 = vmatpush1.bf16.msra.mxu1 %v10176_v63  ;;  %v6560_v63 = vld [vmem:[%s13996_s9 + $0xb0] sm:$0xff] }
 0x855   :  { %6462 = vmatprep.subr.bf16.mxu1 %v10181_v0  ;;  %v6561_v0 = vld [vmem:[%s13996_s9 + $0xb8] sm:$0xff] }
 0x858   :  { %6463 = vmatpush1.bf16.msra.mxu1 %v10179_v1  ;;  %v9002_v1 = vpack.c.bf16 %v6543_v62, %v6542_v61 }
 0x859   :  { %6464 = vmatprep.subr.bf16.mxu1 %v10184_v3  ;;  %v9004_v3 = vpack.c.bf16 %v6561_v0, %v6560_v63 }
 0x8c2   :  { %v8607_v4 = vpop.f32.mrb[12].mxu0 }
 0x8c3   :  { %v8608_v5 = vpop.f32.mrb[13].mxu0 }
 0x8c4   :  { %v8609_v6 = vadd.f32 %v8608_v5, %v8607_v4  ;;  %v8610_v7 = vpop.f32.mrb[14].mxu0  ;;  %v10182_v4 = vld [vmem:[%s13995_s4 + $0x90] ss:$8 sps:$4 sm:$0xff]   ;;  %v10187_v5 = vld [vmem:[%s13995_s4 + $0xa4] ss:$8 sps:$4 sm:$0xff]  }
 0x8c5   :  { %v8611_v9 = vpop.f32.mrb[15].mxu0  ;;  %6465 = vmatpush1.bf16.msra.mxu1 %v10182_v4  ;;  %v10190_v7 = vld [vmem:[%s13995_s4 + $0xb4] ss:$8 sps:$4 sm:$0xff]  }
 0x8c6   :  { %6466 = vmatprep.subr.bf16.mxu1 %v10187_v5  ;;  %v10188_v9 = vld [vmem:[%s13995_s4 + $0xb0] ss:$8 sps:$4 sm:$0xff]  }
 0x8c7   :  { %v6544_v4 = vld [vmem:[%s13996_s9 + $0x30] sm:$0xff]  ;;  %v6545_v5 = vld [vmem:[%s13996_s9 + $0x38] sm:$0xff] }
 0x8e6   :  { %v13013_v11 = vpop.f32.mrb[28].mxu1 }
 0x8e7   :  { %v5835_v14 = vmul.f32 %v13013_v11, %v13013_v11  ;;  %v13017_v16 = vpop.f32.mrb[29].mxu1 }
 0x8e8   :  { %v5836_v17 = vmul.f32 %v13017_v16, %v13017_v16  ;;  %v5752_v19 = vpop.f32.mrb[30].mxu1 }
 0x8e9   :  { %v5841_v25 = vrot.slane %v5835_v14, 6  ;;  %v5753_v27 = vpop.f32.mrb[31].mxu1  ;;  %v10193_v14 = vld [vmem:[%s13995_s4 + $0xc4] ss:$8 sps:$4 sm:$0xff]  }
 0x8ea   :  { %v5842_v36 = vrot.slane %v5836_v17, 6  ;;  %v10191_v17 = vld [vmem:[%s13995_s4 + $0xc0] ss:$8 sps:$4 sm:$0xff]  }
 0x8eb   :  { %v5847_v38 = vsel %vm2931_vm0, %v13013_v11, %v5841_v25 }
 0x8ec   :  { %v5848_v34 = vsel %vm2931_vm0, %v13017_v16, %v5842_v36 }
 0x8ed   :  { %5954 = vmatprep.mubr.f32.mxu0 %v5848_v34 }
 0x8ee   :  { %5955 = vmatmul.mubr.f32.vlgmr.msra.gmra.mrb[16].mxu0 %v5847_v38 }
 0x8ef   :  { %8974 = vmatpush3.bf16.msra.mxu0 %v8973_v32  ;;  %8771 = vmatprep.mubr.msk.f32.mxu0 %vm10319_vm4, %v10317_v18 }
 0x8f0   :  { %8975 = vmatprep.subr.bf16.mxu0 %v10316_v54 }
 0x8f3   :  { %8977 = vmatpush3.bf16.msra.mxu0 %v8976_v56 }
 0x8f4   :  { %8979 = vmatprep.subr.bf16.mxu0 %v8978_v46 }
 0x90a   :  { %v5829_v15 = vpop.f32.mrb[32].mxu1 }
 0x90b   :  { %v13040_v39 = vadd.f32 %v8609_v6, %v5829_v15  ;;  %v5831_v40 = vpop.f32.mrb[33].mxu1  ;;  %v10185_v6 = vld [vmem:[%s13995_s4 + $0xa0] ss:$8 sps:$4 sm:$0xff]  }
 0x90c   :  { %v5832_v60 = vpop.f32.mrb[34].mxu1  ;;  %6467 = vmatpush1.bf16.msra.mxu1 %v10185_v6  ;;  %v6562_v6 = vld [vmem:[%s13996_s9 + $0xc0] sm:$0xff] }
 0x90d   :  { %v5837_v43 = vmul.f32 %v13040_v39, %v13040_v39  ;;  %v5833_v41 = vpop.f32.mrb[35].mxu1  ;;  %6468 = vmatprep.subr.bf16.mxu1 %v10190_v7  ;;  %v6049_v60 = vld [vmem:[%s13994_s13 + $0x10] sm:$0xff]  ;;  %v6563_v7 = vld [vmem:[%s13996_s9 + $0xc8] sm:$0xff] }
 0x90f   :  { %v5843_v42 = vrot.slane %v5837_v43, 6  ;;  %v6052_v43 = vld [vmem:[%s13994_s13 + $0x28] sm:$0xff] }
 0x910   :  { %6469 = vmatpush1.bf16.msra.mxu1 %v10188_v9  ;;  %v9006_v9 = vpack.c.bf16 %v6545_v5, %v6544_v4  ;;  %v6658_v4 = vld [vmem:[%s13997_s14 + $0x8] sm:$0xff]  ;;  %v6660_v5 = vld [vmem:[%s13997_s14 + $0x18] sm:$0xff] }
 0x911   :  { %v5849_v26 = vsel %vm2931_vm0, %v13040_v39, %v5843_v42  ;;  %6470 = vmatprep.subr.bf16.mxu1 %v10193_v14  ;;  %v9008_v14 = vpack.c.bf16 %v6563_v7, %v6562_v6  ;;  %v9024_v6 = vpack.c.bf16 %v6660_v5, %v6658_v4  ;;  %v6657_v7 = vld [vmem:[%s13997_s14] sm:$0xff] }
 0x912   :  { %8772 = vmatmul.mubr.msk.f32.vlgmr.msra.gmra.mrb[18].mxu0 %vm5886_vm5, %v5849_v26  ;;  %v8987_v26 = vpack.c.bf16 %v6052_v43, %v6049_v60 }
 0x913   :  { %6126 = vmatprep.mubr.f32.mxu0 %v10317_v18  ;;  %8981 = vmatpush1.bf16.msra.mxu0 %v8980_v13  ;;  %v10194_v13 = vld [vmem:[%s13995_s4 + $0xd0] ss:$8 sps:$4 sm:$0xff]  }
 0x914   :  { %8983 = vmatprep.subr.bf16.mxu0 %v8982_v50  ;;  %6471 = vmatpush1.bf16.msra.mxu1 %v10191_v17  ;;  %v10200_v50 = vld [vmem:[%s13995_s4 + $0xf0] ss:$8 sps:$4 sm:$0xff]   ;;  %v6546_v17 = vld [vmem:[%s13996_s9 + $0x40] sm:$0xff] }
 0x915   :  { %6472 = vmatprep.subr.bf16.mxu1 %v10196_v2 }
 0x917   :  { %8985 = vmatpush1.bf16.msra.mxu0 %v8984_v37  ;;  %v6555_v37 = vld [vmem:[%s13996_s9 + $0x88] sm:$0xff] }
 0x918   :  { %8986 = vmatprep.subr.bf16.mxu0 %v10316_v54  ;;  %6473 = vmatpush1.bf16.msra.mxu1 %v10194_v13  ;;  %v8992_v33 = vpack.c.bf16 %v6555_v37, %v6554_v52  ;;  %v6566_v52 = vld [vmem:[%s13996_s9 + $0xe0] sm:$0xff]  ;;  %v6567_v37 = vld [vmem:[%s13996_s9 + $0xe8] sm:$0xff] }
 0x919   :  { %6474 = vmatprep.subr.bf16.mxu1 %v10199_v49  ;;  %v9016_v21 = vpack.c.bf16 %v6567_v37, %v6566_v52  ;;  %v10254_v52 = vld [vmem:[%s13998_s5 + $0xe8] ss:$16 sps:$4 sm:$0xff]   ;;  %v10262_v37 = vld [vmem:[%s13998_s5 + $0x10c] ss:$16 sps:$4 sm:$0xff]  }
 0x9c1   :  { %v8645_v19 = vpop.f32.mrb[16].mxu0 }
 0x9c2   :  { %v8646_v20 = vpop.f32.mrb[17].mxu0 }
 0x9c3   :  { %v8647_v23 = vadd.f32 %v8646_v20, %v8645_v19  ;;  %v6547_v19 = vld [vmem:[%s13996_s9 + $0x48] sm:$0xff]  ;;  %v6564_v20 = vld [vmem:[%s13996_s9 + $0xd0] sm:$0xff] }
 0x9e5   :  { %v6026_v25 = vpop.f32.mrb[18].mxu0 }
 0x9e6   :  { %v6027_v27 = vadd.f32 %v8647_v23, %v6026_v25  ;;  %v8773_v36 = vpop.f32.mrb[19].mxu0  ;;  %v6565_v23 = vld [vmem:[%s13996_s9 + $0xd8] sm:$0xff]  ;;  %v9010_v25 = vpack.c.bf16 %v6547_v19, %v6546_v17  ;;  %v6662_v17 = vld [vmem:[%s13997_s14 + $0x28] sm:$0xff] }
 0x9e7   :  { %v6548_v36 = vld [vmem:[%s13996_s9 + $0x50] sm:$0xff]  ;;  %v6664_v19 = vld [vmem:[%s13997_s14 + $0x38] sm:$0xff] }
 0x9e8   :  { %v6030_v32 = vmul.f32 0.11111111, %v6027_v27  ;;  %v9012_v27 = vpack.c.bf16 %v6565_v23, %v6564_v20  ;;  %v9028_v20 = vpack.c.bf16 %v6664_v19, %v6662_v17  ;;  %v6661_v23 = vld [vmem:[%s13997_s14 + $0x20] sm:$0xff] }
 0x9e9   :  { %v10215_v19 = vld [vmem:[%s13998_s5 + $0x20] ss:$16 sps:$4 sm:$0xff]  }
 0x9ea   :  { %v6031_v34 = vmul.f32 %v6030_v32, %v6030_v32 }
 0x9ec   :  { %v6033_v30 = vrot.slane %v6031_v34, 6 }
 0x9ee   :  { %v6035_v35 = vsub.f32 %v6030_v32, %v6033_v30 }
 0x9f0   :  { %v6036_v38 = vmax.f32 %v6035_v35, 0.0 }
 0x9f2   :  { %v6037_v56 = vadd.f32 1e-05, %v6036_v38 }
 0x9f4   :  { %10309 = vrsqrt.f32 %v6037_v56 }
 0x9fe   :  { %v10310_v15 = vpop.eup %10309 }
 0x9ff   :  { %v6040_v40 = vrot.slane %v10310_v15, 2 }
 0xa01   :  { %v6042_v41 = vmul.f32 %v6040_v40, %v6030_v32  ;;  %v6549_v32 = vld [vmem:[%s13996_s9 + $0x58] sm:$0xff] }
 0xa02   :  { %v9014_v34 = vpack.c.bf16 %v6549_v32, %v6548_v36  ;;  %v6666_v36 = vld [vmem:[%s13997_s14 + $0x48] sm:$0xff]  ;;  %v6668_v32 = vld [vmem:[%s13997_s14 + $0x58] sm:$0xff] }
 0xa03   :  { %v6044_v42 = vrot.slane %v6042_v41, 6 }
 0xa05   :  { %v6046_v46 = vsel %vm2931_vm0, %v6040_v40, %v6044_v42 }
 0xa06   :  { %8382 = vmatmul.mubr.msk.f32.vlgmr.msra.gmra.mrb[20].mxu0 %vm5886_vm5, %v6046_v46 }
 0xa07   :  { %8988 = vmatpush3.bf16.msra.mxu0 %v8987_v26  ;;  %8782 = vmatprep.mubr.msk.f32.mxu0 %vm10319_vm4, %v10317_v18 }
 0xa08   :  { %8989 = vmatprep.subr.bf16.mxu0 %v10316_v54  ;;  %v10197_v54 = vld [vmem:[%s13995_s4 + $0xe0] ss:$8 sps:$4 sm:$0xff]  }
 0xa09   :  { %6475 = vmatpush1.bf16.msra.mxu1 %v10197_v54 }
 0xa0a   :  { %6476 = vmatprep.subr.bf16.mxu1 %v10202_v22 }
 0xa0b   :  { %8991 = vmatpush3.bf16.msra.mxu0 %v8990_v47 }
 0xa0c   :  { %8993 = vmatprep.subr.bf16.mxu0 %v8992_v33  ;;  %v6551_v33 = vld [vmem:[%s13996_s9 + $0x68] sm:$0xff] }
 0xa0d   :  { %6477 = vmatpush1.bf16.msra.mxu1 %v10200_v50 }
 0xa0e   :  { %8783 = vmatmul.mubr.msk.f32.vlgmr.msra.gmra.mrb[22].mxu0 %vm5886_vm5, %v6046_v46  ;;  %6487 = vmatprep.subr.bf16.mxu1 %v10205_v51 }
 0xa0f   :  { %8995 = vmatpush3.bf16.msra.mxu0 %v8994_v53  ;;  %v9020_v53 = vpack.c.bf16 %v6569_v24, %v6568_v12  ;;  %v10272_v12 = vld [vmem:[%s13998_s5 + $0x148] ss:$16 sps:$4 sm:$0xff]   ;;  %v10280_v24 = vld [vmem:[%s13998_s5 + $0x16c] ss:$16 sps:$4 sm:$0xff]  }
 0xa10   :  { %8997 = vmatprep.subr.bf16.mxu0 %v8996_v10  ;;  %v6552_v10 = vld [vmem:[%s13996_s9 + $0x70] sm:$0xff] }
 0xa11   :  { %v9022_v55 = vpack.c.bf16 %v6553_v48, %v6552_v10  ;;  %v10286_v10 = vld [vmem:[%s13998_s5 + $0x18c] ss:$16 sps:$4 sm:$0xff]   ;;  %v10284_v48 = vld [vmem:[%s13998_s5 + $0x188] ss:$16 sps:$4 sm:$0xff]  }
 0xa13   :  { %8999 = vmatpush3.bf16.msra.mxu0 %v8998_v58 }
 0xa14   :  { %9001 = vmatprep.subr.bf16.mxu0 %v9000_v59 }
 0xa17   :  { %9003 = vmatpush3.bf16.msra.mxu0 %v9002_v1 }
 0xa18   :  { %9005 = vmatprep.subr.bf16.mxu0 %v9004_v3 }
 0xa1b   :  { %9007 = vmatpush3.bf16.msra.mxu0 %v9006_v9  ;;  %v6659_v9 = vld [vmem:[%s13997_s14 + $0x10] sm:$0xff] }
 0xa1c   :  { %9009 = vmatprep.subr.bf16.mxu0 %v9008_v14  ;;  %v9026_v14 = vpack.c.bf16 %v6659_v9, %v6657_v7  ;;  %v10209_v9 = vld [vmem:[%s13998_s5] ss:$16 sps:$4 sm:$0xff]  }
 0xa1f   :  { %9011 = vmatpush3.bf16.msra.mxu0 %v9010_v25  ;;  %v6663_v25 = vld [vmem:[%s13997_s14 + $0x30] sm:$0xff] }
 0xa20   :  { %9013 = vmatprep.subr.bf16.mxu0 %v9012_v27  ;;  %v9030_v27 = vpack.c.bf16 %v6663_v25, %v6661_v23  ;;  %v10221_v23 = vld [vmem:[%s13998_s5 + $0x40] ss:$16 sps:$4 sm:$0xff]   ;;  %v10229_v25 = vld [vmem:[%s13998_s5 + $0x64] ss:$16 sps:$4 sm:$0xff]  }
 0xa23   :  { %9015 = vmatpush3.bf16.msra.mxu0 %v9014_v34  ;;  %v9032_v34 = vpack.c.bf16 %v6668_v32, %v6666_v36  ;;  %v10235_v36 = vld [vmem:[%s13998_s5 + $0x84] ss:$16 sps:$4 sm:$0xff]   ;;  %v10233_v32 = vld [vmem:[%s13998_s5 + $0x80] ss:$16 sps:$4 sm:$0xff]  }
 0xa24   :  { %9017 = vmatprep.subr.bf16.mxu0 %v9016_v21  ;;  %v10260_v21 = vld [vmem:[%s13998_s5 + $0x108] ss:$16 sps:$4 sm:$0xff]  }
 0xad9   :  { %v6128_v30 = vpop.f32.mrb[20].mxu0 }
 0xada   :  { %v6203_v35 = vmul.f32 %v6128_v30, %v13013_v11  ;;  %v6209_v38 = vrot.slane %v6128_v30, 2  ;;  %v6130_v56 = vpop.f32.mrb[21].mxu0  ;;  %v10203_v11 = vld [vmem:[%s13995_s4 + $0x100] ss:$8 sps:$4 sm:$0xff]  }
 0xadb   :  { %v6204_v15 = vmul.f32 %v6130_v56, %v13017_v16  ;;  %v6210_v40 = vrot.slane %v6130_v56, 2  ;;  %v10208_v16 = vld [vmem:[%s13995_s4 + $0x114] ss:$8 sps:$4 sm:$0xff]   ;;  %v6665_v30 = vld [vmem:[%s13997_s14 + $0x40] sm:$0xff]  ;;  %v6670_v56 = vld [vmem:[%s13997_s14 + $0x68] sm:$0xff] }
 0xadc   :  { %v6215_v60 = vsub.f32 %v6203_v35, %v6209_v38  ;;  %v6667_v35 = vld [vmem:[%s13997_s14 + $0x50] sm:$0xff] }
 0xadd   :  { %v6216_v43 = vsub.f32 %v6204_v15, %v6210_v40  ;;  %v9034_v38 = vpack.c.bf16 %v6667_v35, %v6665_v30  ;;  %v6672_v15 = vld [vmem:[%s13997_s14 + $0x78] sm:$0xff]  ;;  %v10239_v30 = vld [vmem:[%s13998_s5 + $0xa0] ss:$16 sps:$4 sm:$0xff]   ;;  %v10247_v35 = vld [vmem:[%s13998_s5 + $0xc4] ss:$16 sps:$4 sm:$0xff]  }
 0xade   :  { %v6218_v41 = vmul.f32 0.2, %v6215_v60  ;;  %v9036_v40 = vpack.c.bf16 %v6672_v15, %v6670_v56  ;;  %v10253_v56 = vld [vmem:[%s13998_s5 + $0xe4] ss:$16 sps:$4 sm:$0xff]   ;;  %v10251_v15 = vld [vmem:[%s13998_s5 + $0xe0] ss:$16 sps:$4 sm:$0xff]  }
 0xadf   :  { %v6219_v42 = vmul.f32 0.2, %v6216_v43 }
 0xae0   :  { %v6221_v26 = vmax.f32 %v6215_v60, %v6218_v41  ;;  %v6669_v60 = vld [vmem:[%s13997_s14 + $0x60] sm:$0xff] }
 0xae1   :  { %v6199_v45 = vpop.f32.mrb[22].mxu0  ;;  %v6222_v28 = vmax.f32 %v6216_v43, %v6219_v42  ;;  %v6671_v43 = vld [vmem:[%s13997_s14 + $0x70] sm:$0xff] }
 0xae2   :  { %v6205_v46 = vmul.f32 %v6199_v45, %v13040_v39  ;;  %v6211_v47 = vrot.slane %v6199_v45, 2  ;;  %v8784_v2 = vpop.f32.mrb[23].mxu0  ;;  %v6224_v49 = vpack.c.bf16 %v6221_v26, %v6221_v26  ;;  %v10206_v39 = vld [vmem:[%s13995_s4 + $0x110] ss:$8 sps:$4 sm:$0xff]   ;;  %v9038_v41 = vpack.c.bf16 %v6671_v43, %v6669_v60  ;;  %v10211_v42 = vld [vmem:[%s13998_s5 + $0x4] ss:$16 sps:$4 sm:$0xff]  }
 0xae3   :  { %v6225_v13 = vpack.c.bf16 %v6222_v28, %v6222_v28  ;;  %v10212_v26 = vld [vmem:[%s13998_s5 + $0x8] ss:$16 sps:$4 sm:$0xff]   ;;  %v10214_v45 = vld [vmem:[%s13998_s5 + $0xc] ss:$16 sps:$4 sm:$0xff]   ;;  %v10257_v60 = vld [vmem:[%s13998_s5 + $0x100] ss:$16 sps:$4 sm:$0xff]  }
 0xae4   :  { %v6217_v54 = vsub.f32 %v6205_v46, %v6211_v47  ;;  %v10218_v28 = vld [vmem:[%s13998_s5 + $0x28] ss:$16 sps:$4 sm:$0xff]   ;;  %v10220_v46 = vld [vmem:[%s13998_s5 + $0x2c] ss:$16 sps:$4 sm:$0xff]   ;;  %v10265_v43 = vld [vmem:[%s13998_s5 + $0x124] ss:$16 sps:$4 sm:$0xff]  }
 0xae5   :  { %6478 = vmatprep.mubr.bf16.mxu1 %v6225_v13  ;;  %v10226_v47 = vld [vmem:[%s13998_s5 + $0x4c] ss:$16 sps:$4 sm:$0xff]   ;;  %v10224_v2 = vld [vmem:[%s13998_s5 + $0x48] ss:$16 sps:$4 sm:$0xff]  }
 0xae6   :  { %6479 = vmatmul.mubr.bf16.vlgmr.msra.gmra.mrb[36].mxu1 %v6224_v49  ;;  %v6220_v22 = vmul.f32 0.2, %v6217_v54  ;;  %v10232_v13 = vld [vmem:[%s13998_s5 + $0x6c] ss:$16 sps:$4 sm:$0xff]  }
 0xae7   :  { %6488 = vmatpush1.bf16.msra.mxu1 %v10203_v11  ;;  %6519 = vmatprep.mubr.bf16.mxu1 %v10318_v8  ;;  %v6550_v8 = vld [vmem:[%s13996_s9 + $0x60] sm:$0xff]  ;;  %v10230_v11 = vld [vmem:[%s13998_s5 + $0x68] ss:$16 sps:$4 sm:$0xff]   ;;  %v10238_v49 = vld [vmem:[%s13998_s5 + $0x8c] ss:$16 sps:$4 sm:$0xff]  }
 0xae8   :  { %6489 = vmatprep.subr.bf16.mxu1 %v10208_v16  ;;  %v6223_v50 = vmax.f32 %v6217_v54, %v6220_v22  ;;  %v9018_v29 = vpack.c.bf16 %v6551_v33, %v6550_v8  ;;  %v10236_v54 = vld [vmem:[%s13998_s5 + $0x88] ss:$16 sps:$4 sm:$0xff]   ;;  %v10244_v16 = vld [vmem:[%s13998_s5 + $0xac] ss:$16 sps:$4 sm:$0xff]  }
 0xae9   :  { %v10250_v22 = vld [vmem:[%s13998_s5 + $0xcc] ss:$16 sps:$4 sm:$0xff]   ;;  %v10266_v33 = vld [vmem:[%s13998_s5 + $0x128] ss:$16 sps:$4 sm:$0xff]  }
 0xaea   :  { %v6226_v51 = vpack.c.bf16 %v6223_v50, %v6223_v50  ;;  %9019 = vmatpush3.bf16.msra.mxu0 %v9018_v29  ;;  %v10248_v50 = vld [vmem:[%s13998_s5 + $0xc8] ss:$16 sps:$4 sm:$0xff]   ;;  %v10268_v8 = vld [vmem:[%s13998_s5 + $0x12c] ss:$16 sps:$4 sm:$0xff]  }
 0xaeb   :  { %6490 = vmatpush1.bf16.msra.mxu1 %v10206_v39  ;;  %9021 = vmatprep.subr.bf16.mxu0 %v9020_v53  ;;  %v10242_v39 = vld [vmem:[%s13998_s5 + $0xa8] ss:$16 sps:$4 sm:$0xff]   ;;  %v10274_v29 = vld [vmem:[%s13998_s5 + $0x14c] ss:$16 sps:$4 sm:$0xff]  }
 0xaec   :  { %7189 = vmatprep.subr.bf16.mxu1 %v10214_v45  ;;  %v10278_v53 = vld [vmem:[%s13998_s5 + $0x168] ss:$16 sps:$4 sm:$0xff]   ;;  %v10277_v45 = vld [vmem:[%s13998_s5 + $0x164] ss:$16 sps:$4 sm:$0xff]  }
 0xaee   :  { %9023 = vmatpush3.bf16.msra.mxu0 %v9022_v55 }
 0xaef   :  { %9025 = vmatprep.subr.bf16.mxu0 %v9024_v6 }
 0xaf2   :  { %8420 = vmatmul.mubr.msk.bf16.vlgmr.msra.gmra.mrb[36].mxu1 %vm5886_vm5, %v6226_v51  ;;  %v10256_v51 = vld [vmem:[%s13998_s5 + $0xec] ss:$16 sps:$4 sm:$0xff]  }
 0xaf3   :  { %7190 = vmatpush1.bf16.msra.mxu1 %v10212_v26  ;;  %v10269_v26 = vld [vmem:[%s13998_s5 + $0x140] ss:$16 sps:$4 sm:$0xff]  }
 0xaf4   :  { %7191 = vmatprep.subr.bf16.mxu1 %v10220_v46  ;;  %v10283_v46 = vld [vmem:[%s13998_s5 + $0x184] ss:$16 sps:$4 sm:$0xff]  }
 0xaf7   :  { %7192 = vmatpush1.bf16.msra.mxu1 %v10218_v28  ;;  %v10275_v28 = vld [vmem:[%s13998_s5 + $0x160] ss:$16 sps:$4 sm:$0xff]  }
 0xaf8   :  { %7193 = vmatprep.subr.bf16.mxu1 %v10226_v47  ;;  %v10281_v47 = vld [vmem:[%s13998_s5 + $0x180] ss:$16 sps:$4 sm:$0xff]  }
 0xafb   :  { %7194 = vmatpush1.bf16.msra.mxu1 %v10224_v2  ;;  %v10289_v2 = vld [vmem:[%s13998_s5 + $0x1a4] ss:$16 sps:$4 sm:$0xff]  }
 0xafc   :  { %7195 = vmatprep.subr.bf16.mxu1 %v10232_v13  ;;  %v10292_v13 = vld [vmem:[%s13998_s5 + $0x1ac] ss:$16 sps:$4 sm:$0xff]  }
 0xaff   :  { %7196 = vmatpush1.bf16.msra.mxu1 %v10230_v11  ;;  %v10287_v11 = vld [vmem:[%s13998_s5 + $0x1a0] ss:$16 sps:$4 sm:$0xff]  }
 0xb00   :  { %7197 = vmatprep.subr.bf16.mxu1 %v10238_v49  ;;  %v10290_v49 = vld [vmem:[%s13998_s5 + $0x1a8] ss:$16 sps:$4 sm:$0xff]  }
 0xb03   :  { %7198 = vmatpush1.bf16.msra.mxu1 %v10236_v54  ;;  %v10295_v54 = vld [vmem:[%s13998_s5 + $0x1c4] ss:$16 sps:$4 sm:$0xff]  }
 0xb04   :  { %7199 = vmatprep.subr.bf16.mxu1 %v10244_v16  ;;  %v10298_v16 = vld [vmem:[%s13998_s5 + $0x1cc] ss:$16 sps:$4 sm:$0xff]  }
 0xb07   :  { %7200 = vmatpush1.bf16.msra.mxu1 %v10242_v39  ;;  %v10293_v39 = vld [vmem:[%s13998_s5 + $0x1c0] ss:$16 sps:$4 sm:$0xff]  }
 0xb08   :  { %7201 = vmatprep.subr.bf16.mxu1 %v10250_v22  ;;  %v10296_v22 = vld [vmem:[%s13998_s5 + $0x1c8] ss:$16 sps:$4 sm:$0xff]  }
 0xb0b   :  { %7202 = vmatpush1.bf16.msra.mxu1 %v10248_v50  ;;  %v10301_v50 = vld [vmem:[%s13998_s5 + $0x1e4] ss:$16 sps:$4 sm:$0xff]  }
 0xb0c   :  { %7203 = vmatprep.subr.bf16.mxu1 %v10256_v51  ;;  %v10304_v51 = vld [vmem:[%s13998_s5 + $0x1ec] ss:$16 sps:$4 sm:$0xff]  }
 0xb0f   :  { %7204 = vmatpush1.bf16.msra.mxu1 %v10254_v52  ;;  %v10299_v52 = vld [vmem:[%s13998_s5 + $0x1e0] ss:$16 sps:$4 sm:$0xff]  }
 0xb10   :  { %7205 = vmatprep.subr.bf16.mxu1 %v10262_v37  ;;  %v10302_v37 = vld [vmem:[%s13998_s5 + $0x1e8] ss:$16 sps:$4 sm:$0xff]  }
 0xb13   :  { %7206 = vmatpush1.bf16.msra.mxu1 %v10260_v21  ;;  %v7266_v21 = vld [vmem:[%s13999_s10 + $0x80] sm:$0xff] }
 0xb14   :  { %7207 = vmatprep.subr.bf16.mxu1 %v10268_v8  ;;  %v7267_v8 = vld [vmem:[%s13999_s10 + $0x88] sm:$0xff] }
 0xb17   :  { %7208 = vmatpush1.bf16.msra.mxu1 %v10266_v33  ;;  %v7298_v33 = vld [vmem:[%s13999_s10 + $0x180] sm:$0xff] }
 0xb18   :  { %7209 = vmatprep.subr.bf16.mxu1 %v10274_v29  ;;  %v9040_v29 = vpack.c.bf16 %v7267_v8, %v7266_v21  ;;  %v7306_v21 = vld [vmem:[%s13999_s10 + $0x1c0] sm:$0xff]  ;;  %v7307_v8 = vld [vmem:[%s13999_s10 + $0x1c8] sm:$0xff] }
 0xb1b   :  { %7210 = vmatpush1.bf16.msra.mxu1 %v10272_v12  ;;  %v7299_v12 = vld [vmem:[%s13999_s10 + $0x188] sm:$0xff] }
 0xb1c   :  { %7211 = vmatprep.subr.bf16.mxu1 %v10280_v24  ;;  %v9072_v24 = vpack.c.bf16 %v7299_v12, %v7298_v33  ;;  %v7258_v12 = vld [vmem:[%s13999_s10 + $0x40] sm:$0xff] }
 0xb1f   :  { %7212 = vmatpush1.bf16.msra.mxu1 %v10278_v53 }
 0xb20   :  { %7213 = vmatprep.subr.bf16.mxu1 %v10286_v10 }
 0xb23   :  { %7214 = vmatpush1.bf16.msra.mxu1 %v10284_v48 }
 0xb24   :  { %7215 = vmatprep.subr.bf16.mxu1 %v10292_v13  ;;  %v7305_v13 = vld [vmem:[%s13999_s10 + $0x1b8] sm:$0xff] }
 0xb27   :  { %7216 = vmatpush1.bf16.msra.mxu1 %v10290_v49 }
 0xb28   :  { %7217 = vmatprep.subr.bf16.mxu1 %v10298_v16  ;;  %v7257_v16 = vld [vmem:[%s13999_s10 + $0x38] sm:$0xff] }
 0xb2b   :  { %7218 = vmatpush1.bf16.msra.mxu1 %v10296_v22 }
 0xb2c   :  { %7219 = vmatprep.subr.bf16.mxu1 %v10304_v51  ;;  %v7289_v51 = vld [vmem:[%s13999_s10 + $0x138] sm:$0xff] }
 0xb2f   :  { %7220 = vmatpush1.bf16.msra.mxu1 %v10302_v37  ;;  %v7275_v37 = vld [vmem:[%s13999_s10 + $0xc8] sm:$0xff] }
 0xb30   :  { %9073 = vmatprep.subr.bf16.mxu1 %v9072_v24  ;;  %v7259_v24 = vld [vmem:[%s13999_s10 + $0x48] sm:$0xff] }
 0xbc5   :  { %v13300_v44 = vpop.f32.mrb[36].mxu1 }
 0xbc6   :  { %v6528_v57 = vmul.f32 %v13300_v44, %v13300_v44  ;;  %v13304_v58 = vpop.f32.mrb[37].mxu1 }
 0xbc7   :  { %v6529_v59 = vmul.f32 %v13304_v58, %v13304_v58  ;;  %v6525_v61 = vpop.f32.mrb[38].mxu1 }
 0xbc8   :  { %v6532_v62 = vrot.slane %v6528_v57, 6  ;;  %v6526_v63 = vpop.f32.mrb[39].mxu1 }
 0xbc9   :  { %v6533_v0 = vrot.slane %v6529_v59, 6 }
 0xbca   :  { %v6536_v3 = vsel %vm2931_vm0, %v13300_v44, %v6532_v62 }
 0xbcb   :  { %v6537_v1 = vsel %vm2931_vm0, %v13304_v58, %v6533_v0 }
 0xbcc   :  { %6634 = vmatprep.mubr.f32.mxu0 %v6537_v1 }
 0xbcd   :  { %6635 = vmatmul.mubr.f32.vlgmr.msra.gmra.mrb[24].mxu0 %v6536_v3 }
 0xbce   :  { %6741 = vmatprep.mubr.f32.mxu0 %v10317_v18  ;;  %9027 = vmatpush1.bf16.msra.mxu0 %v9026_v14  ;;  %v10217_v14 = vld [vmem:[%s13998_s5 + $0x24] ss:$16 sps:$4 sm:$0xff]  }
 0xbcf   :  { %9029 = vmatprep.subr.bf16.mxu0 %v9028_v20  ;;  %v10223_v20 = vld [vmem:[%s13998_s5 + $0x44] ss:$16 sps:$4 sm:$0xff]  }
 0xbd2   :  { %9031 = vmatpush1.bf16.msra.mxu0 %v9030_v27  ;;  %v10227_v27 = vld [vmem:[%s13998_s5 + $0x60] ss:$16 sps:$4 sm:$0xff]  }
 0xbd3   :  { %9033 = vmatprep.subr.bf16.mxu0 %v9032_v34  ;;  %v10241_v34 = vld [vmem:[%s13998_s5 + $0xa4] ss:$16 sps:$4 sm:$0xff]  }
 0xbd6   :  { %9035 = vmatpush1.bf16.msra.mxu0 %v9034_v38  ;;  %v10245_v38 = vld [vmem:[%s13998_s5 + $0xc0] ss:$16 sps:$4 sm:$0xff]  }
 0xbd7   :  { %9037 = vmatprep.subr.bf16.mxu0 %v9036_v40  ;;  %v10259_v40 = vld [vmem:[%s13998_s5 + $0x104] ss:$16 sps:$4 sm:$0xff]  }
 0xbda   :  { %9039 = vmatpush1.bf16.msra.mxu0 %v9038_v41  ;;  %v10263_v41 = vld [vmem:[%s13998_s5 + $0x120] ss:$16 sps:$4 sm:$0xff]  }
 0xbdb   :  { %7148 = vmatprep.subr.bf16.mxu0 %v10211_v42  ;;  %v10271_v42 = vld [vmem:[%s13998_s5 + $0x144] ss:$16 sps:$4 sm:$0xff]  }
 0xca0   :  { %v8690_v55 = vpop.f32.mrb[24].mxu0 }
 0xca1   :  { %v8691_v57 = vpop.f32.mrb[25].mxu0 }
 0xca2   :  { %v8692_v59 = vadd.f32 %v8691_v57, %v8690_v55 }
 0xca4   :  { %v6640_v61 = vmul.f32 0.25, %v8692_v59 }
 0xca6   :  { %v6641_v62 = vmul.f32 %v6640_v61, %v6640_v61 }
 0xca8   :  { %v6643_v63 = vrot.slane %v6641_v62, 6 }
 0xcaa   :  { %v6645_v0 = vsub.f32 %v6640_v61, %v6643_v63 }
 0xcac   :  { %v6646_v1 = vmax.f32 %v6645_v0, 0.0 }
 0xcae   :  { %v6647_v3 = vadd.f32 1e-05, %v6646_v1  ;;  %v7250_v1 = vld [vmem:[%s13999_s10] sm:$0xff] }
 0xcb0   :  { %10311 = vrsqrt.f32 %v6647_v3  ;;  %v7251_v3 = vld [vmem:[%s13999_s10 + $0x8] sm:$0xff] }
 0xcba   :  { %v10312_v4 = vpop.eup %10311 }
 0xcbb   :  { %v6650_v5 = vrot.slane %v10312_v4, 2 }
 0xcbd   :  { %v6652_v6 = vmul.f32 %v6650_v5, %v6640_v61 }
 0xcbf   :  { %v6654_v7 = vrot.slane %v6652_v6, 6 }
 0xcc1   :  { %v6656_v17 = vsel %vm2931_vm0, %v6650_v5, %v6654_v7  ;;  %v7268_v5 = vld [vmem:[%s13999_s10 + $0x90] sm:$0xff]  ;;  %v7269_v7 = vld [vmem:[%s13999_s10 + $0x98] sm:$0xff] }
 0xcc2   :  { %8421 = vmatmul.mubr.msk.f32.vlgmr.msra.gmra.mrb[26].mxu0 %vm6673_vm6, %v6656_v17 }
 0xcc3   :  { %7149 = vmatpush1.bf16.msra.mxu0 %v10209_v9  ;;  %v7300_v9 = vld [vmem:[%s13999_s10 + $0x190] sm:$0xff] }
 0xcc4   :  { %7150 = vmatprep.subr.bf16.mxu0 %v10217_v14  ;;  %v7301_v14 = vld [vmem:[%s13999_s10 + $0x198] sm:$0xff] }
 0xcc7   :  { %7151 = vmatpush1.bf16.msra.mxu0 %v10215_v19  ;;  %v9042_v19 = vpack.c.bf16 %v7251_v3, %v7250_v1  ;;  %v7260_v1 = vld [vmem:[%s13999_s10 + $0x50] sm:$0xff] }
 0xcc8   :  { %7152 = vmatprep.subr.bf16.mxu0 %v10223_v20 }
 0xccb   :  { %7153 = vmatpush1.bf16.msra.mxu0 %v10221_v23  ;;  %v7252_v23 = vld [vmem:[%s13999_s10 + $0x10] sm:$0xff] }
 0xccc   :  { %7154 = vmatprep.subr.bf16.mxu0 %v10229_v25  ;;  %v7253_v25 = vld [vmem:[%s13999_s10 + $0x18] sm:$0xff] }
 0xccf   :  { %7155 = vmatpush1.bf16.msra.mxu0 %v10227_v27 }
 0xcd0   :  { %7156 = vmatprep.subr.bf16.mxu0 %v10235_v36  ;;  %v9044_v36 = vpack.c.bf16 %v7269_v7, %v7268_v5  ;;  %v7293_v5 = vld [vmem:[%s13999_s10 + $0x158] sm:$0xff] }
 0xcd3   :  { %7157 = vmatpush1.bf16.msra.mxu0 %v10233_v32  ;;  %v9076_v32 = vpack.c.bf16 %v7301_v14, %v7300_v9  ;;  %v7278_v9 = vld [vmem:[%s13999_s10 + $0xe0] sm:$0xff]  ;;  %v7279_v14 = vld [vmem:[%s13999_s10 + $0xe8] sm:$0xff] }
 0xcd4   :  { %7158 = vmatprep.subr.bf16.mxu0 %v10241_v34  ;;  %v7284_v34 = vld [vmem:[%s13999_s10 + $0x110] sm:$0xff] }
 0xcd7   :  { %7159 = vmatpush1.bf16.msra.mxu0 %v10239_v30  ;;  %v7285_v30 = vld [vmem:[%s13999_s10 + $0x118] sm:$0xff] }
 0xcd8   :  { %7160 = vmatprep.subr.bf16.mxu0 %v10247_v35  ;;  %v7270_v35 = vld [vmem:[%s13999_s10 + $0xa0] sm:$0xff] }
 0xcdb   :  { %7161 = vmatpush1.bf16.msra.mxu0 %v10245_v38  ;;  %v7271_v38 = vld [vmem:[%s13999_s10 + $0xa8] sm:$0xff] }
 0xcdc   :  { %7162 = vmatprep.subr.bf16.mxu0 %v10253_v56  ;;  %v7302_v56 = vld [vmem:[%s13999_s10 + $0x1a0] sm:$0xff] }
 0xcdf   :  { %7163 = vmatpush1.bf16.msra.mxu0 %v10251_v15  ;;  %v7303_v15 = vld [vmem:[%s13999_s10 + $0x1a8] sm:$0xff] }
 0xce0   :  { %7164 = vmatprep.subr.bf16.mxu0 %v10259_v40  ;;  %v9046_v40 = vpack.c.bf16 %v7253_v25, %v7252_v23  ;;  %v7262_v23 = vld [vmem:[%s13999_s10 + $0x60] sm:$0xff]  ;;  %v7263_v25 = vld [vmem:[%s13999_s10 + $0x68] sm:$0xff] }
 0xce3   :  { %7165 = vmatpush1.bf16.msra.mxu0 %v10257_v60  ;;  %v9078_v60 = vpack.c.bf16 %v7285_v30, %v7284_v34  ;;  %v7295_v34 = vld [vmem:[%s13999_s10 + $0x168] sm:$0xff] }
 0xce4   :  { %7166 = vmatprep.subr.bf16.mxu0 %v10265_v43  ;;  %v7254_v43 = vld [vmem:[%s13999_s10 + $0x20] sm:$0xff] }
 0xce7   :  { %7167 = vmatpush1.bf16.msra.mxu0 %v10263_v41  ;;  %v7255_v41 = vld [vmem:[%s13999_s10 + $0x28] sm:$0xff] }
 0xce8   :  { %7168 = vmatprep.subr.bf16.mxu0 %v10271_v42  ;;  %v9048_v42 = vpack.c.bf16 %v7271_v38, %v7270_v35  ;;  %v7280_v35 = vld [vmem:[%s13999_s10 + $0xf0] sm:$0xff]  ;;  %v7281_v38 = vld [vmem:[%s13999_s10 + $0xf8] sm:$0xff] }
 0xceb   :  { %7169 = vmatpush1.bf16.msra.mxu0 %v10269_v26  ;;  %v9080_v26 = vpack.c.bf16 %v7303_v15, %v7302_v56  ;;  %v7312_v56 = vld [vmem:[%s13999_s10 + $0x1f0] sm:$0xff]  ;;  %v9068_v15 = vpack.c.bf16 %v7281_v38, %v7280_v35 }
 0xcec   :  { %7170 = vmatprep.subr.bf16.mxu0 %v10277_v45  ;;  %v7286_v45 = vld [vmem:[%s13999_s10 + $0x120] sm:$0xff] }
 0xcef   :  { %7171 = vmatpush1.bf16.msra.mxu0 %v10275_v28  ;;  %v7287_v28 = vld [vmem:[%s13999_s10 + $0x128] sm:$0xff] }
 0xcf0   :  { %7172 = vmatprep.subr.bf16.mxu0 %v10283_v46  ;;  %v7272_v46 = vld [vmem:[%s13999_s10 + $0xb0] sm:$0xff]  ;;  %v9082_v49 = vpack.c.bf16 %v7287_v28, %v7286_v45  ;;  %v7297_v45 = vld [vmem:[%s13999_s10 + $0x178] sm:$0xff] }
 0xcf3   :  { %7173 = vmatpush1.bf16.msra.mxu0 %v10281_v47  ;;  %v7273_v47 = vld [vmem:[%s13999_s10 + $0xb8] sm:$0xff] }
 0xcf4   :  { %7174 = vmatprep.subr.bf16.mxu0 %v10289_v2  ;;  %v7304_v2 = vld [vmem:[%s13999_s10 + $0x1b0] sm:$0xff] }
 0xcf5   :  { %v9084_v22 = vpack.c.bf16 %v7305_v13, %v7304_v2 }
 0xcf7   :  { %7175 = vmatpush1.bf16.msra.mxu0 %v10287_v11  ;;  %v9050_v11 = vpack.c.bf16 %v7255_v41, %v7254_v43  ;;  %v7265_v43 = vld [vmem:[%s13999_s10 + $0x78] sm:$0xff] }
 0xcf8   :  { %7176 = vmatprep.subr.bf16.mxu0 %v10295_v54  ;;  %v7256_v54 = vld [vmem:[%s13999_s10 + $0x30] sm:$0xff] }
 0xcf9   :  { %v9054_v33 = vpack.c.bf16 %v7257_v16, %v7256_v54 }
 0xcfb   :  { %7177 = vmatpush1.bf16.msra.mxu0 %v10293_v39  ;;  %v9052_v39 = vpack.c.bf16 %v7273_v47, %v7272_v46 }
 0xcfc   :  { %7178 = vmatprep.subr.bf16.mxu0 %v10301_v50  ;;  %v7288_v50 = vld [vmem:[%s13999_s10 + $0x130] sm:$0xff] }
 0xcff   :  { %7179 = vmatpush1.bf16.msra.mxu0 %v10299_v52  ;;  %v7274_v52 = vld [vmem:[%s13999_s10 + $0xc0] sm:$0xff] }
 0xd00   :  { %9041 = vmatprep.subr.bf16.mxu0 %v9040_v29  ;;  %v9086_v29 = vpack.c.bf16 %v7289_v51, %v7288_v50 }
 0xd95   :  { %v6743_v53 = vpop.f32.mrb[26].mxu0 }
 0xd96   :  { %v6748_v10 = vmul.f32 %v6743_v53, %v13300_v44  ;;  %v6752_v48 = vrot.slane %v6743_v53, 2  ;;  %v6745_v55 = vpop.f32.mrb[27].mxu0  ;;  %v7282_v44 = vld [vmem:[%s13999_s10 + $0x100] sm:$0xff]  ;;  %v9056_v53 = vpack.c.bf16 %v7275_v37, %v7274_v52 }
 0xd97   :  { %v6749_v57 = vmul.f32 %v6745_v55, %v13304_v58  ;;  %v6753_v59 = vrot.slane %v6745_v55, 2  ;;  %v7283_v58 = vld [vmem:[%s13999_s10 + $0x108] sm:$0xff] }
 0xd98   :  { %v6756_v61 = vsub.f32 %v6748_v10, %v6752_v48  ;;  %v9074_v20 = vpack.c.bf16 %v7283_v58, %v7282_v44  ;;  %v9088_v10 = vpack.c.bf16 %v7307_v8, %v7306_v21  ;;  %v7290_v48 = vld [vmem:[%s13999_s10 + $0x140] sm:$0xff]  ;;  %v7291_v55 = vld [vmem:[%s13999_s10 + $0x148] sm:$0xff]  ;;  %v7261_v44 = vld [vmem:[%s13999_s10 + $0x58] sm:$0xff] }
 0xd99   :  { %v6757_v62 = vsub.f32 %v6749_v57, %v6753_v59  ;;  %v7276_v57 = vld [vmem:[%s13999_s10 + $0xd0] sm:$0xff]  ;;  %v7277_v59 = vld [vmem:[%s13999_s10 + $0xd8] sm:$0xff] }
 0xd9a   :  { %v6758_v63 = vmul.f32 0.2, %v6756_v61  ;;  %v9060_v3 = vpack.c.bf16 %v7277_v59, %v7276_v57  ;;  %v7292_v58 = vld [vmem:[%s13999_s10 + $0x150] sm:$0xff]  ;;  %v7478_v57 = vld [vmem:[%s14000_s15 + $0x38] sm:$0xff]  ;;  %v7475_v59 = vld [vmem:[%s14000_s15 + $0x20] sm:$0xff] }
 0xd9b   :  { %v6759_v0 = vmul.f32 0.2, %v6757_v62  ;;  %v9094_v7 = vpack.c.bf16 %v7293_v5, %v7292_v58  ;;  %v7486_v5 = vld [vmem:[%s14000_s15 + $0x78] sm:$0xff] }
 0xd9c   :  { %v6760_v4 = vmax.f32 %v6756_v61, %v6758_v63  ;;  %v7308_v61 = vld [vmem:[%s13999_s10 + $0x1d0] sm:$0xff]  ;;  %v9058_v63 = vpack.c.bf16 %v7259_v24, %v7258_v12 }
 0xd9d   :  { %v6761_v6 = vmax.f32 %v6757_v62, %v6759_v0  ;;  %v7309_v62 = vld [vmem:[%s13999_s10 + $0x1d8] sm:$0xff]  ;;  %v9090_v0 = vpack.c.bf16 %v7291_v55, %v7290_v48 }
 0xd9e   :  { %v6762_v27 = vpack.c.bf16 %v6760_v4, %v6760_v4  ;;  %v9092_v4 = vpack.c.bf16 %v7309_v62, %v7308_v61  ;;  %v7474_v48 = vld [vmem:[%s14000_s15 + $0x18] sm:$0xff] }
 0xd9f   :  { %v6763_v17 = vpack.c.bf16 %v6761_v6, %v6761_v6  ;;  %v9062_v6 = vpack.c.bf16 %v7261_v44, %v7260_v1  ;;  %v9136_v61 = vpack.c.bf16 %v7478_v57, %v7474_v48  ;;  %v7482_v44 = vld [vmem:[%s14000_s15 + $0x58] sm:$0xff]  ;;  %v7516_v48 = vld [vmem:[%s14000_s15 + $0x168] sm:$0xff] }
 0xda1   :  { %7180 = vmatprep.mubr.bf16.mxu0 %v6763_v17  ;;  %7221 = vmatprep.mubr.bf16.mxu1 %v6763_v17  ;;  %v7310_v17 = vld [vmem:[%s13999_s10 + $0x1e0] sm:$0xff] }
 0xda2   :  { %7181 = vmatmul.mubr.bf16.vlgmr.msra.gmra.mrb[28].mxu0 %v6762_v27  ;;  %7222 = vmatmul.mubr.bf16.vlgmr.msra.gmra.mrb[40].mxu1 %v6762_v27 }
 0xda3   :  { %9043 = vmatpush3.bf16.msra.mxu0 %v9042_v19  ;;  %9075 = vmatpush3.bf16.msra.mxu1 %v9074_v20  ;;  %v9064_v19 = vpack.c.bf16 %v7279_v14, %v7278_v9  ;;  %v7311_v20 = vld [vmem:[%s13999_s10 + $0x1e8] sm:$0xff]  ;;  %v9140_v9 = vpack.c.bf16 %v7486_v5, %v7482_v44 }
 0xda4   :  { %9045 = vmatprep.subr.bf16.mxu0 %v9044_v36  ;;  %9077 = vmatprep.subr.bf16.mxu1 %v9076_v32  ;;  %v9096_v27 = vpack.c.bf16 %v7311_v20, %v7310_v17  ;;  %v9066_v36 = vpack.c.bf16 %v7263_v25, %v7262_v23  ;;  %v7294_v32 = vld [vmem:[%s13999_s10 + $0x160] sm:$0xff]  ;;  %v7481_v17 = vld [vmem:[%s14000_s15 + $0x50] sm:$0xff]  ;;  %v7488_v23 = vld [vmem:[%s14000_s15 + $0x88] sm:$0xff] }
 0xda5   :  { %v9098_v30 = vpack.c.bf16 %v7295_v34, %v7294_v32  ;;  %v7492_v25 = vld [vmem:[%s14000_s15 + $0xa8] sm:$0xff]  ;;  %v7494_v32 = vld [vmem:[%s14000_s15 + $0xb8] sm:$0xff]  ;;  %v7487_v34 = vld [vmem:[%s14000_s15 + $0x80] sm:$0xff] }
 0xda6   :  { %v7524_v44 = vld [vmem:[%s14000_s15 + $0x1a8] sm:$0xff] }
 0xda7   :  { %9047 = vmatpush3.bf16.msra.mxu0 %v9046_v40  ;;  %9079 = vmatpush3.bf16.msra.mxu1 %v9078_v60  ;;  %v7313_v40 = vld [vmem:[%s13999_s10 + $0x1f8] sm:$0xff]  ;;  %v7264_v60 = vld [vmem:[%s13999_s10 + $0x70] sm:$0xff] }
 0xda8   :  { %9049 = vmatprep.subr.bf16.mxu0 %v9048_v42  ;;  %9081 = vmatprep.subr.bf16.mxu1 %v9080_v26  ;;  %v9100_v41 = vpack.c.bf16 %v7313_v40, %v7312_v56  ;;  %v9070_v42 = vpack.c.bf16 %v7265_v43, %v7264_v60  ;;  %v7296_v26 = vld [vmem:[%s13999_s10 + $0x170] sm:$0xff]  ;;  %v7496_v60 = vld [vmem:[%s14000_s15 + $0xc8] sm:$0xff] }
 0xda9   :  { %v9102_v28 = vpack.c.bf16 %v7297_v45, %v7296_v26  ;;  %v7489_v56 = vld [vmem:[%s14000_s15 + $0x90] sm:$0xff]  ;;  %v7500_v43 = vld [vmem:[%s14000_s15 + $0xe8] sm:$0xff]  ;;  %v7502_v26 = vld [vmem:[%s14000_s15 + $0xf8] sm:$0xff] }
 0xdaa   :  { %v7495_v45 = vld [vmem:[%s14000_s15 + $0xc0] sm:$0xff] }
 0xdab   :  { %9051 = vmatpush3.bf16.msra.mxu0 %v9050_v11  ;;  %9083 = vmatpush3.bf16.msra.mxu1 %v9082_v49 }
 0xdac   :  { %9053 = vmatprep.subr.bf16.mxu0 %v9052_v39  ;;  %9085 = vmatprep.subr.bf16.mxu1 %v9084_v22 }
 0xdaf   :  { %9055 = vmatpush3.bf16.msra.mxu0 %v9054_v33  ;;  %9087 = vmatpush3.bf16.msra.mxu1 %v9086_v29 }
 0xdb0   :  { %9057 = vmatprep.subr.bf16.mxu0 %v9056_v53  ;;  %9089 = vmatprep.subr.bf16.mxu1 %v9088_v10  ;;  %v7472_v53 = vld [vmem:[%s14000_s15 + $0x8] sm:$0xff] }
 0xdb1   :  { %v7476_v10 = vld [vmem:[%s14000_s15 + $0x28] sm:$0xff] }
 0xdb2   :  { %v9104_v55 = vpack.c.bf16 %v7476_v10, %v7472_v53  ;;  %v7512_v10 = vld [vmem:[%s14000_s15 + $0x148] sm:$0xff] }
 0xdb3   :  { %9059 = vmatpush3.bf16.msra.mxu0 %v9058_v63  ;;  %9091 = vmatpush3.bf16.msra.mxu1 %v9090_v0  ;;  %v7473_v63 = vld [vmem:[%s14000_s15 + $0x10] sm:$0xff]  ;;  %v9124_v57 = vpack.c.bf16 %v7516_v48, %v7512_v10 }
 0xdb4   :  { %9061 = vmatprep.subr.bf16.mxu0 %v9060_v3  ;;  %9093 = vmatprep.subr.bf16.mxu1 %v9092_v4  ;;  %v7477_v0 = vld [vmem:[%s14000_s15 + $0x30] sm:$0xff]  ;;  %v7480_v3 = vld [vmem:[%s14000_s15 + $0x48] sm:$0xff] }
 0xdb5   :  { %v9138_v1 = vpack.c.bf16 %v7477_v0, %v7473_v63  ;;  %v7484_v4 = vld [vmem:[%s14000_s15 + $0x68] sm:$0xff]  ;;  %v7513_v0 = vld [vmem:[%s14000_s15 + $0x150] sm:$0xff] }
 0xdb6   :  { %v9108_v58 = vpack.c.bf16 %v7484_v4, %v7480_v3  ;;  %v7520_v4 = vld [vmem:[%s14000_s15 + $0x188] sm:$0xff] }
 0xdb7   :  { %9063 = vmatpush3.bf16.msra.mxu0 %v9062_v6  ;;  %9095 = vmatpush3.bf16.msra.mxu1 %v9094_v7  ;;  %v7479_v6 = vld [vmem:[%s14000_s15 + $0x40] sm:$0xff]  ;;  %v9128_v5 = vpack.c.bf16 %v7524_v44, %v7520_v4 }
 0xdb8   :  { %9065 = vmatprep.subr.bf16.mxu0 %v9064_v19  ;;  %9097 = vmatprep.subr.bf16.mxu1 %v9096_v27  ;;  %v7483_v7 = vld [vmem:[%s14000_s15 + $0x60] sm:$0xff]  ;;  %v7485_v19 = vld [vmem:[%s14000_s15 + $0x70] sm:$0xff]  ;;  %v7490_v27 = vld [vmem:[%s14000_s15 + $0x98] sm:$0xff] }
 0xdb9   :  { %v9110_v14 = vpack.c.bf16 %v7483_v7, %v7479_v6  ;;  %v9142_v20 = vpack.c.bf16 %v7485_v19, %v7481_v17  ;;  %v9144_v35 = vpack.c.bf16 %v7494_v32, %v7490_v27  ;;  %v7526_v6 = vld [vmem:[%s14000_s15 + $0x1b8] sm:$0xff]  ;;  %v7519_v7 = vld [vmem:[%s14000_s15 + $0x180] sm:$0xff]  ;;  %v7521_v19 = vld [vmem:[%s14000_s15 + $0x190] sm:$0xff] }
 0xdba   :  { %v7532_v27 = vld [vmem:[%s14000_s15 + $0x1e8] sm:$0xff] }
 0xdbb   :  { %9067 = vmatpush3.bf16.msra.mxu0 %v9066_v36  ;;  %9099 = vmatpush3.bf16.msra.mxu1 %v9098_v30  ;;  %v9112_v36 = vpack.c.bf16 %v7492_v25, %v7488_v23  ;;  %v7491_v30 = vld [vmem:[%s14000_s15 + $0xa0] sm:$0xff]  ;;  %v7528_v25 = vld [vmem:[%s14000_s15 + $0x1c8] sm:$0xff] }
 0xdbc   :  { %9069 = vmatprep.subr.bf16.mxu0 %v9068_v15  ;;  %9101 = vmatprep.subr.bf16.mxu1 %v9100_v41  ;;  %v9114_v38 = vpack.c.bf16 %v7491_v30, %v7487_v34  ;;  %v7493_v15 = vld [vmem:[%s14000_s15 + $0xb0] sm:$0xff]  ;;  %v7498_v41 = vld [vmem:[%s14000_s15 + $0xd8] sm:$0xff]  ;;  %v9132_v32 = vpack.c.bf16 %v7532_v27, %v7528_v25  ;;  %v7527_v30 = vld [vmem:[%s14000_s15 + $0x1c0] sm:$0xff] }
 0xdbd   :  { %v9146_v40 = vpack.c.bf16 %v7493_v15, %v7489_v56  ;;  %v7534_v34 = vld [vmem:[%s14000_s15 + $0x1f8] sm:$0xff]  ;;  %v7529_v15 = vld [vmem:[%s14000_s15 + $0x1d0] sm:$0xff] }
 0xdbf   :  { %9071 = vmatpush3.bf16.msra.mxu0 %v9070_v42  ;;  %9103 = vmatpush3.bf16.msra.mxu1 %v9102_v28  ;;  %v9116_v42 = vpack.c.bf16 %v7500_v43, %v7496_v60  ;;  %v7499_v28 = vld [vmem:[%s14000_s15 + $0xe0] sm:$0xff] }
 0xdc0   :  { %9105 = vmatprep.subr.bf16.mxu0 %v9104_v55  ;;  %9137 = vmatprep.subr.bf16.mxu1 %v9136_v61  ;;  %v7514_v55 = vld [vmem:[%s14000_s15 + $0x158] sm:$0xff]  ;;  %v7515_v61 = vld [vmem:[%s14000_s15 + $0x160] sm:$0xff] }
 0xe75   :  { %v13748_v46 = vpop.f32.mrb[28].mxu0  ;;  %v13750_v47 = vpop.f32.mrb[40].mxu1 }
 0xe76   :  { %v7230_v2 = vmul.f32 %v13748_v46, %v13748_v46  ;;  %v7232_v13 = vmul.f32 %v13750_v47, %v13750_v47  ;;  %v13756_v11 = vpop.f32.mrb[29].mxu0  ;;  %v13758_v49 = vpop.f32.mrb[41].mxu1 }
 0xe77   :  { %v7231_v54 = vmul.f32 %v13756_v11, %v13756_v11  ;;  %v7233_v16 = vmul.f32 %v13758_v49, %v13758_v49  ;;  %v7186_v39 = vpop.f32.mrb[30].mxu0  ;;  %v7227_v22 = vpop.f32.mrb[42].mxu1 }
 0xe78   :  { %v7238_v50 = vrot.slane %v7230_v2, 6  ;;  %v7240_v51 = vrot.slane %v7232_v13, 6  ;;  %v7187_v52 = vpop.f32.mrb[31].mxu0  ;;  %v7228_v37 = vpop.f32.mrb[43].mxu1  ;;  %v9148_v2 = vpack.c.bf16 %v7502_v26, %v7498_v41  ;;  %v9118_v13 = vpack.c.bf16 %v7499_v28, %v7495_v45  ;;  %v7504_v22 = vld [vmem:[%s14000_s15 + $0x108] sm:$0xff] }
 0xe79   :  { %v7239_v21 = vrot.slane %v7231_v54, 6  ;;  %v7241_v8 = vrot.slane %v7233_v16, 6  ;;  %v7497_v54 = vld [vmem:[%s14000_s15 + $0xd0] sm:$0xff]  ;;  %v7510_v37 = vld [vmem:[%s14000_s15 + $0x138] sm:$0xff] }
 0xe7a   :  { %v7246_v12 = vsel %vm2931_vm0, %v13748_v46, %v7238_v50  ;;  %v7248_v24 = vsel %vm2931_vm0, %v13750_v47, %v7240_v51  ;;  %v7501_v16 = vld [vmem:[%s14000_s15 + $0xf0] sm:$0xff]  ;;  %v7508_v50 = vld [vmem:[%s14000_s15 + $0x128] sm:$0xff]  ;;  %v7506_v51 = vld [vmem:[%s14000_s15 + $0x118] sm:$0xff] }
 0xe7b   :  { %v7247_v33 = vsel %vm2931_vm0, %v13756_v11, %v7239_v21  ;;  %v7249_v29 = vsel %vm2931_vm0, %v13758_v49, %v7241_v8  ;;  %v9150_v39 = vpack.c.bf16 %v7501_v16, %v7497_v54  ;;  %v9120_v52 = vpack.c.bf16 %v7508_v50, %v7504_v22  ;;  %v7503_v21 = vld [vmem:[%s14000_s15 + $0x100] sm:$0xff] }
 0xe7c   :  { %7378 = vmatprep.mubr.f32.mxu0 %v7247_v33  ;;  %7448 = vmatprep.mubr.f32.mxu1 %v7249_v29  ;;  %v7507_v8 = vld [vmem:[%s14000_s15 + $0x120] sm:$0xff]  ;;  %v9152_v33 = vpack.c.bf16 %v7510_v37, %v7506_v51 }
 0xe7d   :  { %7379 = vmatmul.mubr.f32.vlgmr.msra.gmra.mrb[32].mxu0 %v7246_v12  ;;  %7449 = vmatmul.mubr.f32.vlgmr.msra.gmra.mrb[44].mxu1 %v7248_v24  ;;  %v9122_v29 = vpack.c.bf16 %v7507_v8, %v7503_v21  ;;  %v7505_v12 = vld [vmem:[%s14000_s15 + $0x110] sm:$0xff] }
 0xe7e   :  { %7599 = vmatprep.mubr.f32.mxu0 %v10317_v18  ;;  %7670 = vmatprep.mubr.f32.mxu1 %v10317_v18  ;;  %v7471_v18 = vld [vmem:[%s14000_s15] sm:$0xff]  ;;  %v7509_v24 = vld [vmem:[%s14000_s15 + $0x130] sm:$0xff] }
 0xe7f   :  { %v9106_v62 = vpack.c.bf16 %v7475_v59, %v7471_v18  ;;  %9139 = vmatpush1.bf16.msra.mxu1 %v9138_v1  ;;  %v9154_v53 = vpack.c.bf16 %v7509_v24, %v7505_v12  ;;  %v7518_v18 = vld [vmem:[%s14000_s15 + $0x178] sm:$0xff]  ;;  %v7511_v59 = vld [vmem:[%s14000_s15 + $0x140] sm:$0xff]  ;;  %v7517_v1 = vld [vmem:[%s14000_s15 + $0x170] sm:$0xff]  ;;  %v7713_v12 = vsub.s32 1, %v10491_v31  ;;  %v7709_v24 = vsub.s32 0, %v10491_v31 }
 0xe80   :  { %9141 = vmatprep.subr.bf16.mxu1 %v9140_v9  ;;  %v9126_v63 = vpack.c.bf16 %v7515_v61, %v7511_v59  ;;  %v9158_v3 = vpack.c.bf16 %v7517_v1, %v7513_v0  ;;  %v7523_v9 = vld [vmem:[%s14000_s15 + $0x1a0] sm:$0xff] }
 0xe81   :  { %9107 = vmatpush1.bf16.msra.mxu0 %v9106_v62  ;;  %v9156_v62 = vpack.c.bf16 %v7518_v18, %v7514_v55  ;;  %v9130_v17 = vpack.c.bf16 %v7523_v9, %v7519_v7 }
 0xe82   :  { %9109 = vmatprep.subr.bf16.mxu0 %v9108_v58  ;;  %v7522_v58 = vld [vmem:[%s14000_s15 + $0x198] sm:$0xff] }
 0xe83   :  { %9143 = vmatpush1.bf16.msra.mxu1 %v9142_v20  ;;  %v7525_v20 = vld [vmem:[%s14000_s15 + $0x1b0] sm:$0xff] }
 0xe84   :  { %9145 = vmatprep.subr.bf16.mxu1 %v9144_v35  ;;  %v9162_v23 = vpack.c.bf16 %v7525_v20, %v7521_v19  ;;  %v7531_v35 = vld [vmem:[%s14000_s15 + $0x1e0] sm:$0xff] }
 0xe85   :  { %9111 = vmatpush1.bf16.msra.mxu0 %v9110_v14  ;;  %v9160_v14 = vpack.c.bf16 %v7526_v6, %v7522_v58  ;;  %v9134_v56 = vpack.c.bf16 %v7531_v35, %v7527_v30  ;;  %v7721_v58 = vsub.s32 3, %v10491_v31 }
 0xe86   :  { %9113 = vmatprep.subr.bf16.mxu0 %v9112_v36  ;;  %v7530_v36 = vld [vmem:[%s14000_s15 + $0x1d8] sm:$0xff] }
 0xe87   :  { %9147 = vmatpush1.bf16.msra.mxu1 %v9146_v40  ;;  %v7533_v40 = vld [vmem:[%s14000_s15 + $0x1f0] sm:$0xff] }
 0xe88   :  { %9149 = vmatprep.subr.bf16.mxu1 %v9148_v2  ;;  %v9166_v60 = vpack.c.bf16 %v7533_v40, %v7529_v15 }
 0xe89   :  { %9115 = vmatpush1.bf16.msra.mxu0 %v9114_v38  ;;  %v9164_v38 = vpack.c.bf16 %v7534_v34, %v7530_v36 }
 0xe8a   :  { %9117 = vmatprep.subr.bf16.mxu0 %v9116_v42 }
 0xe8b   :  { %9151 = vmatpush1.bf16.msra.mxu1 %v9150_v39 }
 0xe8c   :  { %9153 = vmatprep.subr.bf16.mxu1 %v9152_v33 }
 0xe8d   :  { %9119 = vmatpush1.bf16.msra.mxu0 %v9118_v13 }
 0xe8e   :  { %9121 = vmatprep.subr.bf16.mxu0 %v9120_v52 }
 0xe8f   :  { %9155 = vmatpush1.bf16.msra.mxu1 %v9154_v53  ;;  %v7717_v53 = vsub.s32 2, %v10491_v31 }
 0xe90   :  { %9157 = vmatprep.subr.bf16.mxu1 %v9156_v62 }
 0xe91   :  { %9123 = vmatpush1.bf16.msra.mxu0 %v9122_v29 }
 0xe92   :  { %9125 = vmatprep.subr.bf16.mxu0 %v9124_v57 }
 0xe93   :  { %9159 = vmatpush1.bf16.msra.mxu1 %v9158_v3 }
 0xe94   :  { %9161 = vmatprep.subr.bf16.mxu1 %v9160_v14 }
 0xe95   :  { %9127 = vmatpush1.bf16.msra.mxu0 %v9126_v63  ;;  %v7705_v63 = vld [vmem:[%s14001_s16] sm:$0xf] }
 0xe96   :  { %9129 = vmatprep.subr.bf16.mxu0 %v9128_v5  ;;  %v7710_v6 = vrot.slane %v7705_v63, %v7709_v24  ;;  %v7714_v9 = vrot.slane %v7705_v63, %v7713_v12  ;;  %v7718_v14 = vrot.slane %v7705_v63, %v7717_v53  ;;  %v7722_v25 = vrot.slane %v7705_v63, %v7721_v58 }
 0xe97   :  { %9163 = vmatpush1.bf16.msra.mxu1 %v9162_v23 }
 0xe98   :  { %9165 = vmatprep.subr.bf16.mxu1 %v9164_v38 }
 0xe99   :  { %9131 = vmatpush1.bf16.msra.mxu0 %v9130_v17 }
 0xe9a   :  { %9133 = vmatprep.subr.bf16.mxu0 %v9132_v32 }
 0xe9b   :  { %9167 = vmatpush1.bf16.msra.mxu1 %v9166_v60 }
 0xe9d   :  { %9135 = vmatpush1.bf16.msra.mxu0 %v9134_v56 }
 0xf50   :  { %v8725_v43 = vpop.f32.mrb[32].mxu0  ;;  %v8760_v41 = vpop.f32.mrb[44].mxu1 }
 0xf51   :  { %v8726_v42 = vpop.f32.mrb[33].mxu0  ;;  %v8761_v26 = vpop.f32.mrb[45].mxu1 }
 0xf52   :  { %v8727_v45 = vadd.f32 %v8726_v42, %v8725_v43  ;;  %v8762_v28 = vadd.f32 %v8761_v26, %v8760_v41 }
 0xf54   :  { %v7451_v2 = vadd.f32 %v8762_v28, %v8727_v45 }
 0xf56   :  { %v7454_v13 = vmul.f32 0.25, %v7451_v2 }
 0xf58   :  { %v7455_v54 = vmul.f32 %v7454_v13, %v7454_v13 }
 0xf5a   :  { %v7457_v16 = vrot.slane %v7455_v54, 6 }
 0xf5c   :  { %v7459_v39 = vsub.f32 %v7454_v13, %v7457_v16 }
 0xf5e   :  { %v7460_v22 = vmax.f32 %v7459_v39, 0.0 }
 0xf60   :  { %v7461_v50 = vadd.f32 1e-05, %v7460_v22 }
 0xf62   :  { %10313 = vrsqrt.f32 %v7461_v50 }
 0xf6c   :  { %v10314_v51 = vpop.eup %10313 }
 0xf6d   :  { %v7464_v52 = vrot.slane %v10314_v51, 2 }
 0xf6f   :  { %v7466_v37 = vmul.f32 %v7464_v52, %v7454_v13 }
 0xf71   :  { %v7468_v21 = vrot.slane %v7466_v37, 6 }
 0xf73   :  { %v7470_v8 = vsel %vm2931_vm0, %v7464_v52, %v7468_v21 }
 0xf74   :  { %7600 = vmatmul.mubr.f32.vlgmr.msra.gmra.mrb[34].mxu0 %v7470_v8  ;;  %7671 = vmatmul.mubr.f32.vlgmr.msra.gmra.mrb[46].mxu1 %v7470_v8 }
0x1047   :  { %v7601_v33 = vpop.f32.mrb[34].mxu0  ;;  %v7672_v29 = vpop.f32.mrb[46].mxu1 }
0x1048   :  { %v7677_v10 = vmul.f32 %v7601_v33, %v13748_v46  ;;  %v7685_v48 = vrot.slane %v7601_v33, 2  ;;  %v7679_v55 = vmul.f32 %v7672_v29, %v13750_v47  ;;  %v7687_v57 = vrot.slane %v7672_v29, 2  ;;  %v7603_v18 = vpop.f32.mrb[35].mxu0  ;;  %v7674_v59 = vpop.f32.mrb[47].mxu1 }
0x1049   :  { %v7678_v61 = vmul.f32 %v7603_v18, %v13756_v11  ;;  %v7686_v62 = vrot.slane %v7603_v18, 2  ;;  %v7680_v0 = vmul.f32 %v7674_v59, %v13758_v49  ;;  %v7688_v1 = vrot.slane %v7674_v59, 2 }
0x104a   :  { %v7693_v3 = vsub.f32 %v7677_v10, %v7685_v48  ;;  %v7695_v4 = vsub.f32 %v7679_v55, %v7687_v57 }
0x104b   :  { %v7694_v44 = vsub.f32 %v7678_v61, %v7686_v62  ;;  %v7696_v46 = vsub.f32 %v7680_v0, %v7688_v1 }
0x104c   :  { %v7697_v47 = vmul.f32 0.2, %v7693_v3  ;;  %v7699_v5 = vmul.f32 0.2, %v7695_v4 }
0x104d   :  { %v7698_v7 = vmul.f32 0.2, %v7694_v44  ;;  %v7700_v11 = vmul.f32 0.2, %v7696_v46 }
0x104e   :  { %v7701_v17 = vmax.f32 %v7693_v3, %v7697_v47  ;;  %v7703_v19 = vmax.f32 %v7695_v4, %v7699_v5 }
0x104f   :  { %v7702_v20 = vmax.f32 %v7694_v44, %v7698_v7  ;;  %v7704_v23 = vmax.f32 %v7696_v46, %v7700_v11 }
0x1050   :  { %v7727_v49 = vmul.f32 %v7710_v6, %v7701_v17  ;;  %v7729_v36 = vmul.f32 %v7718_v14, %v7703_v19 }
0x1051   :  { %v7728_v27 = vmul.f32 %v7714_v9, %v7702_v20  ;;  %v7730_v34 = vmul.f32 %v7722_v25, %v7704_v23 }
0x1052   :  { %v7731_v32 = vsel %vm2931_vm0, %v7727_v49, 0.0  ;;  %v7734_v35 = vsel %vm2931_vm0, %v7729_v36, 0.0 }
0x1053   :  { %v7732_v31 = vsel %vm2931_vm0, %v7728_v27, 0.0  ;;  %v7736_v56 = vsel %vm2931_vm0, %v7730_v34, 0.0 }
0x1054   :  { %v7733_v30 = vadd.f32 %v7732_v31, %v7731_v32 }
0x1056   :  { %v7735_v38 = vadd.f32 %v7734_v35, %v7733_v30 }
0x1058   :  { %v7737_v15 = vadd.f32 %v7736_v56, %v7735_v38 }
0x105a   :  { %7738 = vadd.xlane.f32.xlu0 %v7737_v15 }
0x10e7   :  { %v7739_v40 = vpop.xlane.xlu0 %7738 }
0x10e8   :  { %7740 = vst [vmem:[%s14002_s17] sm:$0x3] %v7739_v40 }

</bundles_post_ra>
